<compile_context>
chip_gen: v7x
topology: tpu7x:2x2x1
jax: 0.10.0
libtpu: 0.0.40
codegen_flags: <defaults>
</compile_context>

<pallas_src>
import functools

import jax
import jax.numpy as jnp
import numpy as np
from jax.experimental import pallas as pl
from jax.experimental.pallas import tpu as pltpu

LEAKY_SLOPE = 0.01          # torch.nn.LeakyReLU default
BN_EPS = 1e-5               # torch.nn.BatchNorm2d default
OBS_EPS = 1e-6

TILE_M = 512                         # row tile (multiple of 32: ok for u8/bf16/f32)
VMEM_LIMIT = 32 * 1024 * 1024        # safe on v5e/v6e/v7x


# ----------------------------------------------------------------------------
# Pallas kernels
# ----------------------------------------------------------------------------
def _matmul_bias_lrelu(x_ref, w_ref, b_ref):
    """bf16 MXU matmul (f32 accumulation) + bias + LeakyReLU; returns f32."""
    x = x_ref[...]
    if x.dtype != jnp.bfloat16:
        # uint8 network input (or f32): cast in-kernel; 0..255 exact in bf16.
        x = x.astype(jnp.float32).astype(jnp.bfloat16)
    y = jnp.dot(x, w_ref[...], preferred_element_type=jnp.float32)
    y = y + b_ref[...]
    return jnp.where(y >= 0.0, y, LEAKY_SLOPE * y)


def _gemm_lrelu_kernel(x_ref, w_ref, b_ref, y_ref):
    y_ref[...] = _matmul_bias_lrelu(x_ref, w_ref, b_ref).astype(y_ref.dtype)


def _gemm_lrelu_stats_kernel(x_ref, w_ref, b_ref, y_ref, stat_ref, *,
                             total_rows, tile_rows, need_mask):
    y = _matmul_bias_lrelu(x_ref, w_ref, b_ref)
    y_ref[...] = y.astype(y_ref.dtype)
    if need_mask:
        # Last tile may contain out-of-bounds rows: exclude them from the
        # BatchNorm statistics (jnp.where, so padded garbage never propagates).
        row = (pl.program_id(0) * tile_rows
               + jax.lax.broadcasted_iota(jnp.int32, (tile_rows, 1), 0))
        y = jnp.where(row < total_rows, y, 0.0)
    s = jnp.sum(y, axis=0, keepdims=True)            # (1, C)
    q = jnp.sum(y * y, axis=0, keepdims=True)        # (1, C)
    stat_ref[0] = jnp.concatenate([s, q], axis=0)    # (2, C) per-tile partials


# ----------------------------------------------------------------------------
# pallas_call wrappers (tiled over rows, weights resident, parallel grid)
# ----------------------------------------------------------------------------
def _compiler_params():
    return pltpu.CompilerParams(dimension_semantics=("parallel",),
                                vmem_limit_bytes=VMEM_LIMIT)


def _row_tile(m):
    return m if m <= TILE_M else TILE_M


def gemm_lrelu(x, w, b, out_dtype=jnp.float32):
    """LeakyReLU(x @ w + b); x:(M,K), w:(K,C) -> (M,C)."""
    m, k = x.shape
    c = w.shape[1]
    tile = _row_tile(m)
    grid_m = pl.cdiv(m, tile)
    return pl.pallas_call(
        _gemm_lrelu_kernel,
        grid=(grid_m,),
        in_specs=[pl.BlockSpec((tile, k), lambda i: (i, 0)),
                  pl.BlockSpec((k, c), lambda i: (0, 0)),    # resident weights
                  pl.BlockSpec((1, c), lambda i: (0, 0))],   # resident bias
        out_specs=pl.BlockSpec((tile, c), lambda i: (i, 0)),
        out_shape=jax.ShapeDtypeStruct((m, c), out_dtype),
        compiler_params=_compiler_params(),
    )(x, w.astype(jnp.bfloat16), b.reshape(1, c).astype(jnp.float32))


def gemm_lrelu_stats(x, w, b, out_dtype=jnp.bfloat16):
    """Same fused GEMM, plus per-tile (sum, sum-of-squares) over rows emitted
    from the epilogue so BatchNorm needs no extra pass over the activation."""
    m, k = x.shape
    c = w.shape[1]
    tile = _row_tile(m)
    grid_m = pl.cdiv(m, tile)
    kernel = functools.partial(_gemm_lrelu_stats_kernel,
                               total_rows=m, tile_rows=tile,
                               need_mask=(m % tile != 0))
    y, stats = pl.pallas_call(
        kernel,
        grid=(grid_m,),
        in_specs=[pl.BlockSpec((tile, k), lambda i: (i, 0)),
                  pl.BlockSpec((k, c), lambda i: (0, 0)),
                  pl.BlockSpec((1, c), lambda i: (0, 0))],
        out_specs=(pl.BlockSpec((tile, c), lambda i: (i, 0)),
                   pl.BlockSpec((1, 2, c), lambda i: (i, 0, 0))),
        out_shape=(jax.ShapeDtypeStruct((m, c), out_dtype),
                   jax.ShapeDtypeStruct((grid_m, 2, c), jnp.float32)),
        compiler_params=_compiler_params(),
    )(x, w.astype(jnp.bfloat16), b.reshape(1, c).astype(jnp.float32))
    return y, stats


# ----------------------------------------------------------------------------
# BatchNorm / normalization folding (tiny XLA glue on weight-sized tensors)
# ----------------------------------------------------------------------------
def _bn_scale_shift(stats, count):
    """Training-mode BatchNorm2d (gamma=1, beta=0) from per-tile partials."""
    total = jnp.sum(stats, axis=0)                             # (2, C)
    mean = total[0] / count
    var = jnp.maximum(total[1] / count - mean * mean, 0.0)     # biased variance
    scale = jax.lax.rsqrt(var + BN_EPS)
    shift = -mean * scale
    return scale, shift


def _fold_bn_into_next(w, b, scale, shift):
    """Fold y -> y*scale[c] + shift[c] (per input channel, channel fastest in
    the K ordering) into the following layer's (K, Cout) weight and bias."""
    cin = scale.shape[0]
    reps = w.shape[0] // cin
    col_scale = jnp.tile(scale, reps)
    col_shift = jnp.tile(shift, reps)
    return w * col_scale[:, None], b + col_shift @ w


def _fold_obs_norm(w, b, mean, std):
    """Fold (x - mean) / (std + 1e-6) into conv1's weight/bias."""
    inv = 1.0 / (std + OBS_EPS)
    return w * inv, b - mean * inv * jnp.sum(w, axis=0)


# ----------------------------------------------------------------------------
# Glue: im2col, parameter init, forward wrapper
# ----------------------------------------------------------------------------
def im2col(x, kh, kw, stride):
    """x: (N, H, W, C) -> patches (N*OH*OW, kh*kw*C); column order (kh, kw, c),
    c fastest. Keeps the input dtype (uint8 stays uint8 until the kernel)."""
    n, h, w, c = x.shape
    oh = (h - kh) // stride + 1
    ow = (w - kw) // stride + 1
    cols = []
    for i in range(kh):
        for j in range(kw):
            cols.append(x[:, i:i + stride * oh:stride, j:j + stride * ow:stride, :])
    patches = jnp.stack(cols, axis=3)                 # (N, OH, OW, kh*kw, C)
    return patches.reshape(n * oh * ow, kh * kw * c), (n, oh, ow)


def _orthogonal(key, shape, gain):
    """Orthogonal init matching torch.nn.init.orthogonal_ semantics
    (rows = shape[0], cols = prod(shape[1:]); JAX RNG, not torch RNG)."""
    rows = shape[0]
    cols = int(np.prod(shape[1:]))
    flat = (rows, cols) if rows >= cols else (cols, rows)
    a = jax.random.normal(key, flat, dtype=jnp.float32)
    q, r = jnp.linalg.qr(a)
    d = jnp.diagonal(r)
    q = q * jnp.where(d < 0, -1.0, 1.0)
    if rows < cols:
        q = q.T
    return (gain * q).reshape(shape).astype(jnp.float32)


def init_params(key, first_layer_filters, second_layer_filters, out_features):
    gain = float(np.sqrt(2.0 / (1.0 + LEAKY_SLOPE ** 2)))  # calculate_gain('leaky_relu')
    k1, k2, k3, k4 = jax.random.split(key, 4)

    def conv_w(k, cout, cin, ksz):
        w = _orthogonal(k, (cout, cin, ksz, ksz), gain)          # torch (O,I,KH,KW)
        return w.transpose(2, 3, 1, 0).reshape(ksz * ksz * cin, cout)  # (KH*KW*Cin, Cout)

    f1, f2 = first_layer_filters, second_layer_filters
    params = {
        "w1": conv_w(k1, f1, 3, 8), "b1": jnp.zeros((f1,), jnp.float32),
        "w2": conv_w(k2, f2, f1, 4), "b2": jnp.zeros((f2,), jnp.float32),
        "w3": conv_w(k3, f2, f2, 3), "b3": jnp.zeros((f2,), jnp.float32),
    }
    # Linear(64*7*7 -> out): torch weight (out, 3136), columns ordered (C,H,W).
    # Reorder to (H,W,C) so it multiplies our NHWC flatten with identical numerics.
    wfc = _orthogonal(k4, (out_features, f2 * 7 * 7), gain)
    wfc = wfc.reshape(out_features, f2, 7, 7).transpose(2, 3, 1, 0).reshape(7 * 7 * f2, out_features)
    params["wfc"] = wfc
    params["bfc"] = jnp.zeros((out_features,), jnp.float32)
    return params


def base_network_forward(x_u8, params, obs_mean, obs_std,
                         first_layer_filters, second_layer_filters):
    f1, f2 = first_layer_filters, second_layer_filters

    # conv1 (8x8 s4) + LeakyReLU; obs normalization folded into the weights,
    # uint8 patches go straight into the kernel (cast in-kernel).
    w1, b1 = _fold_obs_norm(params["w1"], params["b1"], obs_mean, obs_std)
    p1, (n, oh1, ow1) = im2col(x_u8, 8, 8, 4)
    c1, st1 = gemm_lrelu_stats(p1, w1, b1)                  # bf16 act + bn1 partials
    s1, t1 = _bn_scale_shift(st1, p1.shape[0])              # bn1 batch stats

    # conv2 (4x4 s2) + LeakyReLU; bn1 apply folded into conv2's weights.
    c1 = c1.reshape(n, oh1, ow1, f1)
    p2, (_, oh2, ow2) = im2col(c1, 4, 4, 2)
    w2, b2 = _fold_bn_into_next(params["w2"], params["b2"], s1, t1)
    c2, st2 = gemm_lrelu_stats(p2, w2, b2)
    s2, t2 = _bn_scale_shift(st2, p2.shape[0])              # bn2 batch stats

    # conv3 (3x3 s1) + LeakyReLU; bn2 apply folded into conv3's weights.
    c2 = c2.reshape(n, oh2, ow2, f2)
    p3, (_, oh3, ow3) = im2col(c2, 3, 3, 1)
    w3, b3 = _fold_bn_into_next(params["w3"], params["b3"], s2, t2)
    c3, st3 = gemm_lrelu_stats(p3, w3, b3)
    s3, t3 = _bn_scale_shift(st3, p3.shape[0])              # bn2 again, fresh batch stats

    # fully_connected + LeakyReLU; bn2(conv3) apply folded into fc weights.
    c3 = c3.reshape(n, oh3 * ow3 * f2)                      # (N, 7*7*64), (h,w,c) order
    wfc, bfc = _fold_bn_into_next(params["wfc"], params["bfc"], s3, t3)
    out = gemm_lrelu(c3, wfc, bfc, out_dtype=jnp.float32)
    return out


# TODO(synk): BatchNorm running-statistics (running_mean/var buffer updates,
#             used only in eval mode) are not modeled; the forward output
#             matches training-mode BN with batch statistics.

if __name__ == "__main__":
    FIRST, SECOND, OUT = 32, 64, 256       # SECOND must be 64 (fc expects 64*7*7)
    OBS_MEAN, OBS_STD = 128.0, 64.0

    key = jax.random.PRNGKey(0)
    k_params, k_x = jax.random.split(key)
    params = init_params(k_params, FIRST, SECOND, OUT)

    # Batch kept small; spatial must be 84x84 because fc in_features = 64*7*7.
    x = jax.random.randint(k_x, (2, 84, 84, 3), 0, 256, dtype=jnp.int32).astype(jnp.uint8)

    fwd = jax.jit(functools.partial(base_network_forward,
                                    first_layer_filters=FIRST,
                                    second_layer_filters=SECOND))
    out = fwd(x, params, jnp.float32(OBS_MEAN), jnp.float32(OBS_STD))
    out = jax.block_until_ready(out)
    assert out.shape == (2, OUT) and out.dtype == jnp.float32
    assert bool(jnp.isfinite(out).all())
    print("KERNEL_OK")
</pallas_src>

<mosaic_0001>
module attributes {stable_mosaic.version = 11 : i64} {
  func.func @_gemm_lrelu_stats_kernel(%arg0: i32, %arg1: memref<512x192xi8, #tpu.memory_space<vmem>>, %arg2: memref<192x32xbf16, #tpu.memory_space<vmem>>, %arg3: memref<1x32xf32, #tpu.memory_space<vmem>>, %arg4: memref<512x32xbf16, #tpu.memory_space<vmem>>, %arg5: memref<1x2x32xf32, #tpu.memory_space<vmem>>) attributes {dimension_semantics = [#tpu.dimension_semantics<parallel>], iteration_bounds = array<i64: 2>, scalar_prefetch = 0 : i64, scratch_operands = 0 : i64, tpu.core_type = #tpu.core_type<tc>, window_params = [{transform_indices = @transform_0, window_bounds = array<i64: 512, 192>}, {pipeline_mode = #tpu.pipeline_mode<synchronous>, transform_indices = @transform_1, window_bounds = array<i64: 192, 32>}, {pipeline_mode = #tpu.pipeline_mode<synchronous>, transform_indices = @transform_2, window_bounds = array<i64: 1, 32>}, {transform_indices = @transform_3, window_bounds = array<i64: 512, 32>}, {transform_indices = @transform_4, window_bounds = array<i64: 1, 2, 32>}]} {
    %c0 = arith.constant 0 : index
    %c0_0 = arith.constant 0 : index
    %0 = vector.load %arg1[%c0, %c0_0] : memref<512x192xi8, #tpu.memory_space<vmem>>, vector<512x192xi8>
    %1 = arith.uitofp %0 : vector<512x192xi8> to vector<512x192xf32>
    %2 = arith.truncf %1 : vector<512x192xf32> to vector<512x192xbf16>
    %c0_1 = arith.constant 0 : index
    %c0_2 = arith.constant 0 : index
    %3 = vector.load %arg2[%c0_1, %c0_2] : memref<192x32xbf16, #tpu.memory_space<vmem>>, vector<192x32xbf16>
    %cst = arith.constant dense<0.000000e+00> : vector<512x32xf32>
    %4 = tpu.matmul %2, %3, %cst {dimension_numbers = #tpu.dot_dimension_numbers<[1], [0], [0], [1], [0, 0, 1, 1], [], []>} : vector<512x192xbf16>, vector<192x32xbf16>, vector<512x32xf32> -> vector<512x32xf32>
    %c0_3 = arith.constant 0 : index
    %c0_4 = arith.constant 0 : index
    %5 = vector.load %arg3[%c0_3, %c0_4] : memref<1x32xf32, #tpu.memory_space<vmem>>, vector<1x32xf32>
    %6 = vector.broadcast %5 : vector<1x32xf32> to vector<512x32xf32>
    %7 = arith.addf %4, %6 : vector<512x32xf32>
    %cst_5 = arith.constant 0.000000e+00 : f32
    %8 = vector.broadcast %cst_5 : f32 to vector<512x32xf32>
    %9 = arith.cmpf oge, %7, %8 : vector<512x32xf32>
    %cst_6 = arith.constant 0.00999999977 : f32
    %10 = vector.broadcast %cst_6 : f32 to vector<512x32xf32>
    %11 = arith.mulf %10, %7 : vector<512x32xf32>
    %12 = arith.select %9, %7, %11 : vector<512x32xi1>, vector<512x32xf32>
    %13 = arith.truncf %12 : vector<512x32xf32> to vector<512x32xbf16>
    %c0_7 = arith.constant 0 : index
    %c0_8 = arith.constant 0 : index
    %14 = vector.load %arg4[%c0_7, %c0_8] : memref<512x32xbf16, #tpu.memory_space<vmem>>, vector<512x32xbf16>
    tpu.vector_store %arg4[%c0_7, %c0_8], %13 {strides = array<i32>} : memref<512x32xbf16, #tpu.memory_space<vmem>>, vector<512x32xbf16>,
    %c512_i32 = arith.constant 512 : i32
    %15 = arith.muli %arg0, %c512_i32 : i32
    %16 = tpu.iota {dimensions = array<i32: 0>} : vector<512x1xi32>
    %17 = vector.broadcast %15 : i32 to vector<512x1xi32>
    %18 = arith.addi %17, %16 : vector<512x1xi32>
    %c800_i32 = arith.constant 800 : i32
    %19 = vector.broadcast %c800_i32 : i32 to vector<512x1xi32>
    %20 = arith.cmpi slt, %18, %19 : vector<512x1xi32>
    %cst_9 = arith.constant 0.000000e+00 : f32
    %21 = vector.shape_cast %20 : vector<512x1xi1> to vector<512x1xi1>
    %22 = vector.broadcast %21 : vector<512x1xi1> to vector<512x32xi1>
    %23 = vector.broadcast %cst_9 : f32 to vector<512x32xf32>
    %24 = arith.select %22, %12, %23 : vector<512x32xi1>, vector<512x32xf32>
    %cst_10 = arith.constant dense<0.000000e+00> : vector<32xf32>
    %25 = vector.multi_reduction <add>, %24, %cst_10 [0] : vector<512x32xf32> to vector<32xf32>
    %26 = vector.shape_cast %25 : vector<32xf32> to vector<1x32xf32>
    %27 = arith.mulf %24, %24 : vector<512x32xf32>
    %cst_11 = arith.constant dense<0.000000e+00> : vector<32xf32>
    %28 = vector.multi_reduction <add>, %27, %cst_11 [0] : vector<512x32xf32> to vector<32xf32>
    %29 = vector.shape_cast %28 : vector<32xf32> to vector<1x32xf32>
    %30 = tpu.concatenate %26, %29 in 0 : vector<1x32xf32>, vector<1x32xf32> -> vector<2x32xf32>
    %c0_12 = arith.constant 0 : index
    %c0_13 = arith.constant 0 : index
    %c0_14 = arith.constant 0 : index
    %31 = vector.load %arg5[%c0_12, %c0_13, %c0_14] : memref<1x2x32xf32, #tpu.memory_space<vmem>>, vector<1x2x32xf32>
    %32 = vector.shape_cast %31 : vector<1x2x32xf32> to vector<2x32xf32>
    %33 = vector.shape_cast %30 : vector<2x32xf32> to vector<1x2x32xf32>
    tpu.vector_store %arg5[%c0_12, %c0_13, %c0_14], %33 {strides = array<i32>} : memref<1x2x32xf32, #tpu.memory_space<vmem>>, vector<1x2x32xf32>,
    return
  }
  func.func @transform_0(%arg0: i32) -> (i32, i32) {
    %c0_i32 = arith.constant 0 : i32
    %c0_i32_0 = arith.constant 0 : i32
    return %arg0, %c0_i32 : i32, i32
  }
  func.func @transform_1(%arg0: i32) -> (i32, i32) {
    %c0_i32 = arith.constant 0 : i32
    %c0_i32_0 = arith.constant 0 : i32
    %c0_i32_1 = arith.constant 0 : i32
    return %c0_i32, %c0_i32_0 : i32, i32
  }
  func.func @transform_2(%arg0: i32) -> (i32, i32) {
    %c0_i32 = arith.constant 0 : i32
    %c0_i32_0 = arith.constant 0 : i32
    %c0_i32_1 = arith.constant 0 : i32
    return %c0_i32, %c0_i32_0 : i32, i32
  }
  func.func @transform_3(%arg0: i32) -> (i32, i32) {
    %c0_i32 = arith.constant 0 : i32
    %c0_i32_0 = arith.constant 0 : i32
    return %arg0, %c0_i32 : i32, i32
  }
  func.func @transform_4(%arg0: i32) -> (i32, i32, i32) {
    %c0_i32 = arith.constant 0 : i32
    %c0_i32_0 = arith.constant 0 : i32
    %c0_i32_1 = arith.constant 0 : i32
    return %arg0, %c0_i32, %c0_i32_0 : i32, i32, i32
  }
}

module attributes {stable_mosaic.version = 11 : i64} {
  func.func @_gemm_lrelu_stats_kernel(%arg0: i32, %arg1: memref<162x512xbf16, #tpu.memory_space<vmem>>, %arg2: memref<512x64xbf16, #tpu.memory_space<vmem>>, %arg3: memref<1x64xf32, #tpu.memory_space<vmem>>, %arg4: memref<162x64xbf16, #tpu.memory_space<vmem>>, %arg5: memref<1x2x64xf32, #tpu.memory_space<vmem>>) attributes {dimension_semantics = [#tpu.dimension_semantics<parallel>], iteration_bounds = array<i64: 1>, scalar_prefetch = 0 : i64, scratch_operands = 0 : i64, tpu.core_type = #tpu.core_type<tc>, window_params = [{transform_indices = @transform_0, window_bounds = array<i64: 162, 512>}, {pipeline_mode = #tpu.pipeline_mode<synchronous>, transform_indices = @transform_1, window_bounds = array<i64: 512, 64>}, {pipeline_mode = #tpu.pipeline_mode<synchronous>, transform_indices = @transform_2, window_bounds = array<i64: 1, 64>}, {transform_indices = @transform_3, window_bounds = array<i64: 162, 64>}, {transform_indices = @transform_4, window_bounds = array<i64: 1, 2, 64>}]} {
    %c0 = arith.constant 0 : index
    %c0_0 = arith.constant 0 : index
    %0 = vector.load %arg1[%c0, %c0_0] : memref<162x512xbf16, #tpu.memory_space<vmem>>, vector<162x512xbf16>
    %c0_1 = arith.constant 0 : index
    %c0_2 = arith.constant 0 : index
    %1 = vector.load %arg2[%c0_1, %c0_2] : memref<512x64xbf16, #tpu.memory_space<vmem>>, vector<512x64xbf16>
    %cst = arith.constant dense<0.000000e+00> : vector<162x64xf32>
    %2 = tpu.matmul %0, %1, %cst {dimension_numbers = #tpu.dot_dimension_numbers<[1], [0], [0], [1], [0, 0, 1, 1], [], []>} : vector<162x512xbf16>, vector<512x64xbf16>, vector<162x64xf32> -> vector<162x64xf32>
    %c0_3 = arith.constant 0 : index
    %c0_4 = arith.constant 0 : index
    %3 = vector.load %arg3[%c0_3, %c0_4] : memref<1x64xf32, #tpu.memory_space<vmem>>, vector<1x64xf32>
    %4 = vector.broadcast %3 : vector<1x64xf32> to vector<162x64xf32>
    %5 = arith.addf %2, %4 : vector<162x64xf32>
    %cst_5 = arith.constant 0.000000e+00 : f32
    %6 = vector.broadcast %cst_5 : f32 to vector<162x64xf32>
    %7 = arith.cmpf oge, %5, %6 : vector<162x64xf32>
    %cst_6 = arith.constant 0.00999999977 : f32
    %8 = vector.broadcast %cst_6 : f32 to vector<162x64xf32>
    %9 = arith.mulf %8, %5 : vector<162x64xf32>
    %10 = arith.select %7, %5, %9 : vector<162x64xi1>, vector<162x64xf32>
    %11 = arith.truncf %10 : vector<162x64xf32> to vector<162x64xbf16>
    %c0_7 = arith.constant 0 : index
    %c0_8 = arith.constant 0 : index
    %12 = vector.load %arg4[%c0_7, %c0_8] : memref<162x64xbf16, #tpu.memory_space<vmem>>, vector<162x64xbf16>
    tpu.vector_store %arg4[%c0_7, %c0_8], %11 {strides = array<i32>} : memref<162x64xbf16, #tpu.memory_space<vmem>>, vector<162x64xbf16>,
    %cst_9 = arith.constant dense<0.000000e+00> : vector<64xf32>
    %13 = vector.multi_reduction <add>, %10, %cst_9 [0] : vector<162x64xf32> to vector<64xf32>
    %14 = vector.shape_cast %13 : vector<64xf32> to vector<1x64xf32>
    %15 = arith.mulf %10, %10 : vector<162x64xf32>
    %cst_10 = arith.constant dense<0.000000e+00> : vector<64xf32>
    %16 = vector.multi_reduction <add>, %15, %cst_10 [0] : vector<162x64xf32> to vector<64xf32>
    %17 = vector.shape_cast %16 : vector<64xf32> to vector<1x64xf32>
    %18 = tpu.concatenate %14, %17 in 0 : vector<1x64xf32>, vector<1x64xf32> -> vector<2x64xf32>
    %c0_11 = arith.constant 0 : index
    %c0_12 = arith.constant 0 : index
    %c0_13 = arith.constant 0 : index
    %19 = vector.load %arg5[%c0_11, %c0_12, %c0_13] : memref<1x2x64xf32, #tpu.memory_space<vmem>>, vector<1x2x64xf32>
    %20 = vector.shape_cast %19 : vector<1x2x64xf32> to vector<2x64xf32>
    %21 = vector.shape_cast %18 : vector<2x64xf32> to vector<1x2x64xf32>
    tpu.vector_store %arg5[%c0_11, %c0_12, %c0_13], %21 {strides = array<i32>} : memref<1x2x64xf32, #tpu.memory_space<vmem>>, vector<1x2x64xf32>,
    return
  }
  func.func @transform_0(%arg0: i32) -> (i32, i32) {
    %c0_i32 = arith.constant 0 : i32
    %c0_i32_0 = arith.constant 0 : i32
    return %arg0, %c0_i32 : i32, i32
  }
  func.func @transform_1(%arg0: i32) -> (i32, i32) {
    %c0_i32 = arith.constant 0 : i32
    %c0_i32_0 = arith.constant 0 : i32
    %c0_i32_1 = arith.constant 0 : i32
    return %c0_i32, %c0_i32_0 : i32, i32
  }
  func.func @transform_2(%arg0: i32) -> (i32, i32) {
    %c0_i32 = arith.constant 0 : i32
    %c0_i32_0 = arith.constant 0 : i32
    %c0_i32_1 = arith.constant 0 : i32
    return %c0_i32, %c0_i32_0 : i32, i32
  }
  func.func @transform_3(%arg0: i32) -> (i32, i32) {
    %c0_i32 = arith.constant 0 : i32
    %c0_i32_0 = arith.constant 0 : i32
    return %arg0, %c0_i32 : i32, i32
  }
  func.func @transform_4(%arg0: i32) -> (i32, i32, i32) {
    %c0_i32 = arith.constant 0 : i32
    %c0_i32_0 = arith.constant 0 : i32
    %c0_i32_1 = arith.constant 0 : i32
    return %arg0, %c0_i32, %c0_i32_0 : i32, i32, i32
  }
}

module attributes {stable_mosaic.version = 11 : i64} {
  func.func @_gemm_lrelu_stats_kernel(%arg0: i32, %arg1: memref<98x576xbf16, #tpu.memory_space<vmem>>, %arg2: memref<576x64xbf16, #tpu.memory_space<vmem>>, %arg3: memref<1x64xf32, #tpu.memory_space<vmem>>, %arg4: memref<98x64xbf16, #tpu.memory_space<vmem>>, %arg5: memref<1x2x64xf32, #tpu.memory_space<vmem>>) attributes {dimension_semantics = [#tpu.dimension_semantics<parallel>], iteration_bounds = array<i64: 1>, scalar_prefetch = 0 : i64, scratch_operands = 0 : i64, tpu.core_type = #tpu.core_type<tc>, window_params = [{transform_indices = @transform_0, window_bounds = array<i64: 98, 576>}, {pipeline_mode = #tpu.pipeline_mode<synchronous>, transform_indices = @transform_1, window_bounds = array<i64: 576, 64>}, {pipeline_mode = #tpu.pipeline_mode<synchronous>, transform_indices = @transform_2, window_bounds = array<i64: 1, 64>}, {transform_indices = @transform_3, window_bounds = array<i64: 98, 64>}, {transform_indices = @transform_4, window_bounds = array<i64: 1, 2, 64>}]} {
    %c0 = arith.constant 0 : index
    %c0_0 = arith.constant 0 : index
    %0 = vector.load %arg1[%c0, %c0_0] : memref<98x576xbf16, #tpu.memory_space<vmem>>, vector<98x576xbf16>
    %c0_1 = arith.constant 0 : index
    %c0_2 = arith.constant 0 : index
    %1 = vector.load %arg2[%c0_1, %c0_2] : memref<576x64xbf16, #tpu.memory_space<vmem>>, vector<576x64xbf16>
    %cst = arith.constant dense<0.000000e+00> : vector<98x64xf32>
    %2 = tpu.matmul %0, %1, %cst {dimension_numbers = #tpu.dot_dimension_numbers<[1], [0], [0], [1], [0, 0, 1, 1], [], []>} : vector<98x576xbf16>, vector<576x64xbf16>, vector<98x64xf32> -> vector<98x64xf32>
    %c0_3 = arith.constant 0 : index
    %c0_4 = arith.constant 0 : index
    %3 = vector.load %arg3[%c0_3, %c0_4] : memref<1x64xf32, #tpu.memory_space<vmem>>, vector<1x64xf32>
    %4 = vector.broadcast %3 : vector<1x64xf32> to vector<98x64xf32>
    %5 = arith.addf %2, %4 : vector<98x64xf32>
    %cst_5 = arith.constant 0.000000e+00 : f32
    %6 = vector.broadcast %cst_5 : f32 to vector<98x64xf32>
    %7 = arith.cmpf oge, %5, %6 : vector<98x64xf32>
    %cst_6 = arith.constant 0.00999999977 : f32
    %8 = vector.broadcast %cst_6 : f32 to vector<98x64xf32>
    %9 = arith.mulf %8, %5 : vector<98x64xf32>
    %10 = arith.select %7, %5, %9 : vector<98x64xi1>, vector<98x64xf32>
    %11 = arith.truncf %10 : vector<98x64xf32> to vector<98x64xbf16>
    %c0_7 = arith.constant 0 : index
    %c0_8 = arith.constant 0 : index
    %12 = vector.load %arg4[%c0_7, %c0_8] : memref<98x64xbf16, #tpu.memory_space<vmem>>, vector<98x64xbf16>
    tpu.vector_store %arg4[%c0_7, %c0_8], %11 {strides = array<i32>} : memref<98x64xbf16, #tpu.memory_space<vmem>>, vector<98x64xbf16>,
    %cst_9 = arith.constant dense<0.000000e+00> : vector<64xf32>
    %13 = vector.multi_reduction <add>, %10, %cst_9 [0] : vector<98x64xf32> to vector<64xf32>
    %14 = vector.shape_cast %13 : vector<64xf32> to vector<1x64xf32>
    %15 = arith.mulf %10, %10 : vector<98x64xf32>
    %cst_10 = arith.constant dense<0.000000e+00> : vector<64xf32>
    %16 = vector.multi_reduction <add>, %15, %cst_10 [0] : vector<98x64xf32> to vector<64xf32>
    %17 = vector.shape_cast %16 : vector<64xf32> to vector<1x64xf32>
    %18 = tpu.concatenate %14, %17 in 0 : vector<1x64xf32>, vector<1x64xf32> -> vector<2x64xf32>
    %c0_11 = arith.constant 0 : index
    %c0_12 = arith.constant 0 : index
    %c0_13 = arith.constant 0 : index
    %19 = vector.load %arg5[%c0_11, %c0_12, %c0_13] : memref<1x2x64xf32, #tpu.memory_space<vmem>>, vector<1x2x64xf32>
    %20 = vector.shape_cast %19 : vector<1x2x64xf32> to vector<2x64xf32>
    %21 = vector.shape_cast %18 : vector<2x64xf32> to vector<1x2x64xf32>
    tpu.vector_store %arg5[%c0_11, %c0_12, %c0_13], %21 {strides = array<i32>} : memref<1x2x64xf32, #tpu.memory_space<vmem>>, vector<1x2x64xf32>,
    return
  }
  func.func @transform_0(%arg0: i32) -> (i32, i32) {
    %c0_i32 = arith.constant 0 : i32
    %c0_i32_0 = arith.constant 0 : i32
    return %arg0, %c0_i32 : i32, i32
  }
  func.func @transform_1(%arg0: i32) -> (i32, i32) {
    %c0_i32 = arith.constant 0 : i32
    %c0_i32_0 = arith.constant 0 : i32
    %c0_i32_1 = arith.constant 0 : i32
    return %c0_i32, %c0_i32_0 : i32, i32
  }
  func.func @transform_2(%arg0: i32) -> (i32, i32) {
    %c0_i32 = arith.constant 0 : i32
    %c0_i32_0 = arith.constant 0 : i32
    %c0_i32_1 = arith.constant 0 : i32
    return %c0_i32, %c0_i32_0 : i32, i32
  }
  func.func @transform_3(%arg0: i32) -> (i32, i32) {
    %c0_i32 = arith.constant 0 : i32
    %c0_i32_0 = arith.constant 0 : i32
    return %arg0, %c0_i32 : i32, i32
  }
  func.func @transform_4(%arg0: i32) -> (i32, i32, i32) {
    %c0_i32 = arith.constant 0 : i32
    %c0_i32_0 = arith.constant 0 : i32
    %c0_i32_1 = arith.constant 0 : i32
    return %arg0, %c0_i32, %c0_i32_0 : i32, i32, i32
  }
}

module attributes {stable_mosaic.version = 11 : i64} {
  func.func @_gemm_lrelu_kernel(%arg0: i32, %arg1: memref<2x3136xbf16, #tpu.memory_space<vmem>>, %arg2: memref<3136x256xbf16, #tpu.memory_space<vmem>>, %arg3: memref<1x256xf32, #tpu.memory_space<vmem>>, %arg4: memref<2x256xf32, #tpu.memory_space<vmem>>) attributes {dimension_semantics = [#tpu.dimension_semantics<parallel>], iteration_bounds = array<i64: 1>, scalar_prefetch = 0 : i64, scratch_operands = 0 : i64, tpu.core_type = #tpu.core_type<tc>, window_params = [{transform_indices = @transform_0, window_bounds = array<i64: 2, 3136>}, {pipeline_mode = #tpu.pipeline_mode<synchronous>, transform_indices = @transform_1, window_bounds = array<i64: 3136, 256>}, {pipeline_mode = #tpu.pipeline_mode<synchronous>, transform_indices = @transform_2, window_bounds = array<i64: 1, 256>}, {transform_indices = @transform_3, window_bounds = array<i64: 2, 256>}]} {
    %c0 = arith.constant 0 : index
    %c0_0 = arith.constant 0 : index
    %0 = vector.load %arg1[%c0, %c0_0] : memref<2x3136xbf16, #tpu.memory_space<vmem>>, vector<2x3136xbf16>
    %c0_1 = arith.constant 0 : index
    %c0_2 = arith.constant 0 : index
    %1 = vector.load %arg2[%c0_1, %c0_2] : memref<3136x256xbf16, #tpu.memory_space<vmem>>, vector<3136x256xbf16>
    %cst = arith.constant dense<0.000000e+00> : vector<2x256xf32>
    %2 = tpu.matmul %0, %1, %cst {dimension_numbers = #tpu.dot_dimension_numbers<[1], [0], [0], [1], [0, 0, 1, 1], [], []>} : vector<2x3136xbf16>, vector<3136x256xbf16>, vector<2x256xf32> -> vector<2x256xf32>
    %c0_3 = arith.constant 0 : index
    %c0_4 = arith.constant 0 : index
    %3 = vector.load %arg3[%c0_3, %c0_4] : memref<1x256xf32, #tpu.memory_space<vmem>>, vector<1x256xf32>
    %4 = vector.broadcast %3 : vector<1x256xf32> to vector<2x256xf32>
    %5 = arith.addf %2, %4 : vector<2x256xf32>
    %cst_5 = arith.constant 0.000000e+00 : f32
    %6 = vector.broadcast %cst_5 : f32 to vector<2x256xf32>
    %7 = arith.cmpf oge, %5, %6 : vector<2x256xf32>
    %cst_6 = arith.constant 0.00999999977 : f32
    %8 = vector.broadcast %cst_6 : f32 to vector<2x256xf32>
    %9 = arith.mulf %8, %5 : vector<2x256xf32>
    %10 = arith.select %7, %5, %9 : vector<2x256xi1>, vector<2x256xf32>
    %c0_7 = arith.constant 0 : index
    %c0_8 = arith.constant 0 : index
    %11 = vector.load %arg4[%c0_7, %c0_8] : memref<2x256xf32, #tpu.memory_space<vmem>>, vector<2x256xf32>
    tpu.vector_store %arg4[%c0_7, %c0_8], %10 {strides = array<i32>} : memref<2x256xf32, #tpu.memory_space<vmem>>, vector<2x256xf32>,
    return
  }
  func.func @transform_0(%arg0: i32) -> (i32, i32) {
    %c0_i32 = arith.constant 0 : i32
    %c0_i32_0 = arith.constant 0 : i32
    return %arg0, %c0_i32 : i32, i32
  }
  func.func @transform_1(%arg0: i32) -> (i32, i32) {
    %c0_i32 = arith.constant 0 : i32
    %c0_i32_0 = arith.constant 0 : i32
    %c0_i32_1 = arith.constant 0 : i32
    return %c0_i32, %c0_i32_0 : i32, i32
  }
  func.func @transform_2(%arg0: i32) -> (i32, i32) {
    %c0_i32 = arith.constant 0 : i32
    %c0_i32_0 = arith.constant 0 : i32
    %c0_i32_1 = arith.constant 0 : i32
    return %c0_i32, %c0_i32_0 : i32, i32
  }
  func.func @transform_3(%arg0: i32) -> (i32, i32) {
    %c0_i32 = arith.constant 0 : i32
    %c0_i32_0 = arith.constant 0 : i32
    return %arg0, %c0_i32 : i32, i32
  }
}

</mosaic_0001>

<bundles_post_ra>
// kernel: base_network_forward.4
= control target key start
LH: loop header
LB: loop body
LE: loop exit
PB: predicated region body
PF: predicated region fallthrough
CT: control target
= control target key end

     0   :  { %s3000_s15 = smov 0   ;;  %s3002_s16 = smov 0   ;;  %s4393_s0 = inlined_call_operand.vmem [shape: u8[800,192], index: 0, kind: input, shape index: {}]   ;;  %s4394_s1 = inlined_call_operand.vmem [shape: bf16[192,32], index: 1, kind: input, shape index: {}]   ;;  %s4395_s2 = inlined_call_operand.vmem [shape: f32[1,32], index: 2, kind: input, shape index: {}]   ;;  %s4396_s3 = inlined_call_operand.vmem [shape: bf16[800,32], index: 3, kind: output, shape index: {0}]   ;;  %s4397_s4 = inlined_call_operand.vmem [shape: f32[2,2,32], index: 4, kind: output, shape index: {1}]  }
   0x1   :  { %s3004_s17 = smov 0  }
   0x2 LB: > { %s3013_s18 = sadd.s32 4294967295, %s2940_s17   ;;  %s3015_s19 = sadd.s32 1, %s2940_s17   ;;  %s2940_s17 = sphi %s3004_s17, %s4441_s17   ;;  %s2936_s16 = sphi %s3002_s16, %s4440_s16   ;;  %s2932_s15 = sphi %s3000_s15, %s4439_s15  }
   0x3   : > { %s87_s20 = ssub.s32 %s2940_s17, %s3015_s19  ;;  %s90_s21 = sadd.s32 1, %s2936_s16 }
   0x4   : > { %p88_p0 = scmp.eq.s32.totalorder %s87_s20, 0  ;;  %p100_p1 = scmp.ne.s32.totalorder %s2936_s16, %s2932_s15 }
   0x5   : > { %p101_p2 = scmp.eq.s32.totalorder %s3013_s18, 1  ;;  %p2559_p3 = scmp.ge.s32.totalorder %s2940_s17, 1 }
   0x6   : > { %s3023_s22 = scalar_select %p88_p0, %s2936_s16, %s90_s21  }
   0x7   : > { %p3025_p4 = por %p101_p2, %p100_p1  ;;  %p177_p5 = scmp.lt.s32.totalorder %s2940_s17, 3 }
   0x9   : > { %p178_p6 = pnand %p2559_p3, %p177_p5 }
   0xb   : > { %181 = sbr.rel (%p178_p6) target bundleno = 592 (0x250), region = 32 }
  0x12   : > { %v2873_v0 = vld [vmem:[%s4394_s1] sm:$0xff]   ;;  %v2974_v1 = vmov 0   ;;  %s2561_s26 = sshll.u32 %s3013_s18, 4  ;;  %v2874_v2 = vld [vmem:[%s4394_s1 + $0x8] sm:$0xff]   ;;  %v2875_v3 = vld [vmem:[%s4394_s1 + $0x10] sm:$0xff]   ;;  %vm438_vm0 = vcmask 523264  }
  0x13   : > { %535 = vmatprep.subr.bf16.mxu0 %v2974_v1  ;;  %2760 = vmatprep.subr.bf16.mxu1 %v2974_v1  ;;  %p218_p7 = scmp.lt.s32.totalorder %s2561_s26, 24  ;;  %v2876_v4 = vld [vmem:[%s4394_s1 + $0x18] sm:$0xff]   ;;  %v2877_v7 = vld [vmem:[%s4394_s1 + $0x20] sm:$0xff]   ;;  %v2878_v10 = vld [vmem:[%s4394_s1 + $0x28] sm:$0xff]   ;;  %s2674_s7 = sshll.u32 %s3013_s18, 9  ;;  %vm1272_vm2 = vcmask 257024  }
  0x14   : > { %536 = vmatpush1.bf16.msra.mxu0 %v2873_v0  ;;  %2772 = vmatpush1.bf16.msra.mxu1 %v2873_v0  ;;  %v2879_v11 = vld [vmem:[%s4394_s1 + $0x30] sm:$0xff]   ;;  %v2880_v12 = vld [vmem:[%s4394_s1 + $0x38] sm:$0xff]   ;;  %v2881_v13 = vld [vmem:[%s4394_s1 + $0x40] sm:$0xff]   ;;  %vm1724_vm4 = vcmask 261120   ;;  %s203_s10 = sand.u32 1, %s2932_s15   ;;  %p234_p8 = scmp.lt.s32.totalorder %s3013_s18, 1 }
  0x15   : > { %537 = vmatprep.subr.bf16.mxu0 %v2974_v1  ;;  %2761 = vmatprep.subr.bf16.mxu1 %v2974_v1  ;;  %s4443_s26 = smov (!%p218_p7, %s2561_s26), 24  ;;  %v2882_v14 = vld [vmem:[%s4394_s1 + $0x48] sm:$0xff]   ;;  %v2883_v15 = vld [vmem:[%s4394_s1 + $0x50] sm:$0xff]   ;;  %v2884_v16 = vld [vmem:[%s4394_s1 + $0x58] sm:$0xff]   ;;  %s3331_s15 = sshll.u32 %s203_s10, 8 }
  0x16   : > { %s2692_s5 = sshll.u32 %s4443_s26, 4  ;;  %s3362_s11 = scalar_lea.vmem [#allocation2], %s3331_s15  }
  0x17   : > { %s3048_s8 = scalar_lea.vmem %s4393_s0, %s2692_s5  ;;  %s2676_s25 = sshll.u32 (%p3025_p4), %s3013_s18, 6 }
  0x18   : > { %538 = vmatpush1.bf16.msra.mxu0 %v2874_v2  ;;  %2773 = vmatpush1.bf16.msra.mxu1 %v2874_v2  ;;  %v240_v5 = vld [vmem:[%s3048_s8 + $0x8] sm:$0xff]  ;;  %v239_v17 = vld [vmem:[%s3048_s8] sm:$0xff]  ;;  %v242_v23 = vld [vmem:[%s3048_s8 + $0x18] sm:$0xff]  ;;  %s235_s14 = scalar_select %p234_p8, %s3013_s18, 1 }
  0x19   : > { %539 = vmatprep.subr.bf16.mxu0 %v2974_v1  ;;  %2762 = vmatprep.subr.bf16.mxu1 %v2974_v1  ;;  %v272_v6 = vunpack.c.l.u8.bf16 %v240_v5  ;;  %v256_v8 = vld [vmem:[%s3048_s8 + $0x88] sm:$0xff]  ;;  %v255_v18 = vld [vmem:[%s3048_s8 + $0x80] sm:$0xff]  ;;  %v271_v19 = vunpack.c.l.u8.bf16 %v239_v17  ;;  %v274_v21 = vunpack.c.h.u8.bf16 %v240_v5  ;;  %v258_v24 = vld [vmem:[%s3048_s8 + $0x98] sm:$0xff]  ;;  %v273_v25 = vunpack.c.h.u8.bf16 %v239_v17  ;;  %s2757_s26 = sshll.u32 (%p3025_p4), %s3013_s18, 8  ;;  %s2071_s27 = ssub.s32 (%p3025_p4), 100, %s2676_s25 }
  0x1a   : > { %v304_v9 = vunpack.c.l.u8.bf16 %v256_v8  ;;  %v303_v20 = vunpack.c.l.u8.bf16 %v255_v18  ;;  %v306_v22 = vunpack.c.h.u8.bf16 %v256_v8  ;;  %v305_v26 = vunpack.c.h.u8.bf16 %v255_v18  ;;  %v241_v29 = vld [vmem:[%s3048_s8 + $0x10] sm:$0xff]  ;;  %v244_v35 = vld [vmem:[%s3048_s8 + $0x28] sm:$0xff]  ;;  %v243_v41 = vld [vmem:[%s3048_s8 + $0x20] sm:$0xff]  ;;  %s2564_s17 = sshll.u32 %s235_s14, 1  ;;  %s4201_s30 = scalar_lea.vmem (%p3025_p4), %s4396_s3, %s2757_s26  }
  0x1b   : > { %2578 = vmatprep.mubr.msk.bf16.mxu0 %vm438_vm0, %v272_v6  ;;  %v276_v27 = vunpack.c.l.u8.bf16 %v242_v23  ;;  %v308_v28 = vunpack.c.l.u8.bf16 %v258_v24  ;;  %v257_v30 = vld [vmem:[%s3048_s8 + $0x90] sm:$0xff]  ;;  %v275_v31 = vunpack.c.l.u8.bf16 %v241_v29  ;;  %v278_v33 = vunpack.c.h.u8.bf16 %v242_v23  ;;  %v260_v36 = vld [vmem:[%s3048_s8 + $0xa8] sm:$0xff]  ;;  %v259_v42 = vld [vmem:[%s3048_s8 + $0xa0] sm:$0xff]  ;;  %s237_s24 = scalar_lea.vmem %s4397_s4, %s2564_s17  ;;  %p2072_p9 = scmp.lt.s32.totalorder (%p3025_p4), %s2071_s27, 64 }
  0x1c   : > { %540 = vmatpush1.bf16.msra.mxu0 %v2875_v3  ;;  %2774 = vmatpush1.bf16.msra.mxu1 %v2875_v3  ;;  %v307_v32 = vunpack.c.l.u8.bf16 %v257_v30  ;;  %v310_v34 = vunpack.c.h.u8.bf16 %v258_v24  ;;  %v277_v37 = vunpack.c.h.u8.bf16 %v241_v29  ;;  %v309_v38 = vunpack.c.h.u8.bf16 %v257_v30  ;;  %v246_v47 = vld [vmem:[%s3048_s8 + $0x38] sm:$0xff]  ;;  %v245_v53 = vld [vmem:[%s3048_s8 + $0x30] sm:$0xff]  ;;  %v248_v59 = vld [vmem:[%s3048_s8 + $0x48] sm:$0xff] }
  0x1d   : > { %541 = vmatprep.subr.bf16.mxu0 %v2974_v1  ;;  %2763 = vmatprep.subr.bf16.mxu1 %v2974_v1  ;;  %v280_v39 = vunpack.c.l.u8.bf16 %v244_v35  ;;  %v312_v40 = vunpack.c.l.u8.bf16 %v260_v36  ;;  %v279_v43 = vunpack.c.l.u8.bf16 %v243_v41  ;;  %v311_v44 = vunpack.c.l.u8.bf16 %v259_v42  ;;  %v262_v48 = vld [vmem:[%s3048_s8 + $0xb8] sm:$0xff]  ;;  %v261_v54 = vld [vmem:[%s3048_s8 + $0xb0] sm:$0xff]  ;;  %v264_v60 = vld [vmem:[%s3048_s8 + $0xc8] sm:$0xff] }
  0x1e   : > { %2594 = vmatprep.mubr.msk.bf16.mxu1 %vm438_vm0, %v304_v9  ;;  %v282_v45 = vunpack.c.h.u8.bf16 %v244_v35  ;;  %v314_v46 = vunpack.c.h.u8.bf16 %v260_v36  ;;  %v281_v49 = vunpack.c.h.u8.bf16 %v243_v41  ;;  %v313_v50 = vunpack.c.h.u8.bf16 %v259_v42  ;;  %v263_v2 = vld [vmem:[%s3048_s8 + $0xc0] sm:$0xff]  ;;  %v266_v8 = vld [vmem:[%s3048_s8 + $0xd8] sm:$0xff] }
  0x1f   : > { %v284_v51 = vunpack.c.l.u8.bf16 %v246_v47  ;;  %v316_v52 = vunpack.c.l.u8.bf16 %v262_v48  ;;  %v283_v55 = vunpack.c.l.u8.bf16 %v245_v53  ;;  %v315_v56 = vunpack.c.l.u8.bf16 %v261_v54 }
  0x20   : > { %542 = vmatpush1.bf16.msra.mxu0 %v2876_v4  ;;  %2775 = vmatpush1.bf16.msra.mxu1 %v2876_v4  ;;  %v286_v57 = vunpack.c.h.u8.bf16 %v246_v47  ;;  %v318_v58 = vunpack.c.h.u8.bf16 %v262_v48  ;;  %v285_v61 = vunpack.c.h.u8.bf16 %v245_v53  ;;  %v317_v62 = vunpack.c.h.u8.bf16 %v261_v54 }
  0x21   : > { %543 = vmatprep.subr.bf16.mxu0 %v2974_v1  ;;  %2764 = vmatprep.subr.bf16.mxu1 %v2974_v1  ;;  %v288_v63 = vunpack.c.l.u8.bf16 %v248_v59  ;;  %v320_v0 = vunpack.c.l.u8.bf16 %v264_v60  ;;  %v319_v4 = vunpack.c.l.u8.bf16 %v263_v2  ;;  %v290_v5 = vunpack.c.h.u8.bf16 %v248_v59 }
  0x22   : > { %v322_v6 = vunpack.c.h.u8.bf16 %v264_v60  ;;  %v326_v18 = vunpack.c.h.u8.bf16 %v266_v8  ;;  %v3162_v47 = vstv %s2674_s7 }
  0x23   : > { %4408 = vst [vmem:[#allocation3_spill] sm:$0xff] %v3162_v47 }
  0x24   : > { %544 = vmatpush1.bf16.msra.mxu0 %v2877_v7  ;;  %2776 = vmatpush1.bf16.msra.mxu1 %v2877_v7  ;;  %v250_v7 = vld [vmem:[%s3048_s8 + $0x58] sm:$0xff] }
  0x25   : > { %545 = vmatprep.subr.bf16.mxu0 %v2974_v1  ;;  %2765 = vmatprep.subr.bf16.mxu1 %v2974_v1  ;;  %v294_v17 = vunpack.c.h.u8.bf16 %v250_v7 }
  0x28   : > { %546 = vmatpush1.bf16.msra.mxu0 %v2878_v10  ;;  %2777 = vmatpush1.bf16.msra.mxu1 %v2878_v10  ;;  %v321_v10 = vunpack.c.h.u8.bf16 %v263_v2 }
  0x29   : > { %547 = vmatprep.subr.bf16.mxu0 %v2974_v1  ;;  %2766 = vmatprep.subr.bf16.mxu1 %v2974_v1 }
  0x2c   : > { %548 = vmatpush1.bf16.msra.mxu0 %v2879_v11  ;;  %2778 = vmatpush1.bf16.msra.mxu1 %v2879_v11  ;;  %v292_v11 = vunpack.c.l.u8.bf16 %v250_v7 }
  0x2d   : > { %549 = vmatprep.subr.bf16.mxu0 %v2974_v1  ;;  %2767 = vmatprep.subr.bf16.mxu1 %v2974_v1 }
  0x30   : > { %550 = vmatpush1.bf16.msra.mxu0 %v2880_v12  ;;  %2779 = vmatpush1.bf16.msra.mxu1 %v2880_v12  ;;  %v324_v12 = vunpack.c.l.u8.bf16 %v266_v8 }
  0x31   : > { %551 = vmatprep.subr.bf16.mxu0 %v2974_v1  ;;  %2768 = vmatprep.subr.bf16.mxu1 %v2974_v1 }
  0x34   : > { %552 = vmatpush1.bf16.msra.mxu0 %v2881_v13  ;;  %2780 = vmatpush1.bf16.msra.mxu1 %v2881_v13  ;;  %v249_v13 = vld [vmem:[%s3048_s8 + $0x50] sm:$0xff] }
  0x35   : > { %553 = vmatprep.subr.bf16.mxu0 %v2974_v1  ;;  %2769 = vmatprep.subr.bf16.mxu1 %v2974_v1 }
  0x38   : > { %554 = vmatpush1.bf16.msra.mxu0 %v2882_v14  ;;  %2781 = vmatpush1.bf16.msra.mxu1 %v2882_v14  ;;  %v265_v14 = vld [vmem:[%s3048_s8 + $0xd0] sm:$0xff] }
  0x39   : > { %555 = vmatprep.subr.bf16.mxu0 %v2974_v1  ;;  %2770 = vmatprep.subr.bf16.mxu1 %v2974_v1 }
  0x3c   : > { %556 = vmatpush1.bf16.msra.mxu0 %v2883_v15  ;;  %2782 = vmatpush1.bf16.msra.mxu1 %v2883_v15  ;;  %v291_v15 = vunpack.c.l.u8.bf16 %v249_v13 }
  0x3d   : > { %557 = vmatprep.subr.bf16.mxu0 %v2974_v1  ;;  %2771 = vmatprep.subr.bf16.mxu1 %v2974_v1  ;;  %v247_v1 = vld [vmem:[%s3048_s8 + $0x40] sm:$0xff] }
  0x3e   : > { %v287_v3 = vunpack.c.l.u8.bf16 %v247_v1  ;;  %v289_v9 = vunpack.c.h.u8.bf16 %v247_v1 }
  0x40   : > { %558 = vmatpush1.bf16.msra.mxu0 %v2884_v16  ;;  %2783 = vmatpush1.bf16.msra.mxu1 %v2884_v16  ;;  %v323_v16 = vunpack.c.l.u8.bf16 %v265_v14 }
  0x43   : > { %568 = vmatmul.mubr.bf16.vlgmr.msra.gmra.mrb[0].mxu0 %v271_v19  ;;  %696 = vmatmul.mubr.bf16.vlgmr.msra.gmra.mrb[0].mxu1 %v303_v20  ;;  %v252_v19 = vld [vmem:[%s3048_s8 + $0x68] sm:$0xff] }
  0x44   : > { %2579 = vmatprep.mubr.msk.bf16.mxu0 %vm438_vm0, %v274_v21  ;;  %2595 = vmatprep.mubr.msk.bf16.mxu1 %vm438_vm0, %v306_v22  ;;  %v268_v20 = vld [vmem:[%s3048_s8 + $0xe8] sm:$0xff]  ;;  %v293_v21 = vunpack.c.h.u8.bf16 %v249_v13  ;;  %v325_v22 = vunpack.c.h.u8.bf16 %v265_v14  ;;  %v296_v23 = vunpack.c.l.u8.bf16 %v252_v19  ;;  %v298_v29 = vunpack.c.h.u8.bf16 %v252_v19 }
  0x45   : > { %v328_v24 = vunpack.c.l.u8.bf16 %v268_v20  ;;  %v330_v30 = vunpack.c.h.u8.bf16 %v268_v20 }
  0x4b   : > { %576 = vmatmul.mubr.bf16.gmra.mrb[4].mxu0 %v273_v25  ;;  %704 = vmatmul.mubr.bf16.gmra.mrb[4].mxu1 %v305_v26  ;;  %v251_v25 = vld [vmem:[%s3048_s8 + $0x60] sm:$0xff] }
  0x4c   : > { %2580 = vmatprep.mubr.msk.bf16.mxu0 %vm438_vm0, %v276_v27  ;;  %2596 = vmatprep.mubr.msk.bf16.mxu1 %vm438_vm0, %v308_v28  ;;  %v267_v26 = vld [vmem:[%s3048_s8 + $0xe0] sm:$0xff]  ;;  %v295_v27 = vunpack.c.l.u8.bf16 %v251_v25 }
  0x4d   : > { %v327_v28 = vunpack.c.l.u8.bf16 %v267_v26 }
  0x53   : > { %584 = vmatmul.mubr.bf16.gmra.mrb[8].mxu0 %v275_v31  ;;  %712 = vmatmul.mubr.bf16.gmra.mrb[8].mxu1 %v307_v32  ;;  %v254_v31 = vld [vmem:[%s3048_s8 + $0x78] sm:$0xff] }
  0x54   : > { %2581 = vmatprep.mubr.msk.bf16.mxu0 %vm438_vm0, %v278_v33  ;;  %2597 = vmatprep.mubr.msk.bf16.mxu1 %vm438_vm0, %v310_v34  ;;  %v270_v32 = vld [vmem:[%s3048_s8 + $0xf8] sm:$0xff]  ;;  %v297_v33 = vunpack.c.h.u8.bf16 %v251_v25  ;;  %v329_v34 = vunpack.c.h.u8.bf16 %v267_v26  ;;  %v300_v35 = vunpack.c.l.u8.bf16 %v254_v31  ;;  %v302_v41 = vunpack.c.h.u8.bf16 %v254_v31 }
  0x55   : > { %v332_v36 = vunpack.c.l.u8.bf16 %v270_v32  ;;  %v334_v42 = vunpack.c.h.u8.bf16 %v270_v32 }
  0x5b   : > { %592 = vmatmul.mubr.bf16.gmra.mrb[12].mxu0 %v277_v37  ;;  %720 = vmatmul.mubr.bf16.gmra.mrb[12].mxu1 %v309_v38  ;;  %v253_v37 = vld [vmem:[%s3048_s8 + $0x70] sm:$0xff] }
  0x5c   : > { %2582 = vmatprep.mubr.msk.bf16.mxu0 %vm438_vm0, %v280_v39  ;;  %2598 = vmatprep.mubr.msk.bf16.mxu1 %vm438_vm0, %v312_v40  ;;  %v269_v38 = vld [vmem:[%s3048_s8 + $0xf0] sm:$0xff]  ;;  %v299_v39 = vunpack.c.l.u8.bf16 %v253_v37 }
  0x5d   : > { %v331_v40 = vunpack.c.l.u8.bf16 %v269_v38 }
  0x63   : > { %600 = vmatmul.mubr.bf16.gmra.mrb[16].mxu0 %v279_v43  ;;  %728 = vmatmul.mubr.bf16.gmra.mrb[16].mxu1 %v311_v44  ;;  %v301_v43 = vunpack.c.h.u8.bf16 %v253_v37  ;;  %v333_v44 = vunpack.c.h.u8.bf16 %v269_v38 }
  0x64   : > { %2583 = vmatprep.mubr.msk.bf16.mxu0 %vm438_vm0, %v282_v45  ;;  %2599 = vmatprep.mubr.msk.bf16.mxu1 %vm438_vm0, %v314_v46  ;;  %v1338_v45 = vlaneseq }
  0x66   : > { %v3159_v46 = vshrl.u32 %v1338_v45, 7 }
  0x68   : > { %v1340_v48 = vadd.s32 8, %v3159_v46  ;;  %v1345_v53 = vadd.s32 48, %v3159_v46  ;;  %v1346_v54 = vadd.s32 56, %v3159_v46  ;;  %v1351_v1 = vadd.s32 96, %v3159_v46 }
  0x69   : > { %v1353_v7 = vadd.s32 112, %v3159_v46  ;;  %v1354_v8 = vadd.s32 120, %v3159_v46  ;;  %v1356_v13 = vadd.s32 136, %v3159_v46  ;;  %v1358_v19 = vadd.s32 152, %v3159_v46 }
  0x6a   : > { %v3196_v2 = vadd.s32 %v3162_v47, %v1345_v53  ;;  %v1375_v20 = vadd.s32 288, %v3159_v46  ;;  %v1360_v32 = vadd.s32 168, %v3159_v46  ;;  %v1378_v38 = vadd.s32 312, %v3159_v46 }
  0x6b   : > { %608 = vmatmul.mubr.bf16.gmra.mrb[20].mxu0 %v281_v49  ;;  %736 = vmatmul.mubr.bf16.gmra.mrb[20].mxu1 %v313_v50  ;;  %v1341_v49 = vadd.s32 16, %v3159_v46  ;;  %v1342_v50 = vadd.s32 24, %v3159_v46  ;;  %v1364_v45 = vadd.s32 200, %v3159_v46  ;;  %v1365_v53 = vadd.s32 208, %v3159_v46 }
  0x6c   : > { %2584 = vmatprep.mubr.msk.bf16.mxu0 %vm438_vm0, %v284_v51  ;;  %2600 = vmatprep.mubr.msk.bf16.mxu1 %vm438_vm0, %v316_v52  ;;  %v1343_v51 = vadd.s32 32, %v3159_v46  ;;  %v1344_v52 = vadd.s32 40, %v3159_v46 }
  0x6d   : > { %v3181_v59 = vadd.s32 %v3162_v47, %v1341_v49  ;;  %v3184_v60 = vadd.s32 %v3162_v47, %v1342_v50  ;;  %v1381_v50 = vadd.s32 336, %v3159_v46 }
  0x6f   : > { %vm1470_vm6 = vcmp.lt.s32.totalorder %v3181_v59, 800  ;;  %vm1471_vm9 = vcmp.lt.s32.totalorder %v3184_v60, 800 }
  0x73   : > { %616 = vmatmul.mubr.bf16.gmra.mrb[24].mxu0 %v283_v55  ;;  %744 = vmatmul.mubr.bf16.gmra.mrb[24].mxu1 %v315_v56  ;;  %v1347_v55 = vadd.s32 64, %v3159_v46  ;;  %v1348_v56 = vadd.s32 72, %v3159_v46 }
  0x74   : > { %2585 = vmatprep.mubr.msk.bf16.mxu0 %vm438_vm0, %v286_v57  ;;  %2601 = vmatprep.mubr.msk.bf16.mxu1 %vm438_vm0, %v318_v58  ;;  %v3175_v57 = vadd.s32 %v3162_v47, %v3159_v46  ;;  %v3178_v58 = vadd.s32 %v3162_v47, %v1340_v48  ;;  %v3284_v48 = vadd.s32 %v3162_v47, %v1360_v32 }
  0x76   : > { %vm1468_vm1 = vcmp.lt.s32.totalorder %v3175_v57, 800  ;;  %vm1469_vm3 = vcmp.lt.s32.totalorder %v3178_v58, 800 }
  0x7b   : > { %624 = vmatmul.mubr.bf16.gmra.mrb[28].mxu0 %v285_v61  ;;  %752 = vmatmul.mubr.bf16.gmra.mrb[28].mxu1 %v317_v62  ;;  %v1349_v61 = vadd.s32 80, %v3159_v46  ;;  %v3188_v62 = vadd.s32 %v3162_v47, %v1343_v51  ;;  %v1382_v51 = vadd.s32 344, %v3159_v46 }
  0x7c   : > { %2586 = vmatprep.mubr.msk.bf16.mxu0 %vm438_vm0, %v288_v63  ;;  %2602 = vmatprep.mubr.msk.bf16.mxu1 %vm438_vm0, %v320_v0  ;;  %v3191_v63 = vadd.s32 %v3162_v47, %v1344_v52  ;;  %v1350_v0 = vadd.s32 88, %v3159_v46  ;;  %v3294_v52 = vld [vmem:[%s4395_s2] ss:$0 sm:$0xff] }
  0x7d   : > { %vm1472_vm12 = vcmp.lt.s32.totalorder %v3188_v62, 800 }
  0x7e   : > { %v3218_v14 = vadd.s32 %v3162_v47, %v1350_v0  ;;  %vm1473_vm14 = vcmp.lt.s32.totalorder %v3191_v63, 800 }
  0x83   : > { %632 = vmatmul.mubr.bf16.gmra.mrb[32].mxu0 %v287_v3  ;;  %760 = vmatmul.mubr.bf16.gmra.mrb[32].mxu1 %v319_v4  ;;  %v3199_v3 = vadd.s32 %v3162_v47, %v1346_v54  ;;  %v3202_v4 = vadd.s32 %v3162_v47, %v1347_v55  ;;  %v1366_v54 = vadd.s32 216, %v3159_v46  ;;  %v1383_v55 = vadd.s32 352, %v3159_v46 }
  0x84   : > { %2587 = vmatprep.mubr.msk.bf16.mxu0 %vm438_vm0, %v290_v5  ;;  %2603 = vmatprep.mubr.msk.bf16.mxu1 %vm438_vm0, %v322_v6  ;;  %v3205_v5 = vadd.s32 %v3162_v47, %v1348_v56  ;;  %v1352_v6 = vadd.s32 104, %v3159_v46  ;;  %v1384_v56 = vadd.s32 360, %v3159_v46 }
  0x8b   : > { %640 = vmatmul.mubr.bf16.gmra.mrb[36].mxu0 %v289_v9  ;;  %768 = vmatmul.mubr.bf16.gmra.mrb[36].mxu1 %v321_v10  ;;  %v1371_v9 = vadd.s32 256, %v3159_v46  ;;  %v3212_v10 = vadd.s32 %v3162_v47, %v1349_v61  ;;  %v3302_v61 = vadd.s32 %v3162_v47, %v1378_v38  ;;  %v3337_v38 = vadd.s32 %v3162_v47, %v1366_v54 }
  0x8c   : > { %2588 = vmatprep.mubr.msk.bf16.mxu0 %vm438_vm0, %v292_v11  ;;  %2604 = vmatprep.mubr.msk.bf16.mxu1 %vm438_vm0, %v324_v12  ;;  %v1372_v11 = vadd.s32 264, %v3159_v46  ;;  %v1355_v12 = vadd.s32 128, %v3159_v46  ;;  %v1368_v54 = vadd.s32 232, %v3159_v46 }
  0x8d   : > { %v3239_v25 = vadd.s32 %v3162_v47, %v1371_v9  ;;  %4410 = vst [vmem:[#allocation5_spill] sm:$0xff] %v3337_v38 }
  0x8e   : > { %v3242_v26 = vadd.s32 %v3162_v47, %v1372_v11 }
  0x8f   : > { %vm1500_vm15 = vcmp.lt.s32.totalorder %v3239_v25, 800 }
  0x93   : > { %648 = vmatmul.mubr.bf16.gmra.mrb[40].mxu0 %v291_v15  ;;  %776 = vmatmul.mubr.bf16.gmra.mrb[40].mxu1 %v323_v16  ;;  %v3221_v15 = vadd.s32 %v3162_v47, %v1351_v1  ;;  %v1373_v16 = vadd.s32 272, %v3159_v46 }
  0x94   : > { %2589 = vmatprep.mubr.msk.bf16.mxu0 %vm438_vm0, %v294_v17  ;;  %2605 = vmatprep.mubr.msk.bf16.mxu1 %vm438_vm0, %v326_v18  ;;  %v1374_v17 = vadd.s32 280, %v3159_v46  ;;  %v1357_v18 = vadd.s32 144, %v3159_v46 }
  0x96   : > { %v3255_v31 = vadd.s32 %v3162_v47, %v1374_v17 }
  0x9b   : > { %656 = vmatmul.mubr.bf16.gmra.mrb[44].mxu0 %v293_v21  ;;  %784 = vmatmul.mubr.bf16.gmra.mrb[44].mxu1 %v325_v22  ;;  %v1376_v21 = vadd.s32 296, %v3159_v46  ;;  %v3230_v22 = vadd.s32 %v3162_v47, %v1352_v6 }
  0x9c   : > { %2590 = vmatprep.mubr.msk.bf16.mxu0 %vm438_vm0, %v296_v23  ;;  %2606 = vmatprep.mubr.msk.bf16.mxu1 %vm438_vm0, %v328_v24  ;;  %v3233_v23 = vadd.s32 %v3162_v47, %v1353_v7  ;;  %v3236_v24 = vadd.s32 %v3162_v47, %v1354_v8 }
  0x9d   : > { %v3269_v37 = vadd.s32 %v3162_v47, %v1376_v21  ;;  %v3329_v21 = vadd.s32 %v3162_v47, %v1382_v51 }
  0xa3   : > { %664 = vmatmul.mubr.bf16.gmra.mrb[48].mxu0 %v295_v27  ;;  %792 = vmatmul.mubr.bf16.gmra.mrb[48].mxu1 %v327_v28  ;;  %v3245_v27 = vadd.s32 %v3162_v47, %v1355_v12  ;;  %v3248_v28 = vadd.s32 %v3162_v47, %v1356_v13  ;;  %v3320_v12 = vadd.s32 %v3162_v47, %v1364_v45  ;;  %v1367_v13 = vadd.s32 224, %v3159_v46 }
  0xa4   : > { %2591 = vmatprep.mubr.msk.bf16.mxu0 %vm438_vm0, %v298_v29  ;;  %2607 = vmatprep.mubr.msk.bf16.mxu1 %vm438_vm0, %v330_v30  ;;  %v1359_v29 = vadd.s32 160, %v3159_v46  ;;  %v3252_v30 = vadd.s32 %v3162_v47, %v1373_v16 }
  0xab   : > { %672 = vmatmul.mubr.bf16.gmra.mrb[52].mxu0 %v297_v33  ;;  %800 = vmatmul.mubr.bf16.gmra.mrb[52].mxu1 %v329_v34  ;;  %v1377_v33 = vadd.s32 304, %v3159_v46  ;;  %v3260_v34 = vadd.s32 %v3162_v47, %v1357_v18 }
  0xac   : > { %2592 = vmatprep.mubr.msk.bf16.mxu0 %vm438_vm0, %v300_v35  ;;  %2608 = vmatprep.mubr.msk.bf16.mxu1 %vm438_vm0, %v332_v36  ;;  %v3263_v35 = vadd.s32 %v3162_v47, %v1358_v19  ;;  %v3266_v36 = vadd.s32 %v3162_v47, %v1375_v20  ;;  %v3326_v20 = vadd.s32 %v3162_v47, %v1381_v50 }
  0xad   : > { %v3287_v49 = vadd.s32 %v3162_v47, %v1377_v33  ;;  %v3334_v33 = vadd.s32 %v3162_v47, %v1365_v53  ;;  %v3349_v53 = vadd.s32 %v3162_v47, %v1367_v13 }
  0xaf   : > { %4409 = vst [vmem:[#allocation4_spill] sm:$0xff] %v3334_v33  ;;  %4413 = vst [vmem:[#allocation8_spill] sm:$0xff] %v3349_v53 }
  0xb3   : > { %680 = vmatmul.mubr.bf16.gmra.mrb[56].mxu0 %v299_v39  ;;  %808 = vmatmul.mubr.bf16.gmra.mrb[56].mxu1 %v331_v40  ;;  %v1361_v39 = vadd.s32 176, %v3159_v46  ;;  %v1362_v40 = vadd.s32 184, %v3159_v46 }
  0xb4   : > { %2593 = vmatprep.mubr.msk.bf16.mxu0 %vm438_vm0, %v302_v41  ;;  %2609 = vmatprep.mubr.msk.bf16.mxu1 %vm438_vm0, %v334_v42  ;;  %v1379_v41 = vadd.s32 320, %v3159_v46  ;;  %v3277_v42 = vadd.s32 %v3162_v47, %v1359_v29 }
  0xb5   : > { %v3305_v0 = vadd.s32 %v3162_v47, %v1361_v39  ;;  %v3308_v1 = vadd.s32 %v3162_v47, %v1362_v40  ;;  %v3340_v39 = vadd.s32 %v3162_v47, %v1383_v55  ;;  %v3343_v40 = vadd.s32 %v3162_v47, %v1384_v56 }
  0xb6   : > { %v3311_v6 = vadd.s32 %v3162_v47, %v1379_v41 }
  0xb7   : > { %4411 = vst [vmem:[#allocation6_spill] sm:$0xff] %v3340_v39  ;;  %4412 = vst [vmem:[#allocation7_spill] sm:$0xff] %v3343_v40 }
  0xbb   : > { %688 = vmatmul.mubr.bf16.gmra.mrb[60].mxu0 %v301_v43  ;;  %816 = vmatmul.mubr.bf16.gmra.mrb[60].mxu1 %v333_v44  ;;  %v1380_v43 = vadd.s32 328, %v3159_v46  ;;  %v1363_v44 = vadd.s32 192, %v3159_v46 }
  0xbd   : > { %v3314_v9 = vadd.s32 %v3162_v47, %v1380_v43  ;;  %v3317_v11 = vadd.s32 %v3162_v47, %v1363_v44 }
 0x116   : > { %v569_v7 = vpop.f32.mrb[0].mxu0  ;;  %v697_v8 = vpop.f32.mrb[0].mxu1 }
 0x117   : > { %v570_v16 = vadd.f32 %v3294_v52, %v569_v7  ;;  %v571_v17 = vpop.f32.mrb[1].mxu0  ;;  %v698_v18 = vadd.f32 %v3294_v52, %v697_v8  ;;  %v699_v19 = vpop.f32.mrb[1].mxu1  ;;  %v1385_v7 = vadd.s32 368, %v3159_v46 }
 0x118   : > { %v572_v29 = vpop.f32.mrb[2].mxu0  ;;  %v700_v32 = vpop.f32.mrb[2].mxu1 }
 0x119   : > { %vm824_vm5 = vcmp.ge.f32.partialorder %v570_v16, 0.0  ;;  %v888_v41 = vmul.f32 0.01, %v570_v16  ;;  %v573_v43 = vadd.f32 %v3294_v52, %v572_v29  ;;  %v574_v44 = vpop.f32.mrb[3].mxu0  ;;  %vm856_vm7 = vcmp.ge.f32.partialorder %v698_v18, 0.0  ;;  %v702_v45 = vpop.f32.mrb[3].mxu1 }
 0x11a   : > { %v920_v50 = vmul.f32 0.01, %v698_v18  ;;  %v701_v51 = vadd.f32 %v3294_v52, %v700_v32  ;;  %v1386_v29 = vadd.s32 376, %v3159_v46 }
 0x11b   : > { %v952_v55 = vsel %vm824_vm5, %v570_v16, %v888_v41  ;;  %vm825_vm8 = vcmp.ge.f32.partialorder %v573_v43, 0.0  ;;  %v889_v56 = vmul.f32 0.01, %v573_v43 }
 0x11c   : > { %v2693_v8 = vpack.c.bf16 %v952_v55, %v952_v55  ;;  %v1660_v17 = vsel %vm1468_vm1, %v952_v55, 0.0  ;;  %v3356_v19 = vsel %vm856_vm7, %v698_v18, %v920_v50  ;;  %vm857_vm10 = vcmp.ge.f32.partialorder %v701_v51, 0.0 }
 0x11d   : > { %v1858_v32 = vmul.f32 %v1660_v17, %v1660_v17  ;;  %v953_v13 = vsel %vm825_vm8, %v573_v43, %v889_v56  ;;  %v2725_v44 = vpack.c.bf16 %v3356_v19, %v3356_v19  ;;  %v921_v41 = vmul.f32 0.01, %v701_v51 }
 0x11e   : > { %1273 = vst.msk [vmem:[%s3362_s11] sm:$0xf] %vm1272_vm2, %v2693_v8  ;;  %v2694_v16 = vpack.c.bf16 %v953_v13, %v953_v13  ;;  %v1661_v57 = vsel %vm1469_vm3, %v953_v13, 0.0  ;;  %v577_v18 = vpop.f32.mrb[4].mxu0  ;;  %v705_v45 = vpop.f32.mrb[4].mxu1  ;;  %v1369_v43 = vadd.s32 240, %v3159_v46 }
 0x11f   : > { %v1725_v50 = vsel %vm1724_vm4, %v1660_v17, 0.0  ;;  %v1726_v55 = vsel %vm1724_vm4, %v1661_v57, 0.0  ;;  %v1859_v56 = vmul.f32 %v1661_v57, %v1661_v57  ;;  %v578_v53 = vadd.f32 %v3294_v52, %v577_v18  ;;  %v579_v40 = vpop.f32.mrb[5].mxu0  ;;  %1305 = vst.msk [vmem:[%s3362_s11 + $0x80] sm:$0xf] %vm1272_vm2, %v2725_v44  ;;  %v707_v8 = vpop.f32.mrb[5].mxu1 }
 0x120   : > { %v1922_v39 = vsel %vm1724_vm4, %v1858_v32, 0.0  ;;  %1274 = vst.msk [vmem:[%s3362_s11 + $0x4] sm:$0xf] %vm1272_vm2, %v2694_v16  ;;  %v1727_v58 = vadd.f32 %v1726_v55, %v1725_v50  ;;  %v580_v13 = vpop.f32.mrb[6].mxu0  ;;  %v3378_v38 = vsel %vm857_vm10, %v701_v51, %v921_v41  ;;  %v708_v33 = vpop.f32.mrb[6].mxu1  ;;  %v1370_v17 = vadd.s32 248, %v3159_v46 }
 0x121   : > { %v1923_v57 = vsel %vm1724_vm4, %v1859_v56, 0.0  ;;  %vm826_vm11 = vcmp.ge.f32.partialorder %v578_v53, 0.0  ;;  %v890_v18 = vmul.f32 0.01, %v578_v53  ;;  %v581_v40 = vadd.f32 %v3294_v52, %v580_v13  ;;  %v582_v44 = vpop.f32.mrb[7].mxu0  ;;  %v710_v32 = vpop.f32.mrb[7].mxu1 }
 0x122   : > { %v1924_v16 = vadd.f32 %v1923_v57, %v1922_v39  ;;  %v2726_v50 = vpack.c.bf16 %v3378_v38, %v3378_v38  ;;  %v3387_v51 = vadd.s32 %v3162_v47, %v1368_v54  ;;  %v3390_v41 = vadd.s32 %v3162_v47, %v1385_v7 }
 0x123   : > { %v954_v55 = vsel %vm826_vm11, %v578_v53, %v890_v18  ;;  %vm827_vm13 = vcmp.ge.f32.partialorder %v581_v40, 0.0  ;;  %v891_v56 = vmul.f32 0.01, %v581_v40  ;;  %v3395_v8 = vadd.s32 %v3162_v47, %v1386_v29 }
 0x124   : > { %v2695_v39 = vpack.c.bf16 %v954_v55, %v954_v55  ;;  %v1662_v13 = vsel %vm1470_vm6, %v954_v55, 0.0  ;;  %1306 = vst.msk [vmem:[%s3362_s11 + $0x84] sm:$0xf] %vm1272_vm2, %v2726_v50  ;;  %v706_v54 = vadd.f32 %v3294_v52, %v705_v45  ;;  %v3403_v7 = vadd.s32 %v3162_v47, %v1369_v43 }
 0x125   : > { %4414 = vst [vmem:[#allocation9_spill] sm:$0xff] %v3395_v8  ;;  %v1728_v53 = vsel %vm1724_vm4, %v1662_v13, 0.0  ;;  %v1860_v57 = vmul.f32 %v1662_v13, %v1662_v13  ;;  %v955_v18 = vsel %vm827_vm13, %v581_v40, %v891_v56  ;;  %v3407_v44 = vadd.s32 %v3162_v47, %v1370_v17 }
 0x126   : > { %1275 = vst.msk [vmem:[%s3362_s11 + $0x8] sm:$0xf] %vm1272_vm2, %v2695_v39  ;;  %v1729_v29 = vadd.f32 %v1728_v53, %v1727_v58  ;;  %v2696_v59 = vpack.c.bf16 %v955_v18, %v955_v18  ;;  %v1663_v32 = vsel %vm1471_vm9, %v955_v18, 0.0  ;;  %v585_v50 = vpop.f32.mrb[8].mxu0  ;;  %v709_v45 = vadd.f32 %v3294_v52, %v708_v33  ;;  %v3414_v43 = vpop.f32.mrb[8].mxu1 }
 0x127   : > { %4415 = vst [vmem:[#allocation10_spill] sm:$0xff] %v3407_v44  ;;  %v1925_v55 = vsel %vm1724_vm4, %v1860_v57, 0.0  ;;  %v1730_v40 = vsel %vm1724_vm4, %v1663_v32, 0.0  ;;  %v1861_v56 = vmul.f32 %v1663_v32, %v1663_v32  ;;  %v586_v17 = vadd.f32 %v3294_v52, %v585_v50  ;;  %v587_v13 = vpop.f32.mrb[9].mxu0  ;;  %v715_v8 = vpop.f32.mrb[9].mxu1 }
 0x128   : > { %v1926_v39 = vadd.f32 %v1925_v55, %v1924_v16  ;;  %1276 = vst.msk [vmem:[%s3362_s11 + $0xc] sm:$0xf] %vm1272_vm2, %v2696_v59  ;;  %v1731_v58 = vadd.f32 %v1730_v40, %v1729_v29  ;;  %v588_v60 = vpop.f32.mrb[10].mxu0  ;;  %vm858_vm0 = vcmp.ge.f32.partialorder %v706_v54, 0.0  ;;  %v922_v53 = vmul.f32 0.01, %v706_v54 }
 0x129   : > { %v3421_v18 = vpop.f32.mrb[10].mxu1  ;;  %v1927_v33 = vsel %vm1724_vm4, %v1861_v56, 0.0  ;;  %vm828_vm1 = vcmp.ge.f32.partialorder %v586_v17, 0.0  ;;  %v892_v57 = vmul.f32 0.01, %v586_v17  ;;  %v589_v44 = vadd.f32 %v3294_v52, %v588_v60  ;;  %v590_v32 = vpop.f32.mrb[11].mxu0 }
 0x12a   : > { %vm1474_vm3 = vcmp.lt.s32.totalorder %v3196_v2, 800  ;;  %v718_v50 = vpop.f32.mrb[11].mxu1  ;;  %v1928_v8 = vadd.f32 %v1927_v33, %v1926_v39  ;;  %v3426_v16 = vsel %vm858_vm0, %v706_v54, %v922_v53  ;;  %vm859_vm5 = vcmp.ge.f32.partialorder %v709_v45, 0.0 }
 0x12b   : > { %v923_v29 = vmul.f32 0.01, %v709_v45  ;;  %v956_v59 = vsel %vm828_vm1, %v586_v17, %v892_v57  ;;  %vm829_vm6 = vcmp.ge.f32.partialorder %v589_v44, 0.0  ;;  %v893_v55 = vmul.f32 0.01, %v589_v44 }
 0x12c   : > { %vm1475_vm7 = vcmp.lt.s32.totalorder %v3199_v3, 800  ;;  %vm1501_vm8 = vcmp.lt.s32.totalorder %v3242_v26, 800  ;;  %v2727_v40 = vpack.c.bf16 %v3426_v16, %v3426_v16  ;;  %v2697_v56 = vpack.c.bf16 %v956_v59, %v956_v59 }
 0x12d   : > { %v1664_v13 = vsel %vm1472_vm12, %v956_v59, 0.0  ;;  %v1387_v54 = vadd.s32 384, %v3159_v46  ;;  %v1388_v39 = vadd.s32 392, %v3159_v46  ;;  %v957_v53 = vsel %vm829_vm6, %v589_v44, %v893_v55 }
 0x12e   : > { %v1732_v60 = vsel %vm1724_vm4, %v1664_v13, 0.0  ;;  %v1862_v17 = vmul.f32 %v1664_v13, %v1664_v13  ;;  %1307 = vst.msk [vmem:[%s3362_s11 + $0x88] sm:$0xf] %vm1272_vm2, %v2727_v40  ;;  %v3440_v33 = vsel %vm859_vm5, %v709_v45, %v923_v29  ;;  %1277 = vst.msk [vmem:[%s3362_s11 + $0x10] sm:$0xf] %vm1272_vm2, %v2697_v56  ;;  %v2698_v32 = vpack.c.bf16 %v957_v53, %v957_v53  ;;  %v593_v50 = vpop.f32.mrb[12].mxu0 }
 0x12f   : > { %v1733_v57 = vadd.f32 %v1732_v60, %v1731_v58  ;;  %v1665_v62 = vsel %vm1473_vm14, %v957_v53, 0.0  ;;  %v1692_v59 = vsel %vm1500_vm15, %v3356_v19, 0.0  ;;  %v3449_v13 = vpop.f32.mrb[12].mxu1  ;;  %v594_v29 = vadd.f32 %v3294_v52, %v593_v50  ;;  %v595_v40 = vpop.f32.mrb[13].mxu0 }
 0x130   : > { %v1929_v44 = vsel %vm1724_vm4, %v1862_v17, 0.0  ;;  %v1734_v55 = vsel %vm1724_vm4, %v1665_v62, 0.0  ;;  %v1863_v45 = vmul.f32 %v1665_v62, %v1665_v62  ;;  %v723_v58 = vpop.f32.mrb[13].mxu1  ;;  %1278 = vst.msk [vmem:[%s3362_s11 + $0x14] sm:$0xf] %vm1272_vm2, %v2698_v32  ;;  %v596_v60 = vpop.f32.mrb[14].mxu0  ;;  %v2728_v25 = vpack.c.bf16 %v3440_v33, %v3440_v33 }
 0x131   : > { %v1930_v56 = vadd.f32 %v1929_v44, %v1928_v8  ;;  %v1735_v63 = vadd.f32 %v1734_v55, %v1733_v57  ;;  %v3458_v19 = vpop.f32.mrb[14].mxu1  ;;  %v3461_v17 = vadd.s32 %v3162_v47, %v1387_v54  ;;  %vm830_vm9 = vcmp.ge.f32.partialorder %v594_v29, 0.0  ;;  %v598_v8 = vpop.f32.mrb[15].mxu0 }
 0x132   : > { %v1931_v53 = vsel %vm1724_vm4, %v1863_v45, 0.0  ;;  %v894_v62 = vmul.f32 0.01, %v594_v29  ;;  %v597_v50 = vadd.f32 %v3294_v52, %v596_v60  ;;  %vm1476_vm10 = vcmp.lt.s32.totalorder %v3202_v4, 800  ;;  %v726_v32 = vpop.f32.mrb[15].mxu1 }
 0x133   : > { %v1932_v57 = vadd.f32 %v1931_v53, %v1930_v56  ;;  %v3467_v44 = vsel %vm1724_vm4, %v1692_v59, 0.0  ;;  %1308 = vst.msk [vmem:[%s3362_s11 + $0x8c] sm:$0xf] %vm1272_vm2, %v2728_v25  ;;  %v714_v54 = vadd.f32 %v3294_v52, %v3414_v43  ;;  %v3474_v55 = vadd.s32 %v3162_v47, %v1388_v39 }
 0x134   : > { %v958_v45 = vsel %vm830_vm9, %v594_v29, %v894_v62  ;;  %vm831_vm11 = vcmp.ge.f32.partialorder %v597_v50, 0.0  ;;  %v895_v40 = vmul.f32 0.01, %v597_v50  ;;  %vm1477_vm12 = vcmp.lt.s32.totalorder %v3205_v5, 800 }
 0x135   : > { %v1890_v58 = vmul.f32 %v1692_v59, %v1692_v59  ;;  %vm1502_vm13 = vcmp.lt.s32.totalorder %v3252_v30, 800  ;;  %v2699_v56 = vpack.c.bf16 %v958_v45, %v958_v45  ;;  %v1666_v60 = vsel %vm1474_vm3, %v958_v45, 0.0 }
 0x136   : > { %vm860_vm14 = vcmp.ge.f32.partialorder %v714_v54, 0.0  ;;  %v717_v43 = vadd.f32 %v3294_v52, %v3421_v18  ;;  %v1736_v25 = vsel %vm1724_vm4, %v1666_v60, 0.0  ;;  %v1864_v39 = vmul.f32 %v1666_v60, %v1666_v60  ;;  %v601_v32 = vpop.f32.mrb[16].mxu0  ;;  %v3490_v45 = vpop.f32.mrb[16].mxu1 }
 0x137   : > { %v959_v53 = vsel %vm831_vm11, %v597_v50, %v895_v40  ;;  %v924_v29 = vmul.f32 0.01, %v714_v54  ;;  %1279 = vst.msk [vmem:[%s3362_s11 + $0x18] sm:$0xf] %vm1272_vm2, %v2699_v56  ;;  %v1737_v62 = vadd.f32 %v1736_v25, %v1735_v63  ;;  %v1693_v2 = vsel %vm1501_vm8, %v3378_v38, 0.0  ;;  %v603_v56 = vpop.f32.mrb[17].mxu0 }
 0x138   : > { %v2700_v59 = vpack.c.bf16 %v959_v53, %v959_v53  ;;  %v1667_v8 = vsel %vm1475_vm7, %v959_v53, 0.0  ;;  %v1933_v18 = vsel %vm1724_vm4, %v1864_v39, 0.0  ;;  %v602_v60 = vadd.f32 %v3294_v52, %v601_v32  ;;  %v731_v63 = vpop.f32.mrb[17].mxu1  ;;  %v604_v53 = vpop.f32.mrb[18].mxu0 }
 0x139   : > { %v1738_v50 = vsel %vm1724_vm4, %v1667_v8, 0.0  ;;  %v1865_v40 = vmul.f32 %v1667_v8, %v1667_v8  ;;  %v1934_v25 = vadd.f32 %v1933_v18, %v1932_v57  ;;  %v3498_v47 = vsel %vm860_vm14, %v714_v54, %v924_v29  ;;  %v3500_v26 = vpop.f32.mrb[18].mxu1  ;;  %v606_v32 = vpop.f32.mrb[19].mxu0 }
 0x13a   : > { %1280 = vst.msk [vmem:[%s3362_s11 + $0x1c] sm:$0xf] %vm1272_vm2, %v2700_v59  ;;  %v1739_v3 = vadd.f32 %v1738_v50, %v1737_v62  ;;  %vm861_vm15 = vcmp.ge.f32.partialorder %v717_v43, 0.0  ;;  %vm832_vm0 = vcmp.ge.f32.partialorder %v602_v60, 0.0  ;;  %v896_v39 = vmul.f32 0.01, %v602_v60 }
 0x13b   : > { %v1935_v38 = vsel %vm1724_vm4, %v1865_v40, 0.0  ;;  %v605_v8 = vadd.f32 %v3294_v52, %v604_v53  ;;  %vm1478_vm1 = vcmp.lt.s32.totalorder %v3212_v10, 800  ;;  %vm1503_vm3 = vcmp.lt.s32.totalorder %v3255_v31, 800  ;;  %v734_v57 = vpop.f32.mrb[19].mxu1 }
 0x13c   : > { %v1936_v62 = vadd.f32 %v1935_v38, %v1934_v25  ;;  %v3507_v54 = vsel %vm1724_vm4, %v1890_v58, 0.0  ;;  %v2729_v29 = vpack.c.bf16 %v3498_v47, %v3498_v47  ;;  %v925_v59 = vmul.f32 0.01, %v717_v43 }
 0x13d   : > { %v960_v18 = vsel %vm832_vm0, %v602_v60, %v896_v39  ;;  %vm833_vm5 = vcmp.ge.f32.partialorder %v605_v8, 0.0  ;;  %v897_v50 = vmul.f32 0.01, %v605_v8  ;;  %vm1479_vm6 = vcmp.lt.s32.totalorder %v3218_v14, 800 }
 0x13e   : > { %v3513_v40 = vsel %vm1724_vm4, %v1693_v2, 0.0  ;;  %v2701_v56 = vpack.c.bf16 %v960_v18, %v960_v18  ;;  %v1668_v63 = vsel %vm1476_vm10, %v960_v18, 0.0  ;;  %v1891_v25 = vmul.f32 %v1693_v2, %v1693_v2  ;;  %1309 = vst.msk [vmem:[%s3362_s11 + $0x90] sm:$0xf] %vm1272_vm2, %v2729_v29  ;;  %v3533_v29 = vpop.f32.mrb[20].mxu1 }
 0x13f   : > { %v3520_v58 = vsel %vm861_vm15, %v717_v43, %v925_v59  ;;  %v1740_v53 = vsel %vm1724_vm4, %v1668_v63, 0.0  ;;  %v1866_v60 = vmul.f32 %v1668_v63, %v1668_v63  ;;  %v961_v38 = vsel %vm833_vm5, %v605_v8, %v897_v50  ;;  %v609_v43 = vpop.f32.mrb[20].mxu0 }
 0x140   : > { %vm1504_vm7 = vcmp.lt.s32.totalorder %v3266_v36, 800  ;;  %v2730_v39 = vpack.c.bf16 %v3520_v58, %v3520_v58  ;;  %1281 = vst.msk [vmem:[%s3362_s11 + $0x20] sm:$0xf] %vm1272_vm2, %v2701_v56  ;;  %v1741_v4 = vadd.f32 %v1740_v53, %v1739_v3  ;;  %v2702_v2 = vpack.c.bf16 %v961_v38, %v961_v38  ;;  %v611_v56 = vpop.f32.mrb[21].mxu0  ;;  %v739_v3 = vpop.f32.mrb[21].mxu1 }
 0x141   : > { %v1669_v32 = vsel %vm1477_vm12, %v961_v38, 0.0  ;;  %v1694_v57 = vsel %vm1502_vm13, %v3426_v16, 0.0  ;;  %v1937_v8 = vsel %vm1724_vm4, %v1866_v60, 0.0  ;;  %v610_v50 = vadd.f32 %v3294_v52, %v609_v43  ;;  %v612_v53 = vpop.f32.mrb[22].mxu0  ;;  %v3547_v60 = vpop.f32.mrb[22].mxu1 }
 0x142   : > { %v1742_v59 = vsel %vm1724_vm4, %v1669_v32, 0.0  ;;  %v1867_v18 = vmul.f32 %v1669_v32, %v1669_v32  ;;  %1310 = vst.msk [vmem:[%s3362_s11 + $0x94] sm:$0xf] %vm1272_vm2, %v2730_v39  ;;  %v1938_v5 = vadd.f32 %v1937_v8, %v1936_v62  ;;  %1282 = vst.msk [vmem:[%s3362_s11 + $0x24] sm:$0xf] %vm1272_vm2, %v2702_v2  ;;  %v3543_v30 = vsel %vm1724_vm4, %v1891_v25, 0.0 }
 0x143   : > { %v1743_v63 = vadd.f32 %v1742_v59, %v1741_v4  ;;  %v722_v16 = vadd.f32 %v3294_v52, %v3449_v13  ;;  %vm834_vm8 = vcmp.ge.f32.partialorder %v610_v50, 0.0  ;;  %v898_v32 = vmul.f32 0.01, %v610_v50  ;;  %v614_v43 = vpop.f32.mrb[23].mxu0  ;;  %v742_v62 = vpop.f32.mrb[23].mxu1 }
 0x144   : > { %v1939_v38 = vsel %vm1724_vm4, %v1867_v18, 0.0  ;;  %v613_v39 = vadd.f32 %v3294_v52, %v612_v53  ;;  %vm1480_vm9 = vcmp.lt.s32.totalorder %v3221_v15, 800  ;;  %v3553_v2 = vsel %vm1724_vm4, %v1694_v57, 0.0 }
 0x145   : > { %v1940_v4 = vadd.f32 %v1939_v38, %v1938_v5  ;;  %v1892_v25 = vmul.f32 %v1694_v57, %v1694_v57  ;;  %vm862_vm10 = vcmp.ge.f32.partialorder %v722_v16, 0.0  ;;  %v962_v13 = vsel %vm834_vm8, %v610_v50, %v898_v32 }
 0x146   : > { %vm835_vm11 = vcmp.ge.f32.partialorder %v613_v39, 0.0  ;;  %v899_v8 = vmul.f32 0.01, %v613_v39  ;;  %vm1481_vm12 = vcmp.lt.s32.totalorder %v3230_v22, 800  ;;  %v926_v59 = vmul.f32 0.01, %v722_v16 }
 0x147   : > { %v2703_v18 = vpack.c.bf16 %v962_v13, %v962_v13  ;;  %v1670_v56 = vsel %vm1478_vm1, %v962_v13, 0.0  ;;  %v1695_v3 = vsel %vm1503_vm3, %v3440_v33, 0.0  ;;  %v725_v5 = vadd.f32 %v3294_v52, %v3458_v19  ;;  %v617_v33 = vpop.f32.mrb[24].mxu0  ;;  %v3573_v43 = vpop.f32.mrb[24].mxu1 }
 0x148   : > { %v1744_v57 = vsel %vm1724_vm4, %v1670_v56, 0.0  ;;  %v1868_v53 = vmul.f32 %v1670_v56, %v1670_v56  ;;  %v963_v50 = vsel %vm835_vm11, %v613_v39, %v899_v8  ;;  %vm1505_vm13 = vcmp.lt.s32.totalorder %v3269_v37, 800  ;;  %v619_v8 = vpop.f32.mrb[25].mxu0 }
 0x149   : > { %v3565_v38 = vsel %vm862_vm10, %v722_v16, %v926_v59  ;;  %1283 = vst.msk [vmem:[%s3362_s11 + $0x28] sm:$0xf] %vm1272_vm2, %v2703_v18  ;;  %v1745_v10 = vadd.f32 %v1744_v57, %v1743_v63  ;;  %v2704_v32 = vpack.c.bf16 %v963_v50, %v963_v50  ;;  %v1671_v31 = vsel %vm1479_vm6, %v963_v50, 0.0  ;;  %v747_v63 = vpop.f32.mrb[25].mxu1  ;;  %v620_v18 = vpop.f32.mrb[26].mxu0 }
 0x14a   : > { %v2731_v19 = vpack.c.bf16 %v3565_v38, %v3565_v38  ;;  %v1941_v39 = vsel %vm1724_vm4, %v1868_v53, 0.0  ;;  %v1746_v62 = vsel %vm1724_vm4, %v1671_v31, 0.0  ;;  %v1869_v16 = vmul.f32 %v1671_v31, %v1671_v31  ;;  %v3585_v57 = vpop.f32.mrb[26].mxu1 }
 0x14b   : > { %v618_v13 = vadd.f32 %v3294_v52, %v617_v33  ;;  %v1942_v59 = vadd.f32 %v1941_v39, %v1940_v4  ;;  %1284 = vst.msk [vmem:[%s3362_s11 + $0x2c] sm:$0xf] %vm1272_vm2, %v2704_v32  ;;  %v1747_v14 = vadd.f32 %v1746_v62, %v1745_v10  ;;  %v1696_v56 = vsel %vm1504_vm7, %v3498_v47, 0.0  ;;  %v622_v4 = vpop.f32.mrb[27].mxu0  ;;  %v750_v10 = vpop.f32.mrb[27].mxu1 }
 0x14c   : > { %1311 = vst.msk [vmem:[%s3362_s11 + $0x98] sm:$0xf] %vm1272_vm2, %v2731_v19  ;;  %vm863_vm14 = vcmp.ge.f32.partialorder %v725_v5, 0.0  ;;  %v1943_v53 = vsel %vm1724_vm4, %v1869_v16, 0.0  ;;  %v621_v31 = vadd.f32 %v3294_v52, %v620_v18  ;;  %vm1482_vm0 = vcmp.lt.s32.totalorder %v3233_v23, 800 }
 0x14d   : > { %vm836_vm15 = vcmp.ge.f32.partialorder %v618_v13, 0.0  ;;  %v900_v50 = vmul.f32 0.01, %v618_v13  ;;  %v1944_v32 = vadd.f32 %v1943_v53, %v1942_v59  ;;  %v3591_v33 = vsel %vm1724_vm4, %v1892_v25, 0.0 }
 0x14e   : > { %v3594_v47 = vsel %vm1724_vm4, %v1695_v3, 0.0  ;;  %v927_v36 = vmul.f32 0.01, %v725_v5  ;;  %vm837_vm1 = vcmp.ge.f32.partialorder %v621_v31, 0.0  ;;  %v901_v39 = vmul.f32 0.01, %v621_v31 }
 0x14f   : > { %v964_v19 = vsel %vm836_vm15, %v618_v13, %v900_v50  ;;  %vm1483_vm3 = vcmp.lt.s32.totalorder %v3236_v24, 800  ;;  %v1893_v62 = vmul.f32 %v1695_v3, %v1695_v3  ;;  %v1894_v63 = vmul.f32 %v1696_v56, %v1696_v56  ;;  %v625_v4 = vpop.f32.mrb[28].mxu0  ;;  %v3611_v10 = vpop.f32.mrb[28].mxu1 }
 0x150   : > { %v2705_v16 = vpack.c.bf16 %v964_v19, %v964_v19  ;;  %v1672_v8 = vsel %vm1480_vm9, %v964_v19, 0.0  ;;  %v3600_v59 = vsel %vm863_vm14, %v725_v5, %v927_v36  ;;  %v965_v53 = vsel %vm837_vm1, %v621_v31, %v901_v39 }
 0x151   : > { %v1748_v25 = vsel %vm1724_vm4, %v1672_v8, 0.0  ;;  %v1870_v18 = vmul.f32 %v1672_v8, %v1672_v8  ;;  %v2732_v13 = vpack.c.bf16 %v3600_v59, %v3600_v59  ;;  %v2706_v50 = vpack.c.bf16 %v965_v53, %v965_v53  ;;  %v627_v8 = vpop.f32.mrb[29].mxu0 }
 0x152   : > { %1285 = vst.msk [vmem:[%s3362_s11 + $0x30] sm:$0xf] %vm1272_vm2, %v2705_v16  ;;  %v1749_v3 = vadd.f32 %v1748_v25, %v1747_v14  ;;  %v1673_v15 = vsel %vm1481_vm12, %v965_v53, 0.0  ;;  %v730_v5 = vadd.f32 %v3294_v52, %v3490_v45  ;;  %v626_v39 = vadd.f32 %v3294_v52, %v625_v4  ;;  %v755_v14 = vpop.f32.mrb[29].mxu1  ;;  %v628_v25 = vpop.f32.mrb[30].mxu0 }
 0x153   : > { %v1945_v36 = vsel %vm1724_vm4, %v1870_v18, 0.0  ;;  %v1750_v31 = vsel %vm1724_vm4, %v1673_v15, 0.0  ;;  %v1871_v19 = vmul.f32 %v1673_v15, %v1673_v15  ;;  %1312 = vst.msk [vmem:[%s3362_s11 + $0x9c] sm:$0xf] %vm1272_vm2, %v2732_v13  ;;  %1286 = vst.msk [vmem:[%s3362_s11 + $0x34] sm:$0xf] %vm1272_vm2, %v2706_v50 }
 0x154   : > { %v1946_v16 = vadd.f32 %v1945_v36, %v1944_v32  ;;  %v1751_v22 = vadd.f32 %v1750_v31, %v1749_v3  ;;  %v3621_v45 = vsel %vm1724_vm4, %v1893_v62, 0.0  ;;  %v1697_v18 = vsel %vm1505_vm13, %v3520_v58, 0.0  ;;  %v3627_v53 = vpop.f32.mrb[30].mxu1  ;;  %v630_v50 = vpop.f32.mrb[31].mxu0 }
 0x155   : > { %vm1506_vm5 = vcmp.lt.s32.totalorder %v3287_v49, 800  ;;  %v1947_v15 = vsel %vm1724_vm4, %v1871_v19, 0.0  ;;  %vm838_vm6 = vcmp.ge.f32.partialorder %v626_v39, 0.0  ;;  %v902_v13 = vmul.f32 0.01, %v626_v39  ;;  %v758_v3 = vpop.f32.mrb[31].mxu1 }
 0x156   : > { %v629_v32 = vadd.f32 %v3294_v52, %v628_v25  ;;  %vm1484_vm7 = vcmp.lt.s32.totalorder %v3245_v27, 800  ;;  %v1948_v62 = vadd.f32 %v1947_v15, %v1946_v16  ;;  %v3633_v4 = vsel %vm1724_vm4, %v1696_v56, 0.0  ;;  %v3653_v3 = vpop.f32.mrb[32].mxu1 }
 0x157   : > { %vm864_vm8 = vcmp.ge.f32.partialorder %v730_v5, 0.0  ;;  %v928_v37 = vmul.f32 0.01, %v730_v5  ;;  %v966_v58 = vsel %vm838_vm6, %v626_v39, %v902_v13  ;;  %vm1485_vm10 = vcmp.lt.s32.totalorder %v3248_v28, 800 }
 0x158   : > { %vm839_vm9 = vcmp.ge.f32.partialorder %v629_v32, 0.0  ;;  %v903_v36 = vmul.f32 0.01, %v629_v32  ;;  %v3637_v31 = vsel %vm1724_vm4, %v1894_v63, 0.0  ;;  %v2707_v19 = vpack.c.bf16 %v966_v58, %v966_v58 }
 0x159   : > { %v1674_v8 = vsel %vm1482_vm0, %v966_v58, 0.0  ;;  %v1895_v14 = vmul.f32 %v1697_v18, %v1697_v18  ;;  %v3641_v16 = vsel %vm864_vm8, %v730_v5, %v928_v37  ;;  %vm1507_vm11 = vcmp.lt.s32.totalorder %v3302_v61, 800  ;;  %v633_v5 = vpop.f32.mrb[32].mxu0 }
 0x15a   : > { %v1752_v56 = vsel %vm1724_vm4, %v1674_v8, 0.0  ;;  %v1872_v25 = vmul.f32 %v1674_v8, %v1674_v8  ;;  %v967_v15 = vsel %vm839_vm9, %v629_v32, %v903_v36  ;;  %v2733_v39 = vpack.c.bf16 %v3641_v16, %v3641_v16  ;;  %1287 = vst.msk [vmem:[%s3362_s11 + $0x38] sm:$0xf] %vm1272_vm2, %v2707_v19  ;;  %v635_v8 = vpop.f32.mrb[33].mxu0 }
 0x15b   : > { %v1753_v63 = vadd.f32 %v1752_v56, %v1751_v22  ;;  %v2708_v13 = vpack.c.bf16 %v967_v15, %v967_v15  ;;  %v1675_v23 = vsel %vm1483_vm3, %v967_v15, 0.0  ;;  %v733_v50 = vadd.f32 %v3294_v52, %v3500_v26  ;;  %v763_v22 = vpop.f32.mrb[33].mxu1  ;;  %v636_v56 = vpop.f32.mrb[34].mxu0 }
 0x15c   : > { %v1949_v32 = vsel %vm1724_vm4, %v1872_v25, 0.0  ;;  %v1754_v37 = vsel %vm1724_vm4, %v1675_v23, 0.0  ;;  %v1873_v58 = vmul.f32 %v1675_v23, %v1675_v23  ;;  %v634_v36 = vadd.f32 %v3294_v52, %v633_v5  ;;  %1313 = vst.msk [vmem:[%s3362_s11 + $0xa0] sm:$0xf] %vm1272_vm2, %v2733_v39  ;;  %v3667_v15 = vpop.f32.mrb[34].mxu1  ;;  %v638_v8 = vpop.f32.mrb[35].mxu0 }
 0x15d   : > { %v1950_v19 = vadd.f32 %v1949_v32, %v1948_v62  ;;  %1288 = vst.msk [vmem:[%s3362_s11 + $0x3c] sm:$0xf] %vm1272_vm2, %v2708_v13  ;;  %v1755_v24 = vadd.f32 %v1754_v37, %v1753_v63  ;;  %v3663_v26 = vsel %vm1724_vm4, %v1697_v18, 0.0  ;;  %v738_v25 = vadd.f32 %v3294_v52, %v3533_v29  ;;  %v766_v62 = vpop.f32.mrb[35].mxu1 }
 0x15e   : > { %v1951_v23 = vsel %vm1724_vm4, %v1873_v58, 0.0  ;;  %vm840_vm12 = vcmp.ge.f32.partialorder %v634_v36, 0.0  ;;  %v904_v5 = vmul.f32 0.01, %v634_v36  ;;  %v637_v39 = vadd.f32 %v3294_v52, %v636_v56  ;;  %v3691_v8 = vpop.f32.mrb[36].mxu1 }
 0x15f   : > { %vm1486_vm13 = vcmp.lt.s32.totalorder %v3260_v34, 800  ;;  %v1952_v63 = vadd.f32 %v1951_v23, %v1950_v19  ;;  %v3673_v13 = vsel %vm1724_vm4, %v1895_v14, 0.0  ;;  %vm865_vm14 = vcmp.ge.f32.partialorder %v733_v50, 0.0 }
 0x160   : > { %v929_v18 = vmul.f32 0.01, %v733_v50  ;;  %v968_v29 = vsel %vm840_vm12, %v634_v36, %v904_v5  ;;  %vm841_vm15 = vcmp.ge.f32.partialorder %v637_v39, 0.0  ;;  %v905_v32 = vmul.f32 0.01, %v637_v39 }
 0x161   : > { %vm1487_vm0 = vcmp.lt.s32.totalorder %v3263_v35, 800  ;;  %v1698_v37 = vsel %vm1506_vm5, %v3565_v38, 0.0  ;;  %v2709_v58 = vpack.c.bf16 %v968_v29, %v968_v29  ;;  %v1676_v22 = vsel %vm1484_vm7, %v968_v29, 0.0 }
 0x162   : > { %v3681_v19 = vsel %vm865_vm14, %v733_v50, %v929_v18  ;;  %vm866_vm1 = vcmp.ge.f32.partialorder %v738_v25, 0.0  ;;  %v1756_v14 = vsel %vm1724_vm4, %v1676_v22, 0.0  ;;  %v1874_v56 = vmul.f32 %v1676_v22, %v1676_v22  ;;  %v641_v50 = vpop.f32.mrb[36].mxu0 }
 0x163   : > { %v969_v36 = vsel %vm841_vm15, %v637_v39, %v905_v32  ;;  %vm1508_vm3 = vcmp.lt.s32.totalorder %v3311_v6, 800  ;;  %v2734_v23 = vpack.c.bf16 %v3681_v19, %v3681_v19  ;;  %1289 = vst.msk [vmem:[%s3362_s11 + $0x40] sm:$0xf] %vm1272_vm2, %v2709_v58  ;;  %v1757_v49 = vadd.f32 %v1756_v14, %v1755_v24  ;;  %v643_v32 = vpop.f32.mrb[37].mxu0  ;;  %v771_v58 = vpop.f32.mrb[37].mxu1 }
 0x164   : > { %v2710_v38 = vpack.c.bf16 %v969_v36, %v969_v36  ;;  %v1677_v27 = vsel %vm1485_vm10, %v969_v36, 0.0  ;;  %v930_v5 = vmul.f32 0.01, %v738_v25  ;;  %v1953_v62 = vsel %vm1724_vm4, %v1874_v56, 0.0  ;;  %v644_v22 = vpop.f32.mrb[38].mxu0  ;;  %v3703_v56 = vpop.f32.mrb[38].mxu1 }
 0x165   : > { %v1758_v39 = vsel %vm1724_vm4, %v1677_v27, 0.0  ;;  %v1875_v18 = vmul.f32 %v1677_v27, %v1677_v27  ;;  %v642_v29 = vadd.f32 %v3294_v52, %v641_v50  ;;  %1314 = vst.msk [vmem:[%s3362_s11 + $0xa4] sm:$0xf] %vm1272_vm2, %v2734_v23  ;;  %v1954_v24 = vadd.f32 %v1953_v62, %v1952_v63  ;;  %v646_v23 = vpop.f32.mrb[39].mxu0  ;;  %v774_v63 = vpop.f32.mrb[39].mxu1 }
 0x166   : > { %1290 = vst.msk [vmem:[%s3362_s11 + $0x44] sm:$0xf] %vm1272_vm2, %v2710_v38  ;;  %v1759_v28 = vadd.f32 %v1758_v39, %v1757_v49  ;;  %v1896_v14 = vmul.f32 %v1698_v37, %v1698_v37  ;;  %v1699_v36 = vsel %vm1507_vm11, %v3600_v59, 0.0  ;;  %v645_v32 = vadd.f32 %v3294_v52, %v644_v22  ;;  %v3735_v23 = vpop.f32.mrb[40].mxu1 }
 0x167   : > { %v1955_v27 = vsel %vm1724_vm4, %v1875_v18, 0.0  ;;  %vm842_vm5 = vcmp.ge.f32.partialorder %v642_v29, 0.0  ;;  %v906_v50 = vmul.f32 0.01, %v642_v29  ;;  %vm1488_vm6 = vcmp.lt.s32.totalorder %v3277_v42, 800 }
 0x168   : > { %v1956_v38 = vadd.f32 %v1955_v27, %v1954_v24  ;;  %v3709_v49 = vsel %vm1724_vm4, %v1698_v37, 0.0  ;;  %v3712_v62 = vsel %vm866_vm1, %v738_v25, %v930_v5  ;;  %v741_v61 = vadd.f32 %v3294_v52, %v3547_v60 }
 0x169   : > { %v970_v59 = vsel %vm842_vm5, %v642_v29, %v906_v50  ;;  %vm843_vm7 = vcmp.ge.f32.partialorder %v645_v32, 0.0  ;;  %v907_v39 = vmul.f32 0.01, %v645_v32  ;;  %vm1489_vm8 = vcmp.lt.s32.totalorder %v3284_v48, 800  ;;  %v649_v50 = vpop.f32.mrb[40].mxu0 }
 0x16a   : > { %v2735_v18 = vpack.c.bf16 %v3712_v62, %v3712_v62  ;;  %v2711_v58 = vpack.c.bf16 %v970_v59, %v970_v59  ;;  %v1678_v37 = vsel %vm1486_vm13, %v970_v59, 0.0  ;;  %v3722_v25 = vsel %vm1724_vm4, %v1896_v14, 0.0 }
 0x16b   : > { %v3725_v5 = vsel %vm1724_vm4, %v1699_v36, 0.0  ;;  %v1760_v60 = vsel %vm1724_vm4, %v1678_v37, 0.0  ;;  %v1876_v29 = vmul.f32 %v1678_v37, %v1678_v37  ;;  %v971_v24 = vsel %vm843_vm7, %v645_v32, %v907_v39  ;;  %v651_v39 = vpop.f32.mrb[41].mxu0 }
 0x16c   : > { %v1897_v22 = vmul.f32 %v1699_v36, %v1699_v36  ;;  %vm1509_vm9 = vcmp.lt.s32.totalorder %v3314_v9, 800  ;;  %1315 = vst.msk [vmem:[%s3362_s11 + $0xa8] sm:$0xf] %vm1272_vm2, %v2735_v18  ;;  %1291 = vst.msk [vmem:[%s3362_s11 + $0x48] sm:$0xf] %vm1272_vm2, %v2711_v58  ;;  %v1761_v34 = vadd.f32 %v1760_v60, %v1759_v28  ;;  %v2712_v27 = vpack.c.bf16 %v971_v24, %v971_v24  ;;  %v779_v18 = vpop.f32.mrb[41].mxu1 }
 0x16d   : > { %v1679_v14 = vsel %vm1487_vm0, %v971_v24, 0.0  ;;  %vm867_vm10 = vcmp.ge.f32.partialorder %v741_v61, 0.0  ;;  %v1957_v63 = vsel %vm1724_vm4, %v1876_v29, 0.0  ;;  %v650_v59 = vadd.f32 %v3294_v52, %v649_v50  ;;  %v652_v58 = vpop.f32.mrb[42].mxu0  ;;  %v3745_v24 = vpop.f32.mrb[42].mxu1 }
 0x16e   : > { %v1762_v36 = vsel %vm1724_vm4, %v1679_v14, 0.0  ;;  %v1877_v32 = vmul.f32 %v1679_v14, %v1679_v14  ;;  %v1958_v37 = vadd.f32 %v1957_v63, %v1956_v38  ;;  %1292 = vst.msk [vmem:[%s3362_s11 + $0x4c] sm:$0xf] %vm1272_vm2, %v2712_v27  ;;  %v1700_v35 = vsel %vm1508_vm3, %v3641_v16, 0.0  ;;  %v654_v39 = vpop.f32.mrb[43].mxu0  ;;  %v782_v38 = vpop.f32.mrb[43].mxu1 }
 0x16f   : > { %v1763_v28 = vadd.f32 %v1762_v36, %v1761_v34  ;;  %v931_v60 = vmul.f32 0.01, %v741_v61  ;;  %vm844_vm11 = vcmp.ge.f32.partialorder %v650_v59, 0.0  ;;  %v908_v14 = vmul.f32 0.01, %v650_v59 }
 0x170   : > { %v1959_v29 = vsel %vm1724_vm4, %v1877_v32, 0.0  ;;  %v653_v50 = vadd.f32 %v3294_v52, %v652_v58  ;;  %vm1490_vm12 = vcmp.lt.s32.totalorder %v3305_v0, 800  ;;  %v3751_v34 = vsel %vm1724_vm4, %v1897_v22, 0.0  ;;  %v3773_v58 = vld [vmem:[%s4395_s2] ss:$0 sm:$0xff] }
 0x171   : > { %v1960_v27 = vadd.f32 %v1959_v29, %v1958_v37  ;;  %v3754_v6 = vsel %vm867_vm10, %v741_v61, %v931_v60  ;;  %v746_v16 = vadd.f32 %v3294_v52, %v3573_v43  ;;  %v972_v63 = vsel %vm844_vm11, %v650_v59, %v908_v14  ;;  %v657_v14 = vpop.f32.mrb[44].mxu0 }
 0x172   : > { %vm845_vm13 = vcmp.ge.f32.partialorder %v653_v50, 0.0  ;;  %v909_v36 = vmul.f32 0.01, %v653_v50  ;;  %vm1491_vm14 = vcmp.lt.s32.totalorder %v3308_v1, 800  ;;  %vm1510_vm15 = vcmp.lt.s32.totalorder %v3326_v20, 800 }
 0x173   : > { %v2736_v32 = vpack.c.bf16 %v3754_v6, %v3754_v6  ;;  %v2713_v22 = vpack.c.bf16 %v972_v63, %v972_v63  ;;  %v1680_v18 = vsel %vm1488_vm6, %v972_v63, 0.0  ;;  %v3765_v61 = vsel %vm1724_vm4, %v1700_v35, 0.0 }
 0x174   : > { %v1898_v37 = vmul.f32 %v1700_v35, %v1700_v35  ;;  %v1764_v52 = vsel %vm1724_vm4, %v1680_v18, 0.0  ;;  %v1878_v43 = vmul.f32 %v1680_v18, %v1680_v18  ;;  %v973_v59 = vsel %vm845_vm13, %v653_v50, %v909_v36  ;;  %v3781_v50 = vpop.f32.mrb[44].mxu1 }
 0x175   : > { %1316 = vst.msk [vmem:[%s3362_s11 + $0xac] sm:$0xf] %vm1272_vm2, %v2736_v32  ;;  %v749_v42 = vadd.f32 %v3773_v58, %v3585_v57  ;;  %1293 = vst.msk [vmem:[%s3362_s11 + $0x50] sm:$0xf] %vm1272_vm2, %v2713_v22  ;;  %v1765_v60 = vadd.f32 %v1764_v52, %v1763_v28  ;;  %v2714_v29 = vpack.c.bf16 %v973_v59, %v973_v59  ;;  %v1681_v35 = vsel %vm1489_vm8, %v973_v59, 0.0  ;;  %v659_v32 = vpop.f32.mrb[45].mxu0 }
 0x176   : > { %vm868_vm0 = vcmp.ge.f32.partialorder %v746_v16, 0.0  ;;  %v1961_v39 = vsel %vm1724_vm4, %v1878_v43, 0.0  ;;  %v1766_v38 = vsel %vm1724_vm4, %v1681_v35, 0.0  ;;  %v1879_v63 = vmul.f32 %v1681_v35, %v1681_v35  ;;  %v787_v57 = vpop.f32.mrb[45].mxu1  ;;  %v660_v22 = vpop.f32.mrb[46].mxu0 }
 0x177   : > { %v658_v36 = vadd.f32 %v3773_v58, %v657_v14  ;;  %v1962_v18 = vadd.f32 %v1961_v39, %v1960_v27  ;;  %1294 = vst.msk [vmem:[%s3362_s11 + $0x54] sm:$0xf] %vm1272_vm2, %v2714_v29  ;;  %v1767_v28 = vadd.f32 %v1766_v38, %v1765_v60  ;;  %v1701_v48 = vsel %vm1509_vm9, %v3681_v19, 0.0  ;;  %v3791_v59 = vpop.f32.mrb[46].mxu1  ;;  %v662_v32 = vpop.f32.mrb[47].mxu0 }
 0x178   : > { %v932_v52 = vmul.f32 0.01, %v746_v16  ;;  %v1963_v43 = vsel %vm1724_vm4, %v1879_v63, 0.0  ;;  %v661_v14 = vadd.f32 %v3773_v58, %v660_v22  ;;  %vm1492_vm3 = vcmp.lt.s32.totalorder %v3317_v11, 800  ;;  %v790_v27 = vpop.f32.mrb[47].mxu1 }
 0x179   : > { %vm846_vm1 = vcmp.ge.f32.partialorder %v658_v36, 0.0  ;;  %v910_v35 = vmul.f32 0.01, %v658_v36  ;;  %v1964_v29 = vadd.f32 %v1963_v43, %v1962_v18  ;;  %vm869_vm5 = vcmp.ge.f32.partialorder %v749_v42, 0.0 }
 0x17a   : > { %v3797_v60 = vsel %vm868_vm0, %v746_v16, %v932_v52  ;;  %v933_v9 = vmul.f32 0.01, %v749_v42  ;;  %vm847_vm6 = vcmp.ge.f32.partialorder %v661_v14, 0.0  ;;  %v911_v39 = vmul.f32 0.01, %v661_v14 }
 0x17b   : > { %v974_v19 = vsel %vm846_vm1, %v658_v36, %v910_v35  ;;  %vm1493_vm7 = vcmp.lt.s32.totalorder %v3320_v12, 800  ;;  %vm1511_vm8 = vcmp.lt.s32.totalorder %v3329_v21, 800  ;;  %v2737_v38 = vpack.c.bf16 %v3797_v60, %v3797_v60 }
 0x17c   : > { %v2715_v63 = vpack.c.bf16 %v974_v19, %v974_v19  ;;  %v1682_v57 = vsel %vm1490_vm12, %v974_v19, 0.0  ;;  %v3806_v16 = vsel %vm1724_vm4, %v1898_v37, 0.0  ;;  %v1899_v18 = vmul.f32 %v1701_v48, %v1701_v48  ;;  %v665_v37 = vpop.f32.mrb[48].mxu0  ;;  %v3821_v19 = vpop.f32.mrb[48].mxu1 }
 0x17d   : > { %v1768_v22 = vsel %vm1724_vm4, %v1682_v57, 0.0  ;;  %v1880_v36 = vmul.f32 %v1682_v57, %v1682_v57  ;;  %v975_v52 = vsel %vm847_vm6, %v661_v14, %v911_v39  ;;  %1317 = vst.msk [vmem:[%s3362_s11 + $0xb0] sm:$0xf] %vm1272_vm2, %v2737_v38  ;;  %v3812_v43 = vsel %vm869_vm5, %v749_v42, %v933_v9  ;;  %v667_v38 = vpop.f32.mrb[49].mxu0 }
 0x17e   : > { %1295 = vst.msk [vmem:[%s3362_s11 + $0x58] sm:$0xf] %vm1272_vm2, %v2715_v63  ;;  %v1769_v35 = vadd.f32 %v1768_v22, %v1767_v28  ;;  %v2716_v32 = vpack.c.bf16 %v975_v52, %v975_v52  ;;  %v1683_v0 = vsel %vm1491_vm14, %v975_v52, 0.0  ;;  %v1702_v27 = vsel %vm1510_vm15, %v3712_v62, 0.0  ;;  %v795_v28 = vpop.f32.mrb[49].mxu1  ;;  %v668_v20 = vpop.f32.mrb[50].mxu0 }
 0x17f   : > { %v1965_v14 = vsel %vm1724_vm4, %v1880_v36, 0.0  ;;  %v1770_v39 = vsel %vm1724_vm4, %v1683_v0, 0.0  ;;  %v1881_v42 = vmul.f32 %v1683_v0, %v1683_v0  ;;  %v666_v9 = vadd.f32 %v3773_v58, %v665_v37  ;;  %v3833_v22 = vpop.f32.mrb[50].mxu1  ;;  %v4417_v37 = vld [vmem:[#allocation4_spill] sm:$0xff] }
 0x180   : > { %v1966_v63 = vadd.f32 %v1965_v14, %v1964_v29  ;;  %1296 = vst.msk [vmem:[%s3362_s11 + $0x5c] sm:$0xf] %vm1272_vm2, %v2716_v32  ;;  %v1771_v1 = vadd.f32 %v1770_v39, %v1769_v35  ;;  %v3829_v57 = vsel %vm1724_vm4, %v1701_v48, 0.0  ;;  %v2738_v62 = vpack.c.bf16 %v3812_v43, %v3812_v43  ;;  %4416 = vst [vmem:[#allocation11_spill] sm:$0xff] %v3833_v22  ;;  %v670_v29 = vpop.f32.mrb[51].mxu0  ;;  %v798_v32 = vpop.f32.mrb[51].mxu1 }
 0x181   : > { %v1967_v36 = vsel %vm1724_vm4, %v1881_v42, 0.0  ;;  %vm848_vm9 = vcmp.ge.f32.partialorder %v666_v9, 0.0  ;;  %v912_v52 = vmul.f32 0.01, %v666_v9  ;;  %v669_v0 = vadd.f32 %v3773_v58, %v668_v20  ;;  %v4419_v20 = vld [vmem:[#allocation5_spill] sm:$0xff]  ;;  %v4420_v29 = vld [vmem:[#allocation6_spill] sm:$0xff] }
 0x182   : > { %vm1494_vm10 = vcmp.lt.s32.totalorder %v4417_v37, 800  ;;  %v1968_v35 = vadd.f32 %v1967_v36, %v1966_v63  ;;  %v3839_v48 = vsel %vm1724_vm4, %v1899_v18, 0.0  ;;  %v3842_v14 = vsel %vm1724_vm4, %v1702_v27, 0.0  ;;  %1318 = vst.msk [vmem:[%s3362_s11 + $0xb4] sm:$0xf] %vm1272_vm2, %v2738_v62 }
 0x183   : > { %4418 = vst [vmem:[#allocation4_spill] sm:$0xff] %v3839_v48  ;;  %v754_v39 = vadd.f32 %v3773_v58, %v3611_v10  ;;  %v976_v42 = vsel %vm848_vm9, %v666_v9, %v912_v52  ;;  %vm849_vm11 = vcmp.ge.f32.partialorder %v669_v0, 0.0  ;;  %v913_v38 = vmul.f32 0.01, %v669_v0  ;;  %v3862_v48 = vpop.f32.mrb[52].mxu1 }
 0x184   : > { %v1900_v28 = vmul.f32 %v1702_v27, %v1702_v27  ;;  %vm1495_vm12 = vcmp.lt.s32.totalorder %v4419_v20, 800  ;;  %vm1512_vm13 = vcmp.lt.s32.totalorder %v4420_v29, 800  ;;  %v2717_v63 = vpack.c.bf16 %v976_v42, %v976_v42  ;;  %4421 = vst [vmem:[#allocation5_spill] sm:$0xff] %v3862_v48 }
 0x185   : > { %v1684_v18 = vsel %vm1492_vm3, %v976_v42, 0.0  ;;  %vm870_vm14 = vcmp.ge.f32.partialorder %v754_v39, 0.0  ;;  %v757_v62 = vadd.f32 %v3773_v58, %v3627_v53  ;;  %v977_v10 = vsel %vm849_vm11, %v669_v0, %v913_v38  ;;  %v673_v42 = vpop.f32.mrb[52].mxu0 }
 0x186   : > { %v1772_v36 = vsel %vm1724_vm4, %v1684_v18, 0.0  ;;  %v1882_v32 = vmul.f32 %v1684_v18, %v1684_v18  ;;  %v934_v9 = vmul.f32 0.01, %v754_v39  ;;  %1297 = vst.msk [vmem:[%s3362_s11 + $0x60] sm:$0xf] %vm1272_vm2, %v2717_v63  ;;  %v2718_v52 = vpack.c.bf16 %v977_v10, %v977_v10  ;;  %v675_v63 = vpop.f32.mrb[53].mxu0 }
 0x187   : > { %v1773_v27 = vadd.f32 %v1772_v36, %v1771_v1  ;;  %v1685_v22 = vsel %vm1493_vm7, %v977_v10, 0.0  ;;  %v1703_v11 = vsel %vm1511_vm8, %v3754_v6, 0.0  ;;  %v674_v18 = vadd.f32 %v3773_v58, %v673_v42  ;;  %v803_v1 = vpop.f32.mrb[53].mxu1  ;;  %v676_v10 = vpop.f32.mrb[54].mxu0  ;;  %v4423_v63 = vld [vmem:[#allocation7_spill] sm:$0xff] }
 0x188   : > { %v1969_v53 = vsel %vm1724_vm4, %v1882_v32, 0.0  ;;  %v1774_v0 = vsel %vm1724_vm4, %v1685_v22, 0.0  ;;  %v1883_v38 = vmul.f32 %v1685_v22, %v1685_v22  ;;  %1298 = vst.msk [vmem:[%s3362_s11 + $0x64] sm:$0xf] %vm1272_vm2, %v2718_v52  ;;  %v3870_v21 = vsel %vm870_vm14, %v754_v39, %v934_v9  ;;  %v3872_v6 = vpop.f32.mrb[54].mxu1  ;;  %v678_v42 = vpop.f32.mrb[55].mxu0 }
 0x189   : > { %v1970_v36 = vadd.f32 %v1969_v53, %v1968_v35  ;;  %v1775_v12 = vadd.f32 %v1774_v0, %v1773_v27  ;;  %vm871_vm15 = vcmp.ge.f32.partialorder %v757_v62, 0.0  ;;  %4422 = vst [vmem:[#allocation6_spill] sm:$0xff] %v3872_v6  ;;  %vm850_vm0 = vcmp.ge.f32.partialorder %v674_v18, 0.0  ;;  %v4424_v35 = vld [vmem:[#allocation8_spill] sm:$0xff]  ;;  %v806_v27 = vpop.f32.mrb[55].mxu1 }
 0x18a   : > { %v1971_v32 = vsel %vm1724_vm4, %v1883_v38, 0.0  ;;  %v914_v48 = vmul.f32 0.01, %v674_v18  ;;  %v677_v22 = vadd.f32 %v3773_v58, %v676_v10  ;;  %vm1513_vm1 = vcmp.lt.s32.totalorder %v4423_v63, 800 }
 0x18b   : > { %vm1496_vm3 = vcmp.lt.s32.totalorder %v4424_v35, 800  ;;  %v1972_v52 = vadd.f32 %v1971_v32, %v1970_v36  ;;  %v3879_v39 = vsel %vm1724_vm4, %v1900_v28, 0.0  ;;  %v2739_v9 = vpack.c.bf16 %v3870_v21, %v3870_v21 }
 0x18c   : > { %v935_v53 = vmul.f32 0.01, %v757_v62  ;;  %v3884_v0 = vsel %vm1724_vm4, %v1703_v11, 0.0  ;;  %v978_v38 = vsel %vm850_vm0, %v674_v18, %v914_v48  ;;  %vm851_vm5 = vcmp.ge.f32.partialorder %v677_v22, 0.0 }
 0x18d   : > { %v915_v1 = vmul.f32 0.01, %v677_v22  ;;  %vm1497_vm6 = vcmp.lt.s32.totalorder %v3387_v51, 800  ;;  %v1901_v10 = vmul.f32 %v1703_v11, %v1703_v11  ;;  %v2719_v42 = vpack.c.bf16 %v978_v38, %v978_v38  ;;  %1319 = vst.msk [vmem:[%s3362_s11 + $0xb8] sm:$0xf] %vm1272_vm2, %v2739_v9  ;;  %v681_v9 = vpop.f32.mrb[56].mxu0 }
 0x18e   : > { %v1686_v36 = vsel %vm1494_vm10, %v978_v38, 0.0  ;;  %v3892_v28 = vsel %vm871_vm15, %v757_v62, %v935_v53  ;;  %v1704_v62 = vsel %vm1512_vm13, %v3797_v60, 0.0  ;;  %v3904_v53 = vpop.f32.mrb[56].mxu1  ;;  %vm1514_vm7 = vcmp.lt.s32.totalorder %v3390_v41, 800 }
 0x18f   : > { %v1776_v32 = vsel %vm1724_vm4, %v1686_v36, 0.0  ;;  %v1884_v27 = vmul.f32 %v1686_v36, %v1686_v36  ;;  %v979_v6 = vsel %vm851_vm5, %v677_v22, %v915_v1  ;;  %v2740_v48 = vpack.c.bf16 %v3892_v28, %v3892_v28  ;;  %1299 = vst.msk [vmem:[%s3362_s11 + $0x68] sm:$0xf] %vm1272_vm2, %v2719_v42  ;;  %v683_v36 = vpop.f32.mrb[57].mxu0 }
 0x190   : > { %v1777_v11 = vadd.f32 %v1776_v32, %v1775_v12  ;;  %v2720_v18 = vpack.c.bf16 %v979_v6, %v979_v6  ;;  %v1687_v37 = vsel %vm1495_vm12, %v979_v6, 0.0  ;;  %v682_v42 = vadd.f32 %v3773_v58, %v681_v9  ;;  %v811_v12 = vpop.f32.mrb[57].mxu1  ;;  %v684_v29 = vpop.f32.mrb[58].mxu0  ;;  %v4426_v36 = vld [vmem:[#allocation10_spill] sm:$0xff] }
 0x191   : > { %v1973_v22 = vsel %vm1724_vm4, %v1884_v27, 0.0  ;;  %v1778_v38 = vsel %vm1724_vm4, %v1687_v37, 0.0  ;;  %v1885_v1 = vmul.f32 %v1687_v37, %v1687_v37  ;;  %1320 = vst.msk [vmem:[%s3362_s11 + $0xbc] sm:$0xf] %vm1272_vm2, %v2740_v48  ;;  %v3912_v20 = vsel %vm1724_vm4, %v1901_v10, 0.0  ;;  %v3919_v27 = vpop.f32.mrb[58].mxu1 }
 0x192   : > { %v1974_v6 = vadd.f32 %v1973_v22, %v1972_v52  ;;  %1300 = vst.msk [vmem:[%s3362_s11 + $0x6c] sm:$0xf] %vm1272_vm2, %v2720_v18  ;;  %v1779_v60 = vadd.f32 %v1778_v38, %v1777_v11  ;;  %v762_v32 = vadd.f32 %v3773_v58, %v3653_v3  ;;  %4425 = vst [vmem:[#allocation7_spill] sm:$0xff] %v3919_v27  ;;  %vm852_vm8 = vcmp.ge.f32.partialorder %v682_v42, 0.0  ;;  %v686_v10 = vpop.f32.mrb[59].mxu0  ;;  %v814_v52 = vpop.f32.mrb[59].mxu1 }
 0x193   : > { %v1975_v37 = vsel %vm1724_vm4, %v1885_v1, 0.0  ;;  %v916_v48 = vmul.f32 0.01, %v682_v42  ;;  %v685_v9 = vadd.f32 %v3773_v58, %v684_v29  ;;  %vm1498_vm9 = vcmp.lt.s32.totalorder %v3403_v7, 800 }
 0x194   : > { %v1976_v18 = vadd.f32 %v1975_v37, %v1974_v6  ;;  %v3925_v11 = vsel %vm1724_vm4, %v1704_v62, 0.0  ;;  %v1902_v22 = vmul.f32 %v1704_v62, %v1704_v62  ;;  %vm872_vm10 = vcmp.ge.f32.partialorder %v762_v32, 0.0  ;;  %v4427_v37 = vld [vmem:[#allocation9_spill] sm:$0xff] }
 0x195   : > { %v980_v3 = vsel %vm852_vm8, %v682_v42, %v916_v48  ;;  %vm853_vm11 = vcmp.ge.f32.partialorder %v685_v9, 0.0  ;;  %v917_v38 = vmul.f32 0.01, %v685_v9  ;;  %vm1499_vm12 = vcmp.lt.s32.totalorder %v4426_v36, 800 }
 0x196   : > { %v936_v1 = vmul.f32 0.01, %v762_v32  ;;  %v1705_v12 = vsel %vm1513_vm1, %v3812_v43, 0.0  ;;  %v2721_v29 = vpack.c.bf16 %v980_v3, %v980_v3  ;;  %v1688_v6 = vsel %vm1496_vm3, %v980_v3, 0.0  ;;  %v689_v3 = vpop.f32.mrb[60].mxu0 }
 0x197   : > { %vm1515_vm13 = vcmp.lt.s32.totalorder %v4427_v37, 800  ;;  %v765_v62 = vadd.f32 %v3773_v58, %v3667_v15  ;;  %v1780_v42 = vsel %vm1724_vm4, %v1688_v6, 0.0  ;;  %v1886_v48 = vmul.f32 %v1688_v6, %v1688_v6  ;;  %v3945_v15 = vpop.f32.mrb[60].mxu1 }
 0x198   : > { %v981_v10 = vsel %vm853_vm11, %v685_v9, %v917_v38  ;;  %v3937_v52 = vsel %vm872_vm10, %v762_v32, %v936_v1  ;;  %1301 = vst.msk [vmem:[%s3362_s11 + $0x70] sm:$0xf] %vm1272_vm2, %v2721_v29  ;;  %v1781_v63 = vadd.f32 %v1780_v42, %v1779_v60  ;;  %v690_v38 = vadd.f32 %v3773_v58, %v689_v3  ;;  %v691_v1 = vpop.f32.mrb[61].mxu0  ;;  %v819_v60 = vpop.f32.mrb[61].mxu1 }
 0x199   : > { %v2722_v43 = vpack.c.bf16 %v981_v10, %v981_v10  ;;  %v1689_v35 = vsel %vm1497_vm6, %v981_v10, 0.0  ;;  %v2741_v27 = vpack.c.bf16 %v3937_v52, %v3937_v52  ;;  %v1977_v6 = vsel %vm1724_vm4, %v1886_v48, 0.0  ;;  %v692_v10 = vpop.f32.mrb[62].mxu0  ;;  %v3958_v48 = vpop.f32.mrb[62].mxu1 }
 0x19a   : > { %v1782_v32 = vsel %vm1724_vm4, %v1689_v35, 0.0  ;;  %v1887_v9 = vmul.f32 %v1689_v35, %v1689_v35  ;;  %v3951_v29 = vsel %vm1724_vm4, %v1902_v22, 0.0  ;;  %v1978_v51 = vadd.f32 %v1977_v6, %v1976_v18  ;;  %4428 = vst [vmem:[#allocation8_spill] sm:$0xff] %v3958_v48  ;;  %v694_v22 = vpop.f32.mrb[63].mxu0  ;;  %v822_v60 = vpop.f32.mrb[63].mxu1 }
 0x19b   : > { %1302 = vst.msk [vmem:[%s3362_s11 + $0x74] sm:$0xf] %vm1272_vm2, %v2722_v43  ;;  %v1783_v42 = vadd.f32 %v1782_v32, %v1781_v63  ;;  %1321 = vst.msk [vmem:[%s3362_s11 + $0xc0] sm:$0xf] %vm1272_vm2, %v2741_v27  ;;  %vm1516_vm14 = vcmp.lt.s32.totalorder %v3461_v17, 800  ;;  %vm873_vm15 = vcmp.ge.f32.partialorder %v765_v62, 0.0  ;;  %v693_v1 = vadd.f32 %v3773_v58, %v692_v10 }
 0x19c   : > { %v1979_v35 = vsel %vm1724_vm4, %v1887_v9, 0.0  ;;  %vm854_vm0 = vcmp.ge.f32.partialorder %v690_v38, 0.0  ;;  %v918_v3 = vmul.f32 0.01, %v690_v38  ;;  %v3963_v18 = vsel %vm1724_vm4, %v1705_v12, 0.0 }
 0x19d   : > { %v1903_v63 = vmul.f32 %v1705_v12, %v1705_v12  ;;  %v1980_v43 = vadd.f32 %v1979_v35, %v1978_v51  ;;  %v937_v27 = vmul.f32 0.01, %v765_v62  ;;  %v1706_v6 = vsel %vm1514_vm7, %v3870_v21, 0.0 }
 0x19e   : > { %v982_v32 = vsel %vm854_vm0, %v690_v38, %v918_v3  ;;  %vm855_vm1 = vcmp.ge.f32.partialorder %v693_v1, 0.0  ;;  %v919_v9 = vmul.f32 0.01, %v693_v1  ;;  %v770_v12 = vadd.f32 %v3773_v58, %v3691_v8 }
 0x19f   : > { %v2723_v48 = vpack.c.bf16 %v982_v32, %v982_v32  ;;  %v1690_v10 = vsel %vm1498_vm9, %v982_v32, 0.0  ;;  %v1001_v22 = vsel %vm873_vm15, %v765_v62, %v937_v27  ;;  %vm1517_vm3 = vcmp.lt.s32.totalorder %v3474_v55, 800 }
 0x1a0   : > { %v1784_v51 = vsel %vm1724_vm4, %v1690_v10, 0.0  ;;  %v1888_v35 = vmul.f32 %v1690_v10, %v1690_v10  ;;  %v983_v60 = vsel %vm855_vm1, %v693_v1, %v919_v9  ;;  %v2742_v41 = vpack.c.bf16 %v1001_v22, %v1001_v22 }
 0x1a1   : > { %v3976_v21 = vsel %vm1724_vm4, %v1903_v63, 0.0  ;;  %1303 = vst.msk [vmem:[%s3362_s11 + $0x78] sm:$0xf] %vm1272_vm2, %v2723_v48  ;;  %v1785_v7 = vadd.f32 %v1784_v51, %v1783_v42  ;;  %v2724_v38 = vpack.c.bf16 %v983_v60, %v983_v60  ;;  %v1691_v62 = vsel %vm1499_vm12, %v983_v60, 0.0 }
 0x1a2   : > { %v1707_v8 = vsel %vm1515_vm13, %v3892_v28, 0.0  ;;  %v1981_v3 = vsel %vm1724_vm4, %v1888_v35, 0.0  ;;  %v1786_v1 = vsel %vm1724_vm4, %v1691_v62, 0.0  ;;  %v1889_v27 = vmul.f32 %v1691_v62, %v1691_v62  ;;  %1322 = vst.msk [vmem:[%s3362_s11 + $0xc4] sm:$0xf] %vm1272_vm2, %v2742_v41 }
 0x1a3   : > { %v1904_v63 = vmul.f32 %v1706_v6, %v1706_v6  ;;  %v1982_v32 = vadd.f32 %v1981_v3, %v1980_v43  ;;  %1304 = vst.msk [vmem:[%s3362_s11 + $0x7c] sm:$0xf] %vm1272_vm2, %v2724_v38  ;;  %v1787_v42 = vadd.f32 %v1786_v1, %v1785_v7  ;;  %vm874_vm5 = vcmp.ge.f32.partialorder %v770_v12, 0.0 }
 0x1a4   : > { %v1983_v36 = vsel %vm1724_vm4, %v1889_v27, 0.0  ;;  %v938_v48 = vmul.f32 0.01, %v770_v12  ;;  %v1389_v9 = vadd.s32 400, %v3159_v46  ;;  %v773_v28 = vadd.f32 %v3773_v58, %v3703_v56  ;;  %v4429_v56 = vld [vmem:[#allocation3_spill] sm:$0xff] }
 0x1a5   : > { %v1905_v37 = vmul.f32 %v1707_v8, %v1707_v8  ;;  %v1789_v10 = vadd.f32 %v3467_v44, %v1787_v42  ;;  %v1984_v51 = vadd.f32 %v1983_v36, %v1982_v32  ;;  %v1390_v35 = vadd.s32 408, %v3159_v46 }
 0x1a6   : > { %v1708_v43 = vsel %vm1516_vm14, %v3937_v52, 0.0  ;;  %v1002_v60 = vsel %vm874_vm5, %v770_v12, %v938_v48  ;;  %vm875_vm6 = vcmp.ge.f32.partialorder %v773_v28, 0.0  ;;  %v939_v41 = vmul.f32 0.01, %v773_v28 }
 0x1a7   : > { %v1791_v7 = vadd.f32 %v3513_v40, %v1789_v10  ;;  %v1986_v38 = vadd.f32 %v3507_v54, %v1984_v51  ;;  %v2743_v62 = vpack.c.bf16 %v1002_v60, %v1002_v60  ;;  %v1454_v3 = vadd.s32 %v4429_v56, %v1389_v9 }
 0x1a8   : > { %v1003_v1 = vsel %vm875_vm6, %v773_v28, %v939_v41  ;;  %v1455_v44 = vadd.s32 %v4429_v56, %v1390_v35  ;;  %v778_v27 = vadd.f32 %v3773_v58, %v3735_v23  ;;  %v1391_v17 = vadd.s32 416, %v3159_v46 }
 0x1a9   : > { %v4008_v52 = vsel %vm1724_vm4, %v1706_v6, 0.0  ;;  %v1793_v12 = vadd.f32 %v3553_v2, %v1791_v7  ;;  %v1988_v40 = vadd.f32 %v3543_v30, %v1986_v38  ;;  %1323 = vst.msk [vmem:[%s3362_s11 + $0xc8] sm:$0xf] %vm1272_vm2, %v2743_v62  ;;  %v2744_v54 = vpack.c.bf16 %v1003_v1, %v1003_v1 }
 0x1aa   : > { %v4015_v32 = vsel %vm1724_vm4, %v1904_v63, 0.0  ;;  %v4018_v42 = vsel %vm1724_vm4, %v1707_v8, 0.0  ;;  %v1906_v36 = vmul.f32 %v1708_v43, %v1708_v43  ;;  %vm876_vm7 = vcmp.ge.f32.partialorder %v778_v27, 0.0 }
 0x1ab   : > { %v1795_v23 = vadd.f32 %v3594_v47, %v1793_v12  ;;  %v1990_v6 = vadd.f32 %v3591_v33, %v1988_v40  ;;  %v1709_v2 = vsel %vm1517_vm3, %v1001_v22, 0.0  ;;  %1324 = vst.msk [vmem:[%s3362_s11 + $0xcc] sm:$0xf] %vm1272_vm2, %v2744_v54  ;;  %v940_v30 = vmul.f32 0.01, %v778_v27 }
 0x1ac   : > { %v4027_v48 = vsel %vm1724_vm4, %v1905_v37, 0.0  ;;  %vm1518_vm8 = vcmp.lt.s32.totalorder %v1454_v3, 800  ;;  %vm1519_vm9 = vcmp.lt.s32.totalorder %v1455_v44, 800  ;;  %v1456_v8 = vadd.s32 %v4429_v56, %v1391_v17 }
 0x1ad   : > { %v1797_v63 = vadd.f32 %v3633_v4, %v1795_v23  ;;  %v1992_v47 = vadd.f32 %v3621_v45, %v1990_v6  ;;  %v1004_v9 = vsel %vm876_vm7, %v778_v27, %v940_v30  ;;  %v781_v55 = vadd.f32 %v3773_v58, %v3745_v24 }
 0x1ae   : > { %v4035_v33 = vsel %vm1724_vm4, %v1708_v43, 0.0  ;;  %v4038_v22 = vsel %vm1724_vm4, %v1906_v36, 0.0  ;;  %v1907_v28 = vmul.f32 %v1709_v2, %v1709_v2  ;;  %v2745_v37 = vpack.c.bf16 %v1004_v9, %v1004_v9 }
 0x1af   : > { %v1799_v10 = vadd.f32 %v3663_v26, %v1797_v63  ;;  %v1994_v51 = vadd.f32 %v3637_v31, %v1992_v47  ;;  %v1710_v35 = vsel %vm1518_vm8, %v1002_v60, 0.0  ;;  %vm877_vm10 = vcmp.ge.f32.partialorder %v781_v55, 0.0  ;;  %v4430_v47 = vld [vmem:[#allocation4_spill] sm:$0xff] }
 0x1b0   : > { %v4043_v45 = vsel %vm1724_vm4, %v1709_v2, 0.0  ;;  %v1711_v4 = vsel %vm1519_vm9, %v1003_v1, 0.0  ;;  %1325 = vst.msk [vmem:[%s3362_s11 + $0xd0] sm:$0xf] %vm1272_vm2, %v2745_v37  ;;  %vm1520_vm11 = vcmp.lt.s32.totalorder %v1456_v8, 800  ;;  %v1392_v7 = vadd.s32 424, %v3159_v46 }
 0x1b1   : > { %v941_v24 = vmul.f32 0.01, %v781_v55  ;;  %v1801_v43 = vadd.f32 %v3709_v49, %v1799_v10  ;;  %v1996_v41 = vadd.f32 %v3673_v13, %v1994_v51  ;;  %v786_v31 = vadd.f32 %v3773_v58, %v3781_v50 }
 0x1b2   : > { %v4053_v26 = vsel %vm1724_vm4, %v1907_v28, 0.0  ;;  %v1908_v60 = vmul.f32 %v1710_v35, %v1710_v35  ;;  %v789_v62 = vadd.f32 %v3773_v58, %v3791_v59  ;;  %v1909_v1 = vmul.f32 %v1711_v4, %v1711_v4 }
 0x1b3   : > { %v1005_v38 = vsel %vm877_vm10, %v781_v55, %v941_v24  ;;  %v1803_v3 = vadd.f32 %v3725_v5, %v1801_v43  ;;  %v1998_v49 = vadd.f32 %v3722_v25, %v1996_v41  ;;  %v1712_v44 = vsel %vm1520_vm11, %v1004_v9, 0.0 }
 0x1b4   : > { %v2746_v13 = vpack.c.bf16 %v1005_v38, %v1005_v38  ;;  %vm878_vm12 = vcmp.ge.f32.partialorder %v786_v31, 0.0  ;;  %v942_v27 = vmul.f32 0.01, %v786_v31  ;;  %v1393_v17 = vadd.s32 432, %v3159_v46 }
 0x1b5   : > { %v2000_v50 = vadd.f32 %v3751_v34, %v1998_v49  ;;  %v1805_v12 = vadd.f32 %v3765_v61, %v1803_v3  ;;  %v1457_v40 = vadd.s32 %v4429_v56, %v1392_v7  ;;  %vm879_vm13 = vcmp.ge.f32.partialorder %v789_v62, 0.0 }
 0x1b6   : > { %1326 = vst.msk [vmem:[%s3362_s11 + $0xd4] sm:$0xf] %vm1272_vm2, %v2746_v13  ;;  %v4066_v5 = vsel %vm1724_vm4, %v1710_v35, 0.0  ;;  %v4069_v25 = vsel %vm1724_vm4, %v1908_v60, 0.0  ;;  %v1006_v59 = vsel %vm878_vm12, %v786_v31, %v942_v27  ;;  %v943_v54 = vmul.f32 0.01, %v789_v62 }
 0x1b7   : > { %v1807_v36 = vadd.f32 %v3829_v57, %v1805_v12  ;;  %v2002_v34 = vadd.f32 %v3806_v16, %v2000_v50  ;;  %v1910_v23 = vmul.f32 %v1712_v44, %v1712_v44  ;;  %v2747_v61 = vpack.c.bf16 %v1006_v59, %v1006_v59 }
 0x1b8   : > { %v4074_v6 = vsel %vm1724_vm4, %v1711_v4, 0.0  ;;  %v1458_v2 = vadd.s32 %v4429_v56, %v1393_v17  ;;  %v1007_v30 = vsel %vm879_vm13, %v789_v62, %v943_v54  ;;  %v794_v8 = vadd.f32 %v3773_v58, %v3821_v19 }
 0x1b9   : > { %v1809_v63 = vadd.f32 %v3842_v14, %v1807_v36  ;;  %v2004_v9 = vadd.f32 %v4430_v47, %v2002_v34  ;;  %v4082_v57 = vsel %vm1724_vm4, %v1909_v1, 0.0  ;;  %vm1521_vm14 = vcmp.lt.s32.totalorder %v1457_v40, 800  ;;  %1327 = vst.msk [vmem:[%s3362_s11 + $0xd8] sm:$0xf] %vm1272_vm2, %v2747_v61 }
 0x1ba   : > { %v2748_v16 = vpack.c.bf16 %v1007_v30, %v1007_v30  ;;  %v1394_v55 = vadd.s32 440, %v3159_v46  ;;  %vm880_vm15 = vcmp.ge.f32.partialorder %v794_v8, 0.0  ;;  %v944_v28 = vmul.f32 0.01, %v794_v8 }
 0x1bb   : > { %v1811_v37 = vadd.f32 %v3884_v0, %v1809_v63  ;;  %v2006_v19 = vadd.f32 %v3879_v39, %v2004_v9  ;;  %v4090_v10 = vsel %vm1724_vm4, %v1712_v44, 0.0  ;;  %v4093_v14 = vsel %vm1724_vm4, %v1910_v23, 0.0  ;;  %v4431_v39 = vld [vmem:[#allocation11_spill] sm:$0xff] }
 0x1bc   : > { %v1713_v51 = vsel %vm1521_vm14, %v1005_v38, 0.0  ;;  %vm1522_vm0 = vcmp.lt.s32.totalorder %v1458_v2, 800  ;;  %1328 = vst.msk [vmem:[%s3362_s11 + $0xdc] sm:$0xf] %vm1272_vm2, %v2748_v16  ;;  %v1008_v35 = vsel %vm880_vm15, %v794_v8, %v944_v28  ;;  %v1395_v4 = vadd.s32 448, %v3159_v46  ;;  %v4432_v38 = vld [vmem:[#allocation5_spill] sm:$0xff] }
 0x1bd   : > { %v1813_v24 = vadd.f32 %v3925_v11, %v1811_v37  ;;  %v2008_v0 = vadd.f32 %v3912_v20, %v2006_v19  ;;  %v2749_v43 = vpack.c.bf16 %v1008_v35, %v1008_v35  ;;  %v797_v41 = vadd.f32 %v3773_v58, %v4431_v39 }
 0x1be   : > { %v1459_v7 = vadd.s32 %v4429_v56, %v1394_v55  ;;  %v1460_v31 = vadd.s32 %v4429_v56, %v1395_v4  ;;  %v1396_v60 = vadd.s32 456, %v3159_v46  ;;  %v802_v62 = vadd.f32 %v3773_v58, %v4432_v38 }
 0x1bf   : > { %v1815_v3 = vadd.f32 %v3963_v18, %v1813_v24  ;;  %v2010_v49 = vadd.f32 %v3951_v29, %v2008_v0  ;;  %1329 = vst.msk [vmem:[%s3362_s11 + $0xe0] sm:$0xf] %vm1272_vm2, %v2749_v43  ;;  %vm881_vm1 = vcmp.ge.f32.partialorder %v797_v41, 0.0  ;;  %v945_v20 = vmul.f32 0.01, %v797_v41 }
 0x1c0   : > { %v1911_v11 = vmul.f32 %v1713_v51, %v1713_v51  ;;  %v1461_v1 = vadd.s32 %v4429_v56, %v1396_v60  ;;  %vm882_vm3 = vcmp.ge.f32.partialorder %v802_v62, 0.0  ;;  %v946_v13 = vmul.f32 0.01, %v802_v62 }
 0x1c1   : > { %v1817_v44 = vadd.f32 %v4008_v52, %v1815_v3  ;;  %v2012_v27 = vadd.f32 %v3976_v21, %v2010_v49  ;;  %v1714_v17 = vsel %vm1522_vm0, %v1006_v59, 0.0  ;;  %v1009_v50 = vsel %vm881_vm1, %v797_v41, %v945_v20 }
 0x1c2   : > { %v1830_v18 = vsel %vm1724_vm4, %v1713_v51, 0.0  ;;  %vm1523_vm5 = vcmp.lt.s32.totalorder %v1459_v7, 800  ;;  %vm1524_vm6 = vcmp.lt.s32.totalorder %v1460_v31, 800  ;;  %v2750_v29 = vpack.c.bf16 %v1009_v50, %v1009_v50 }
 0x1c3   : > { %v1819_v12 = vadd.f32 %v4018_v42, %v1817_v44  ;;  %v2014_v40 = vadd.f32 %v4015_v32, %v2012_v27  ;;  %vm1525_vm7 = vcmp.lt.s32.totalorder %v1461_v1, 800  ;;  %v1010_v54 = vsel %vm882_vm3, %v802_v62, %v946_v13  ;;  %v4433_v42 = vld [vmem:[#allocation6_spill] sm:$0xff] }
 0x1c4   : > { %v2027_v36 = vsel %vm1724_vm4, %v1911_v11, 0.0  ;;  %v1832_v52 = vsel %vm1724_vm4, %v1714_v17, 0.0  ;;  %v1912_v21 = vmul.f32 %v1714_v17, %v1714_v17  ;;  %1330 = vst.msk [vmem:[%s3362_s11 + $0xe4] sm:$0xf] %vm1272_vm2, %v2750_v29  ;;  %v2751_v59 = vpack.c.bf16 %v1010_v54, %v1010_v54  ;;  %v4435_v29 = vld [vmem:[#allocation8_spill] sm:$0xff] }
 0x1c5   : > { %v1821_v34 = vadd.f32 %v4035_v33, %v1819_v12  ;;  %v2016_v23 = vadd.f32 %v4027_v48, %v2014_v40  ;;  %v1397_v61 = vadd.s32 464, %v3159_v46  ;;  %v805_v2 = vadd.f32 %v3773_v58, %v4433_v42 }
 0x1c6   : > { %v1715_v32 = vsel %vm1523_vm5, %v1007_v30, 0.0  ;;  %v1716_v8 = vsel %vm1524_vm6, %v1008_v35, 0.0  ;;  %v1717_v63 = vsel %vm1525_vm7, %v1009_v50, 0.0  ;;  %1331 = vst.msk [vmem:[%s3362_s11 + $0xe8] sm:$0xf] %vm1272_vm2, %v2751_v59  ;;  %v810_v47 = vadd.f32 %v3773_v58, %v3904_v53 }
 0x1c7   : > { %v2018_v9 = vadd.f32 %v4038_v22, %v2016_v23  ;;  %v1823_v33 = vadd.f32 %v4043_v45, %v1821_v34  ;;  %v1462_v48 = vadd.s32 %v4429_v56, %v1397_v61  ;;  %vm883_vm8 = vcmp.ge.f32.partialorder %v805_v2, 0.0 }
 0x1c8   : > { %v947_v16 = vmul.f32 0.01, %v805_v2  ;;  %v1398_v55 = vadd.s32 472, %v3159_v46  ;;  %vm884_vm9 = vcmp.ge.f32.partialorder %v810_v47, 0.0  ;;  %v948_v30 = vmul.f32 0.01, %v810_v47 }
 0x1c9   : > { %v2020_v28 = vadd.f32 %v4053_v26, %v2018_v9  ;;  %v1825_v37 = vadd.f32 %v4066_v5, %v1823_v33  ;;  %v2029_v19 = vsel %vm1724_vm4, %v1912_v21, 0.0  ;;  %v1913_v51 = vmul.f32 %v1715_v32, %v1715_v32 }
 0x1ca   : > { %v1834_v53 = vsel %vm1724_vm4, %v1715_v32, 0.0  ;;  %v1914_v22 = vmul.f32 %v1716_v8, %v1716_v8  ;;  %v1011_v35 = vsel %vm883_vm8, %v805_v2, %v947_v16  ;;  %v1012_v45 = vsel %vm884_vm9, %v810_v47, %v948_v30 }
 0x1cb   : > { %v2022_v4 = vadd.f32 %v4069_v25, %v2020_v28  ;;  %v1827_v24 = vadd.f32 %v4074_v6, %v1825_v37  ;;  %v1915_v0 = vmul.f32 %v1717_v63, %v1717_v63  ;;  %vm1526_vm10 = vcmp.lt.s32.totalorder %v1462_v48, 800  ;;  %v4434_v6 = vld [vmem:[#allocation7_spill] sm:$0xff] }
 0x1cc   : > { %v2752_v43 = vpack.c.bf16 %v1011_v35, %v1011_v35  ;;  %v1463_v26 = vadd.s32 %v4429_v56, %v1398_v55  ;;  %v2753_v5 = vpack.c.bf16 %v1012_v45, %v1012_v45  ;;  %v1399_v39 = vadd.s32 480, %v3159_v46 }
 0x1cd   : > { %v2024_v41 = vadd.f32 %v4082_v57, %v2022_v4  ;;  %v1829_v7 = vadd.f32 %v4090_v10, %v1827_v24  ;;  %v2031_v31 = vsel %vm1724_vm4, %v1913_v51, 0.0  ;;  %v1836_v60 = vsel %vm1724_vm4, %v1716_v8, 0.0 }
 0x1ce   : > { %v2033_v25 = vsel %vm1724_vm4, %v1914_v22, 0.0  ;;  %v1718_v38 = vsel %vm1526_vm10, %v1010_v54, 0.0  ;;  %1332 = vst.msk [vmem:[%s3362_s11 + $0xec] sm:$0xf] %vm1272_vm2, %v2752_v43  ;;  %1333 = vst.msk [vmem:[%s3362_s11 + $0xf0] sm:$0xf] %vm1272_vm2, %v2753_v5  ;;  %v813_v62 = vadd.f32 %v3773_v58, %v4434_v6  ;;  %v1464_v11 = vadd.s32 %v4429_v56, %v1399_v39 }
 0x1cf   : > { %v1400_v3 = vadd.s32 488, %v3159_v46  ;;  %v2026_v57 = vadd.f32 %v4093_v14, %v2024_v41  ;;  %v1831_v49 = vadd.f32 %v1830_v18, %v1829_v7  ;;  %v1838_v10 = vsel %vm1724_vm4, %v1717_v63, 0.0 }
 0x1d0   : > { %v2035_v20 = vsel %vm1724_vm4, %v1915_v0, 0.0  ;;  %vm1527_vm11 = vcmp.lt.s32.totalorder %v1463_v26, 800  ;;  %vm885_vm12 = vcmp.ge.f32.partialorder %v813_v62, 0.0  ;;  %v949_v1 = vmul.f32 0.01, %v813_v62 }
 0x1d1   : > { %v2028_v13 = vadd.f32 %v2027_v36, %v2026_v57  ;;  %v1833_v44 = vadd.f32 %v1832_v52, %v1831_v49  ;;  %v1840_v27 = vsel %vm1724_vm4, %v1718_v38, 0.0  ;;  %v818_v17 = vadd.f32 %v3773_v58, %v3945_v15 }
 0x1d2   : > { %v1013_v50 = vsel %vm885_vm12, %v813_v62, %v949_v1  ;;  %v1465_v14 = vadd.s32 %v4429_v56, %v1400_v3  ;;  %v1401_v18 = vadd.s32 496, %v3159_v46  ;;  %v821_v12 = vadd.f32 %v3773_v58, %v4435_v29 }
 0x1d3   : > { %v2030_v40 = vadd.f32 %v2029_v19, %v2028_v13  ;;  %v1835_v54 = vadd.f32 %v1834_v53, %v1833_v44  ;;  %v1916_v21 = vmul.f32 %v1718_v38, %v1718_v38  ;;  %v2754_v59 = vpack.c.bf16 %v1013_v50, %v1013_v50 }
 0x1d4   : > { %v1719_v36 = vsel %vm1527_vm11, %v1011_v35, 0.0  ;;  %vm1528_vm13 = vcmp.lt.s32.totalorder %v1464_v11, 800  ;;  %vm886_vm14 = vcmp.ge.f32.partialorder %v818_v17, 0.0  ;;  %v950_v52 = vmul.f32 0.01, %v818_v17 }
 0x1d5   : > { %v2032_v34 = vadd.f32 %v2031_v31, %v2030_v40  ;;  %v1837_v23 = vadd.f32 %v1836_v60, %v1835_v54  ;;  %1334 = vst.msk [vmem:[%s3362_s11 + $0xf4] sm:$0xf] %vm1272_vm2, %v2754_v59  ;;  %v1466_v15 = vadd.s32 %v4429_v56, %v1401_v18  ;;  %vm887_vm15 = vcmp.ge.f32.partialorder %v821_v12, 0.0 }
 0x1d6   : > { %vm1529_vm0 = vcmp.lt.s32.totalorder %v1465_v14, 800  ;;  %v1014_v61 = vsel %vm886_vm14, %v818_v17, %v950_v52  ;;  %v951_v58 = vmul.f32 0.01, %v821_v12  ;;  %v1402_v42 = vadd.s32 504, %v3159_v46 }
 0x1d7   : > { %v2034_v2 = vadd.f32 %v2033_v25, %v2032_v34  ;;  %v1839_v32 = vadd.f32 %v1838_v10, %v1837_v23  ;;  %v1720_v8 = vsel %vm1528_vm13, %v1012_v45, 0.0  ;;  %v2755_v63 = vpack.c.bf16 %v1014_v61, %v1014_v61 }
 0x1d8   : > { %v1917_v47 = vmul.f32 %v1719_v36, %v1719_v36  ;;  %vm1530_vm1 = vcmp.lt.s32.totalorder %v1466_v15, 800  ;;  %v1015_v9 = vsel %vm887_vm15, %v821_v12, %v951_v58  ;;  %v1467_v33 = vadd.s32 %v4429_v56, %v1402_v42 }
 0x1d9   : > { %v2036_v48 = vadd.f32 %v2035_v20, %v2034_v2  ;;  %v1841_v16 = vadd.f32 %v1840_v27, %v1839_v32  ;;  %v2037_v55 = vsel %vm1724_vm4, %v1916_v21, 0.0  ;;  %v1721_v30 = vsel %vm1529_vm0, %v1013_v50, 0.0  ;;  %1335 = vst.msk [vmem:[%s3362_s11 + $0xf8] sm:$0xf] %vm1272_vm2, %v2755_v63 }
 0x1da   : > { %v1842_v28 = vsel %vm1724_vm4, %v1719_v36, 0.0  ;;  %v1918_v46 = vmul.f32 %v1720_v8, %v1720_v8  ;;  %v2756_v37 = vpack.c.bf16 %v1015_v9, %v1015_v9  ;;  %vm1531_vm3 = vcmp.lt.s32.totalorder %v1467_v33, 800 }
 0x1db   : > { %v2038_v19 = vadd.f32 %v2037_v55, %v2036_v48  ;;  %v1843_v51 = vadd.f32 %v1842_v28, %v1841_v16  ;;  %v1722_v53 = vsel %vm1530_vm1, %v1014_v61, 0.0  ;;  %v2039_v22 = vsel %vm1724_vm4, %v1917_v47, 0.0 }
 0x1dc   : > { %v1844_v56 = vsel %vm1724_vm4, %v1720_v8, 0.0  ;;  %v1919_v35 = vmul.f32 %v1721_v30, %v1721_v30  ;;  %1336 = vst.msk [vmem:[%s3362_s11 + $0xfc] sm:$0xf] %vm1272_vm2, %v2756_v37  ;;  %v1723_v24 = vsel %vm1531_vm3, %v1015_v9, 0.0  ;;  %v2041_v0 = vsel %vm1724_vm4, %v1918_v46, 0.0 }
 0x1dd   : > { %v2040_v45 = vadd.f32 %v2039_v22, %v2038_v19  ;;  %v1845_v4 = vadd.f32 %v1844_v56, %v1843_v51  ;;  %v1846_v43 = vsel %vm1724_vm4, %v1721_v30, 0.0  ;;  %v1920_v26 = vmul.f32 %v1722_v53, %v1722_v53 }
 0x1de   : > { %v2043_v41 = vsel %vm1724_vm4, %v1919_v35, 0.0  ;;  %v1848_v7 = vsel %vm1724_vm4, %v1722_v53, 0.0  ;;  %v1921_v31 = vmul.f32 %v1723_v24, %v1723_v24  ;;  %v1850_v6 = vsel %vm1724_vm4, %v1723_v24, 0.0 }
 0x1df   : > { %v2042_v5 = vadd.f32 %v2041_v0, %v2040_v45  ;;  %v1847_v39 = vadd.f32 %v1846_v43, %v1845_v4  ;;  %v2045_v38 = vsel %vm1724_vm4, %v1920_v26, 0.0  ;;  %vm2055_vm2 = vcmask 1040384  }
 0x1e0   : > { %v2047_v57 = vsel %vm1724_vm4, %v1921_v31, 0.0  ;;  %vm2057_vm4 = vcmask 254976  }
 0x1e1   : > { %v2044_v60 = vadd.f32 %v2043_v41, %v2042_v5  ;;  %v1849_v25 = vadd.f32 %v1848_v7, %v1847_v39 }
 0x1e3   : > { %v2046_v62 = vadd.f32 %v2045_v38, %v2044_v60  ;;  %v1851_v3 = vadd.f32 %v1850_v6, %v1849_v25 }
 0x1e5   : > { %v1852_v49 = vrot.slane %v1851_v3, 4  ;;  %v2048_v10 = vadd.f32 %v2047_v57, %v2046_v62 }
 0x1e7   : > { %v1853_v20 = vadd.f32 %v1852_v49, %v1851_v3  ;;  %v2049_v11 = vrot.slane %v2048_v10, 4 }
 0x1e9   : > { %v1854_v1 = vrot.slane %v1853_v20, 2  ;;  %v2050_v13 = vadd.f32 %v2049_v11, %v2048_v10 }
 0x1eb   : > { %v1855_v44 = vadd.f32 %v1854_v1, %v1853_v20  ;;  %v2051_v27 = vrot.slane %v2050_v13, 2 }
 0x1ed   : > { %v1856_v17 = vrot.slane %v1855_v44, 1  ;;  %v2052_v50 = vadd.f32 %v2051_v27, %v2050_v13 }
 0x1ee   : > { %2069 = sbr.rel (!%p3025_p4) target bundleno = 592 (0x250), region = 36 }
 0x1ef   : > { %v2053_v14 = vrot.slane %v2052_v50, 1  ;;  %v1857_v18 = vadd.f32 %v1856_v17, %v1855_v44 }
 0x1f1   : > { %v2054_v29 = vadd.f32 %v2053_v14, %v2052_v50 }
 0x1f3   : > { %v2056_v12 = vsel %vm2055_vm2, %v1857_v18, %v2054_v29 }
 0x1f4   : > { %2058 = vst.msk [vmem:[%s237_s24] sm:$0x3] %vm2057_vm4, %v2056_v12 }
 0x1f5   : > { %s4445_s27 = smov (!%p2072_p9, %s2071_s27), 64 }
 0x1f6   : > { %s2677_s5 = sshll.u32 %s4445_s27, 6 }
 0x1f7   : > { %p2680_p10 = scmp.eq.s32.totalorder %s2677_s5, 0 }
 0x1f8   : > { %s4207_s23 = sshrl.u32 (!%p2680_p10), %s4445_s27, 6 }
 0x1f9   : > { %2080 = sbr.rel (%p2680_p10) target bundleno = 592 (0x250), region = 40  ;;  %p2681_p11 = scmp.le.s32.totalorder (!%p2680_p10), %s4207_s23, 0 }
 0x200   : > { %2503 = sbr.rel (%p2681_p11) target bundleno = 571 (0x23b), region = 124  ;;  %s4436_s18 = smov (!%p2681_p11), %s4201_s30 }
 0x201   : > { %s4437_s6 = smov (!%p2681_p11), %s3362_s11  ;;  %s4216_s7 = smov (!%p2681_p11), 0  }
 0x202   : > { %s4218_s8 = smov (!%p2681_p11), 0  }
 0x207 LB: >> { %v2096_v40 = vld [vmem:[%s2948_s6] sm:$0xf]  ;;  %v2098_v54 = vld [vmem:[%s2948_s6 + $0x4] sm:$0xf]  ;;  %v2100_v21 = vld [vmem:[%s2948_s6 + $0x8] sm:$0xf]  ;;  %s2956_s8 = sphi %s4218_s8, %s2090_s8   ;;  %s2952_s7 = sphi %s4216_s7, %s4438_s7   ;;  %s2948_s6 = sphi %s4437_s6, %s2229_s6   ;;  %s2944_s18 = sphi %s4436_s18, %s2230_s18  }
 0x208   : >> { %2097 = vst [vmem:[%s2944_s18] sm:$0xf] %v2096_v40  ;;  %2099 = vst [vmem:[%s2944_s18 + $0x4] sm:$0xf] %v2098_v54  ;;  %v2102_v59 = vld [vmem:[%s2948_s6 + $0xc] sm:$0xf]  ;;  %s2224_s9 = sadd.s32 1, %s2952_s7 }
 0x209   : >> { %2101 = vst [vmem:[%s2944_s18 + $0x8] sm:$0xf] %v2100_v21  ;;  %v2104_v36 = vld [vmem:[%s2948_s6 + $0x10] sm:$0xf]  ;;  %v2106_v52 = vld [vmem:[%s2948_s6 + $0x14] sm:$0xf]  ;;  %p2225_p12 = scmp.ge.s32.totalorder %s2224_s9, %s4207_s23 }
 0x20a   : >> { %2103 = vst [vmem:[%s2944_s18 + $0xc] sm:$0xf] %v2102_v59  ;;  %2105 = vst [vmem:[%s2944_s18 + $0x10] sm:$0xf] %v2104_v36  ;;  %v2108_v34 = vld [vmem:[%s2948_s6 + $0x18] sm:$0xf] }
 0x20b   : >> { %2107 = vst [vmem:[%s2944_s18 + $0x14] sm:$0xf] %v2106_v52  ;;  %v2110_v23 = vld [vmem:[%s2948_s6 + $0x1c] sm:$0xf]  ;;  %v2112_v15 = vld [vmem:[%s2948_s6 + $0x20] sm:$0xf] }
 0x20c   : >> { %2109 = vst [vmem:[%s2944_s18 + $0x18] sm:$0xf] %v2108_v34  ;;  %2111 = vst [vmem:[%s2944_s18 + $0x1c] sm:$0xf] %v2110_v23  ;;  %v2114_v61 = vld [vmem:[%s2948_s6 + $0x24] sm:$0xf] }
 0x20d   : >> { %2113 = vst [vmem:[%s2944_s18 + $0x20] sm:$0xf] %v2112_v15  ;;  %v2116_v58 = vld [vmem:[%s2948_s6 + $0x28] sm:$0xf]  ;;  %v2118_v42 = vld [vmem:[%s2948_s6 + $0x2c] sm:$0xf] }
 0x20e   : >> { %2115 = vst [vmem:[%s2944_s18 + $0x24] sm:$0xf] %v2114_v61  ;;  %2117 = vst [vmem:[%s2944_s18 + $0x28] sm:$0xf] %v2116_v58  ;;  %v2120_v2 = vld [vmem:[%s2948_s6 + $0x30] sm:$0xf] }
 0x20f   : >> { %2119 = vst [vmem:[%s2944_s18 + $0x2c] sm:$0xf] %v2118_v42  ;;  %v2122_v32 = vld [vmem:[%s2948_s6 + $0x34] sm:$0xf]  ;;  %v2124_v8 = vld [vmem:[%s2948_s6 + $0x38] sm:$0xf] }
 0x210   : >> { %2121 = vst [vmem:[%s2944_s18 + $0x30] sm:$0xf] %v2120_v2  ;;  %2123 = vst [vmem:[%s2944_s18 + $0x34] sm:$0xf] %v2122_v32  ;;  %v2126_v63 = vld [vmem:[%s2948_s6 + $0x3c] sm:$0xf] }
 0x211   : >> { %2125 = vst [vmem:[%s2944_s18 + $0x38] sm:$0xf] %v2124_v8  ;;  %v2128_v47 = vld [vmem:[%s2948_s6 + $0x40] sm:$0xf]  ;;  %v2130_v9 = vld [vmem:[%s2948_s6 + $0x44] sm:$0xf] }
 0x212   : >> { %2127 = vst [vmem:[%s2944_s18 + $0x3c] sm:$0xf] %v2126_v63  ;;  %2129 = vst [vmem:[%s2944_s18 + $0x40] sm:$0xf] %v2128_v47  ;;  %v2132_v33 = vld [vmem:[%s2948_s6 + $0x48] sm:$0xf] }
 0x213   : >> { %2131 = vst [vmem:[%s2944_s18 + $0x44] sm:$0xf] %v2130_v9  ;;  %v2134_v48 = vld [vmem:[%s2948_s6 + $0x4c] sm:$0xf]  ;;  %v2136_v16 = vld [vmem:[%s2948_s6 + $0x50] sm:$0xf] }
 0x214   : >> { %2133 = vst [vmem:[%s2944_s18 + $0x48] sm:$0xf] %v2132_v33  ;;  %2135 = vst [vmem:[%s2944_s18 + $0x4c] sm:$0xf] %v2134_v48  ;;  %v2138_v55 = vld [vmem:[%s2948_s6 + $0x54] sm:$0xf] }
 0x215   : >> { %2137 = vst [vmem:[%s2944_s18 + $0x50] sm:$0xf] %v2136_v16  ;;  %v2140_v30 = vld [vmem:[%s2948_s6 + $0x58] sm:$0xf]  ;;  %v2142_v28 = vld [vmem:[%s2948_s6 + $0x5c] sm:$0xf] }
 0x216   : >> { %2139 = vst [vmem:[%s2944_s18 + $0x54] sm:$0xf] %v2138_v55  ;;  %2141 = vst [vmem:[%s2944_s18 + $0x58] sm:$0xf] %v2140_v30  ;;  %v2144_v46 = vld [vmem:[%s2948_s6 + $0x60] sm:$0xf] }
 0x217   : >> { %2143 = vst [vmem:[%s2944_s18 + $0x5c] sm:$0xf] %v2142_v28  ;;  %v2146_v37 = vld [vmem:[%s2948_s6 + $0x64] sm:$0xf]  ;;  %v2148_v19 = vld [vmem:[%s2948_s6 + $0x68] sm:$0xf] }
 0x218   : >> { %2145 = vst [vmem:[%s2944_s18 + $0x60] sm:$0xf] %v2144_v46  ;;  %2147 = vst [vmem:[%s2944_s18 + $0x64] sm:$0xf] %v2146_v37  ;;  %v2150_v51 = vld [vmem:[%s2948_s6 + $0x6c] sm:$0xf] }
 0x219   : >> { %2149 = vst [vmem:[%s2944_s18 + $0x68] sm:$0xf] %v2148_v19  ;;  %v2152_v53 = vld [vmem:[%s2948_s6 + $0x70] sm:$0xf]  ;;  %v2154_v22 = vld [vmem:[%s2948_s6 + $0x74] sm:$0xf] }
 0x21a   : >> { %2151 = vst [vmem:[%s2944_s18 + $0x6c] sm:$0xf] %v2150_v51  ;;  %2153 = vst [vmem:[%s2944_s18 + $0x70] sm:$0xf] %v2152_v53  ;;  %v2156_v56 = vld [vmem:[%s2948_s6 + $0x78] sm:$0xf] }
 0x21b   : >> { %2155 = vst [vmem:[%s2944_s18 + $0x74] sm:$0xf] %v2154_v22  ;;  %v2158_v35 = vld [vmem:[%s2948_s6 + $0x7c] sm:$0xf]  ;;  %v2160_v45 = vld [vmem:[%s2948_s6 + $0x80] sm:$0xf] }
 0x21c   : >> { %2157 = vst [vmem:[%s2944_s18 + $0x78] sm:$0xf] %v2156_v56  ;;  %2159 = vst [vmem:[%s2944_s18 + $0x7c] sm:$0xf] %v2158_v35  ;;  %v2162_v4 = vld [vmem:[%s2948_s6 + $0x84] sm:$0xf] }
 0x21d   : >> { %2161 = vst [vmem:[%s2944_s18 + $0x80] sm:$0xf] %v2160_v45  ;;  %v2164_v24 = vld [vmem:[%s2948_s6 + $0x88] sm:$0xf]  ;;  %v2166_v0 = vld [vmem:[%s2948_s6 + $0x8c] sm:$0xf] }
 0x21e   : >> { %2163 = vst [vmem:[%s2944_s18 + $0x84] sm:$0xf] %v2162_v4  ;;  %2165 = vst [vmem:[%s2944_s18 + $0x88] sm:$0xf] %v2164_v24  ;;  %v2168_v43 = vld [vmem:[%s2948_s6 + $0x90] sm:$0xf] }
 0x21f   : >> { %2167 = vst [vmem:[%s2944_s18 + $0x8c] sm:$0xf] %v2166_v0  ;;  %v2170_v26 = vld [vmem:[%s2948_s6 + $0x94] sm:$0xf]  ;;  %v2172_v5 = vld [vmem:[%s2948_s6 + $0x98] sm:$0xf] }
 0x220   : >> { %2169 = vst [vmem:[%s2944_s18 + $0x90] sm:$0xf] %v2168_v43  ;;  %2171 = vst [vmem:[%s2944_s18 + $0x94] sm:$0xf] %v2170_v26  ;;  %v2174_v39 = vld [vmem:[%s2948_s6 + $0x9c] sm:$0xf] }
 0x221   : >> { %2173 = vst [vmem:[%s2944_s18 + $0x98] sm:$0xf] %v2172_v5  ;;  %v2176_v41 = vld [vmem:[%s2948_s6 + $0xa0] sm:$0xf]  ;;  %v2178_v7 = vld [vmem:[%s2948_s6 + $0xa4] sm:$0xf] }
 0x222   : >> { %2175 = vst [vmem:[%s2944_s18 + $0x9c] sm:$0xf] %v2174_v39  ;;  %2177 = vst [vmem:[%s2944_s18 + $0xa0] sm:$0xf] %v2176_v41  ;;  %v2180_v31 = vld [vmem:[%s2948_s6 + $0xa8] sm:$0xf] }
 0x223   : >> { %2179 = vst [vmem:[%s2944_s18 + $0xa4] sm:$0xf] %v2178_v7  ;;  %v2182_v60 = vld [vmem:[%s2948_s6 + $0xac] sm:$0xf]  ;;  %v2184_v25 = vld [vmem:[%s2948_s6 + $0xb0] sm:$0xf] }
 0x224   : >> { %2181 = vst [vmem:[%s2944_s18 + $0xa8] sm:$0xf] %v2180_v31  ;;  %2183 = vst [vmem:[%s2944_s18 + $0xac] sm:$0xf] %v2182_v60  ;;  %v2186_v38 = vld [vmem:[%s2948_s6 + $0xb4] sm:$0xf] }
 0x225   : >> { %2185 = vst [vmem:[%s2944_s18 + $0xb0] sm:$0xf] %v2184_v25  ;;  %v2188_v6 = vld [vmem:[%s2948_s6 + $0xb8] sm:$0xf]  ;;  %v2190_v62 = vld [vmem:[%s2948_s6 + $0xbc] sm:$0xf] }
 0x226   : >> { %2187 = vst [vmem:[%s2944_s18 + $0xb4] sm:$0xf] %v2186_v38  ;;  %2189 = vst [vmem:[%s2944_s18 + $0xb8] sm:$0xf] %v2188_v6  ;;  %v2192_v3 = vld [vmem:[%s2948_s6 + $0xc0] sm:$0xf] }
 0x227   : >> { %2191 = vst [vmem:[%s2944_s18 + $0xbc] sm:$0xf] %v2190_v62  ;;  %v2194_v57 = vld [vmem:[%s2948_s6 + $0xc4] sm:$0xf]  ;;  %v2196_v49 = vld [vmem:[%s2948_s6 + $0xc8] sm:$0xf] }
 0x228   : >> { %2193 = vst [vmem:[%s2944_s18 + $0xc0] sm:$0xf] %v2192_v3  ;;  %2195 = vst [vmem:[%s2944_s18 + $0xc4] sm:$0xf] %v2194_v57  ;;  %v2198_v10 = vld [vmem:[%s2948_s6 + $0xcc] sm:$0xf] }
 0x229   : >> { %2197 = vst [vmem:[%s2944_s18 + $0xc8] sm:$0xf] %v2196_v49  ;;  %v2200_v20 = vld [vmem:[%s2948_s6 + $0xd0] sm:$0xf]  ;;  %v2202_v11 = vld [vmem:[%s2948_s6 + $0xd4] sm:$0xf] }
 0x22a   : >> { %2199 = vst [vmem:[%s2944_s18 + $0xcc] sm:$0xf] %v2198_v10  ;;  %2201 = vst [vmem:[%s2944_s18 + $0xd0] sm:$0xf] %v2200_v20  ;;  %v2204_v1 = vld [vmem:[%s2948_s6 + $0xd8] sm:$0xf] }
 0x22b   : >> { %2203 = vst [vmem:[%s2944_s18 + $0xd4] sm:$0xf] %v2202_v11  ;;  %v2206_v13 = vld [vmem:[%s2948_s6 + $0xdc] sm:$0xf]  ;;  %v2208_v44 = vld [vmem:[%s2948_s6 + $0xe0] sm:$0xf] }
 0x22c   : >> { %2205 = vst [vmem:[%s2944_s18 + $0xd8] sm:$0xf] %v2204_v1  ;;  %2207 = vst [vmem:[%s2944_s18 + $0xdc] sm:$0xf] %v2206_v13  ;;  %v2210_v27 = vld [vmem:[%s2948_s6 + $0xe4] sm:$0xf] }
 0x22d   : >> { %2209 = vst [vmem:[%s2944_s18 + $0xe0] sm:$0xf] %v2208_v44  ;;  %v2212_v17 = vld [vmem:[%s2948_s6 + $0xe8] sm:$0xf]  ;;  %v2214_v50 = vld [vmem:[%s2948_s6 + $0xec] sm:$0xf] }
 0x22e   : >> { %2211 = vst [vmem:[%s2944_s18 + $0xe4] sm:$0xf] %v2210_v27  ;;  %2213 = vst [vmem:[%s2944_s18 + $0xe8] sm:$0xf] %v2212_v17  ;;  %v2216_v14 = vld [vmem:[%s2948_s6 + $0xf0] sm:$0xf] }
 0x22f   : >> { %2215 = vst [vmem:[%s2944_s18 + $0xec] sm:$0xf] %v2214_v50  ;;  %v2218_v18 = vld [vmem:[%s2948_s6 + $0xf4] sm:$0xf]  ;;  %v2220_v29 = vld [vmem:[%s2948_s6 + $0xf8] sm:$0xf] }
 0x230   : >> { %2217 = vst [vmem:[%s2944_s18 + $0xf0] sm:$0xf] %v2216_v14  ;;  %2219 = vst [vmem:[%s2944_s18 + $0xf4] sm:$0xf] %v2218_v18  ;;  %v2222_v12 = vld [vmem:[%s2948_s6 + $0xfc] sm:$0xf] }
 0x231   : >> { %2221 = vst [vmem:[%s2944_s18 + $0xf8] sm:$0xf] %v2220_v29  ;;  %2223 = vst [vmem:[%s2944_s18 + $0xfc] sm:$0xf] %v2222_v12  ;;  %s4447_s9 = smov (%p2225_p12, %s2224_s9), 0  ;;  %s2090_s8 = sadd.s32 1, %s2956_s8  }
 0x232   : >> { %s2682_s10 = sshll.u32 %s4447_s9, 8  ;;  %p2089_p13 = scmp.ge.s32.totalorder %s2090_s8, %s4207_s23 }
 0x233   : >> { %s2229_s6 = scalar_lea.vmem %s3362_s11, %s2682_s10 [#allocation2]   ;;  %s2230_s18 = scalar_lea.vmem %s4201_s30, %s2682_s10  }
 0x234   : >> { %s4438_s7 = smov %s4447_s9  ;;  %2092 = sbr.rel (!%p2089_p13) target bundleno = 519 (0x207), region = 130 }
 0x23b PF: > { %s4375_s15 = sand.u32 63, %s4445_s27   ;;  %s2758_s12 = sshll.u32 %s4207_s23, 8 }
 0x23c   : > { %s2235_s13 = scalar_lea.vmem %s3362_s11, %s2758_s12 [#allocation2]   ;;  %s2237_s14 = scalar_lea.vmem %s4201_s30, %s2758_s12  }
 0x23d   : > { %p2687_p0 = scmp.le.s32.totalorder %s4375_s15, 0 }
 0x23e   : > { %s2958_s17 = smov (!%p2687_p0), %s2237_s14   ;;  %s2962_s20 = smov (!%p2687_p0), %s2235_s13  }
 0x23f   : > { %2517 = sbr.rel (%p2687_p0) target bundleno = 592 (0x250), region = 135  ;;  %s2966_s21 = smov (!%p2687_p0), 0  }
 0x240   : > { %s2970_s24 = smov (!%p2687_p0), 0  }
 0x246 LB: >> { %v2247_v40 = vld [vmem:[%s2964_s20] sm:$0xf]  ;;  %s2249_s25 = sadd.s32 1, %s2968_s21  ;;  %s2241_s24 = sadd.s32 1, %s2972_s24   ;;  %s2972_s24 = sphi %s2970_s24, %s2241_s24   ;;  %s2968_s21 = sphi %s2966_s21, %s2967_s21   ;;  %s2964_s20 = sphi %s2962_s20, %s2254_s20   ;;  %s2960_s17 = sphi %s2958_s17, %s2255_s17  }
 0x247   : >> { %2248 = vst [vmem:[%s2960_s17] sm:$0xf] %v2247_v40  ;;  %p2250_p1 = scmp.ge.s32.totalorder %s2249_s25, %s4375_s15  ;;  %p2240_p2 = scmp.ge.s32.totalorder %s2241_s24, %s4375_s15 }
 0x249   : >> { %s4449_s25 = smov (%p2250_p1, %s2249_s25), 0  ;;  %2243 = sbr.rel (!%p2240_p2) target bundleno = 582 (0x246), region = 141 }
 0x24a   : >> { %s2688_s11 = sshll.u32 %s4449_s25, 2  ;;  %s2967_s21 = smov %s4449_s25  }
 0x24b   : >> { %s2254_s20 = scalar_lea.vmem %s2235_s13, %s2688_s11 [#allocation2]   ;;  %s2255_s17 = scalar_lea.vmem %s2237_s14, %s2688_s11  }
 0x250 PF: > { %p12_p3 = scmp.ge.s32.totalorder %s3015_s19, 4   ;;  %s4439_s15 = smov %s2936_s16 }
 0x251   : > { %s4440_s16 = smov %s3023_s22  ;;  %s4441_s17 = smov %s3015_s19 }
 0x252   :  { %14 = sbr.rel (!%p12_p3) target bundleno = 2 (0x2), region = 152 }

// kernel: tile.33
= control target key start
LH: loop header
LB: loop body
LE: loop exit
PB: predicated region body
PF: predicated region fallthrough
CT: control target
= control target key end

     0   :  { %s28_s0 = inlined_call_operand.vmem [shape: f32[32], index: 0, kind: input, shape index: {}]   ;;  %s29_s1 = inlined_call_operand.vmem [shape: f32[16,32], index: 1, kind: output, shape index: {}]  }
   0x1   :  { %v4_v0 = vld [vmem:[%s28_s0] ss:$0 sm:$0xff] }
   0x2   :  { %5 = vst [vmem:[%s29_s1] sm:$0xff] %v4_v0  ;;  %8 = vst [vmem:[%s29_s1 + $0x8] sm:$0xff] %v4_v0 }

// kernel: mul.31
= control target key start
LH: loop header
LB: loop body
LE: loop exit
PB: predicated region body
PF: predicated region fallthrough
CT: control target
= control target key end

     0   :  { %s35_s8 = smov 96   ;;  %vm3_vm0 = vcmask 261120   ;;  %s37_s15 = smov 64   ;;  %vm9_vm1 = vcmask 1048320   ;;  %vm15_vm2 = vcmask 785920   ;;  %vm21_vm3 = vcmask 523520   ;;  %s63_s0 = inlined_call_operand.vmem [shape: f32[16,32], index: 0, kind: input, shape index: {}]   ;;  %s64_s1 = inlined_call_operand.vmem [shape: f32[512], index: 1, kind: output, shape index: {}]  }
   0x1   :  { %v29_v0 = vld [vmem:[%s63_s0 + $0x3] ss:$4 sm:$0xf]   ;;  %v30_v1 = vld [vmem:[%s63_s0 + $0x2] ss:$4 sm:$0xf]  }
   0x2   :  { %7 = vrot.lane.b32.xlu0 %v29_v0, %s35_s8  ;;  %v31_v2 = vld [vmem:[%s63_s0 + $0x1] ss:$4 sm:$0xf]   ;;  %v2_v3 = vld [vmem:[%s63_s0] ss:$4 sm:$0xf]  }
   0x3   :  { %s36_s0 = smov 32   ;;  %4 = vst.msk [vmem:[#allocation0] sm:$0xf] %vm3_vm0, %v2_v3  }
   0x4   :  { %19 = vrot.lane.b32.xlu1 %v31_v2, %s36_s0 }
   0x6   :  { %13 = vrot.lane.b32.xlu0 %v30_v1, %s37_s15 }
  0x74   :  { %v8_v4 = vpop.permute.xlu0 %7  }
  0x75   :  { %10 = vst.msk [vmem:[#allocation0] sm:$0xf] %vm9_vm1, %v8_v4  }
  0x76   :  { %v20_v5 = vpop.permute.xlu1 %19  }
  0x78   :  { %v14_v6 = vpop.permute.xlu0 %13  }
  0x79   :  { %16 = vst.msk [vmem:[#allocation0] sm:$0xf] %vm15_vm2, %v14_v6  }
  0x7a   :  { %22 = vst.msk [vmem:[#allocation0] sm:$0xf] %vm21_vm3, %v20_v5  }
  0x81   :  { %v26_v7 = vld [vmem:[#allocation0] sm:$0xf] }
  0x82   :  { %28 = vst [vmem:[%s64_s1] sm:$0xf] %v26_v7 }

// kernel: base_network_forward.5
= control target key start
LH: loop header
LB: loop body
LE: loop exit
PB: predicated region body
PF: predicated region fallthrough
CT: control target
= control target key end

     0   :  { %vm924_vm1 = vcmask 519168   ;;  %vm947_vm2 = vcmask 523264   ;;  %s1856_s1 = inlined_call_operand.vmem [shape: bf16[512,64], index: 1, kind: input, shape index: {}]   ;;  %s1857_s0 = inlined_call_operand.vmem [shape: bf16[162,512], index: 0, kind: input, shape index: {}]   ;;  %s1858_s2 = inlined_call_operand.vmem [shape: f32[1,64], index: 2, kind: input, shape index: {}]   ;;  %s1859_s3 = inlined_call_operand.vmem [shape: bf16[162,64], index: 3, kind: output, shape index: {0}]   ;;  %s1860_s4 = inlined_call_operand.vmem [shape: f32[1,2,64], index: 4, kind: output, shape index: {1}]  }
   0x1   :  { %v1358_v0 = vld [vmem:[%s1856_s1 + $0x40] sm:$0xff]   ;;  %v1362_v4 = vld [vmem:[%s1856_s1 + $0x48] sm:$0xff]   ;;  %v1366_v8 = vld [vmem:[%s1856_s1 + $0x50] sm:$0xff]  }
   0x2   :  { %v1359_v1 = vld [vmem:[%s1856_s1 + $0xc0] sm:$0xff]   ;;  %1194 = vmatprep.subr.bf16.mxu0 %v1358_v0  ;;  %v1363_v5 = vld [vmem:[%s1856_s1 + $0xc8] sm:$0xff]   ;;  %v1367_v9 = vld [vmem:[%s1856_s1 + $0xd0] sm:$0xff]  }
   0x3   :  { %v1360_v2 = vld [vmem:[%s1856_s1] sm:$0xff]   ;;  %1276 = vmatprep.subr.bf16.mxu1 %v1359_v1  ;;  %v1364_v6 = vld [vmem:[%s1856_s1 + $0x8] sm:$0xff]   ;;  %v1368_v10 = vld [vmem:[%s1856_s1 + $0x10] sm:$0xff]  }
   0x4   :  { %v1361_v3 = vld [vmem:[%s1856_s1 + $0x80] sm:$0xff]   ;;  %1195 = vmatpush3.bf16.msra.mxu0 %v1360_v2  ;;  %v1365_v7 = vld [vmem:[%s1856_s1 + $0x88] sm:$0xff]   ;;  %v1369_v11 = vld [vmem:[%s1856_s1 + $0x90] sm:$0xff]  }
   0x5   :  { %1277 = vmatpush3.bf16.msra.mxu1 %v1361_v3  ;;  %1196 = vmatprep.subr.bf16.mxu0 %v1362_v4  ;;  %v1370_v12 = vld [vmem:[%s1856_s1 + $0x58] sm:$0xff]   ;;  %v1374_v16 = vld [vmem:[%s1856_s1 + $0x60] sm:$0xff]   ;;  %v1378_v20 = vld [vmem:[%s1856_s1 + $0x68] sm:$0xff]  }
   0x6   :  { %1278 = vmatprep.subr.bf16.mxu1 %v1363_v5  ;;  %v1371_v13 = vld [vmem:[%s1856_s1 + $0xd8] sm:$0xff]   ;;  %v1375_v17 = vld [vmem:[%s1856_s1 + $0xe0] sm:$0xff]   ;;  %v1379_v21 = vld [vmem:[%s1856_s1 + $0xe8] sm:$0xff]  }
   0x7   :  { %v1372_v14 = vld [vmem:[%s1856_s1 + $0x18] sm:$0xff]   ;;  %v1376_v18 = vld [vmem:[%s1856_s1 + $0x20] sm:$0xff]   ;;  %v1380_v22 = vld [vmem:[%s1856_s1 + $0x28] sm:$0xff]  }
   0x8   :  { %1197 = vmatpush3.bf16.msra.mxu0 %v1364_v6  ;;  %v1373_v15 = vld [vmem:[%s1856_s1 + $0x98] sm:$0xff]   ;;  %v1377_v19 = vld [vmem:[%s1856_s1 + $0xa0] sm:$0xff]   ;;  %v1381_v23 = vld [vmem:[%s1856_s1 + $0xa8] sm:$0xff]  }
   0x9   :  { %1279 = vmatpush3.bf16.msra.mxu1 %v1365_v7  ;;  %1198 = vmatprep.subr.bf16.mxu0 %v1366_v8  ;;  %v1382_v24 = vld [vmem:[%s1856_s1 + $0x70] sm:$0xff]   ;;  %v1386_v28 = vld [vmem:[%s1856_s1 + $0x78] sm:$0xff]   ;;  %v57_v6 = vld [vmem:[%s1857_s0 + $0x140] sm:$0x11] }
   0xa   :  { %1280 = vmatprep.subr.bf16.mxu1 %v1367_v9  ;;  %v1383_v25 = vld [vmem:[%s1856_s1 + $0xf0] sm:$0xff]   ;;  %v1387_v29 = vld [vmem:[%s1856_s1 + $0xf8] sm:$0xff]   ;;  %v58_v7 = vld [vmem:[%s1857_s0 + $0x148] sm:$0x11] }
   0xb   :  { %v1384_v26 = vld [vmem:[%s1856_s1 + $0x30] sm:$0xff]   ;;  %v1388_v30 = vld [vmem:[%s1856_s1 + $0x38] sm:$0xff]  }
   0xc   :  { %1199 = vmatpush3.bf16.msra.mxu0 %v1368_v10  ;;  %v1385_v27 = vld [vmem:[%s1856_s1 + $0xb0] sm:$0xff]   ;;  %v1389_v31 = vld [vmem:[%s1856_s1 + $0xb8] sm:$0xff]   ;;  %v1117_v10 = vcombine.high %v57_v6, %v57_v6 }
   0xd   :  { %1281 = vmatpush3.bf16.msra.mxu1 %v1369_v11  ;;  %1200 = vmatprep.subr.bf16.mxu0 %v1370_v12  ;;  %v1390_v32 = vld [vmem:[%s1857_s0] ss:$16 sps:$4 sm:$0xff]   ;;  %v1392_v33 = vld [vmem:[%s1857_s0 + $0x4] ss:$16 sps:$4 sm:$0xff]   ;;  %v1393_v34 = vld [vmem:[%s1857_s0 + $0x8] ss:$16 sps:$4 sm:$0xff]   ;;  %v1119_v11 = vcombine.high %v58_v7, %v58_v7  ;;  %v1116_v12 = vcombine.low %v57_v6, %v57_v6 }
   0xe   :  { %1282 = vmatprep.subr.bf16.mxu1 %v1371_v13  ;;  %v1395_v35 = vld [vmem:[%s1857_s0 + $0xc] ss:$16 sps:$4 sm:$0xff]   ;;  %568 = vmatprep.mubr.bf16.mxu0 %v1392_v33  ;;  %v1396_v36 = vld [vmem:[%s1857_s0 + $0x24] ss:$16 sps:$4 sm:$0xff]   ;;  %v1400_v38 = vld [vmem:[%s1857_s0 + $0x20] ss:$16 sps:$4 sm:$0xff]   ;;  %v1118_v13 = vcombine.low %v58_v7, %v58_v7 }
   0xf   :  { %688 = vmatprep.mubr.bf16.mxu1 %v1395_v35  ;;  %v1398_v37 = vld [vmem:[%s1857_s0 + $0x2c] ss:$16 sps:$4 sm:$0xff]   ;;  %v1401_v39 = vld [vmem:[%s1857_s0 + $0x28] ss:$16 sps:$4 sm:$0xff]   ;;  %v1402_v40 = vld [vmem:[%s1857_s0 + $0x44] ss:$16 sps:$4 sm:$0xff]  }
  0x10   :  { %1201 = vmatpush3.bf16.msra.mxu0 %v1372_v14  ;;  %v1404_v41 = vld [vmem:[%s1857_s0 + $0x4c] ss:$16 sps:$4 sm:$0xff]   ;;  %v1406_v42 = vld [vmem:[%s1857_s0 + $0x40] ss:$16 sps:$4 sm:$0xff]   ;;  %v1407_v43 = vld [vmem:[%s1857_s0 + $0x48] ss:$16 sps:$4 sm:$0xff]  }
  0x11   :  { %1283 = vmatpush3.bf16.msra.mxu1 %v1373_v15  ;;  %1202 = vmatprep.subr.bf16.mxu0 %v1374_v16  ;;  %v1408_v44 = vld [vmem:[%s1857_s0 + $0x64] ss:$16 sps:$4 sm:$0xff]   ;;  %v1410_v45 = vld [vmem:[%s1857_s0 + $0x6c] ss:$16 sps:$4 sm:$0xff]   ;;  %v1412_v46 = vld [vmem:[%s1857_s0 + $0x60] ss:$16 sps:$4 sm:$0xff]  }
  0x12   :  { %1284 = vmatprep.subr.bf16.mxu1 %v1375_v17  ;;  %v1413_v47 = vld [vmem:[%s1857_s0 + $0x68] ss:$16 sps:$4 sm:$0xff]   ;;  %v1414_v48 = vld [vmem:[%s1857_s0 + $0x84] ss:$16 sps:$4 sm:$0xff]   ;;  %v1416_v49 = vld [vmem:[%s1857_s0 + $0x8c] ss:$16 sps:$4 sm:$0xff]  }
  0x13   :  { %v1418_v50 = vld [vmem:[%s1857_s0 + $0x80] ss:$16 sps:$4 sm:$0xff]   ;;  %v1419_v51 = vld [vmem:[%s1857_s0 + $0x88] ss:$16 sps:$4 sm:$0xff]   ;;  %v1420_v52 = vld [vmem:[%s1857_s0 + $0xa4] ss:$16 sps:$4 sm:$0xff]  }
  0x14   :  { %1203 = vmatpush3.bf16.msra.mxu0 %v1376_v18  ;;  %v1422_v53 = vld [vmem:[%s1857_s0 + $0xac] ss:$16 sps:$4 sm:$0xff]   ;;  %v1424_v54 = vld [vmem:[%s1857_s0 + $0xa0] ss:$16 sps:$4 sm:$0xff]   ;;  %v1425_v55 = vld [vmem:[%s1857_s0 + $0xa8] ss:$16 sps:$4 sm:$0xff]  }
  0x15   :  { %1285 = vmatpush3.bf16.msra.mxu1 %v1377_v19  ;;  %1204 = vmatprep.subr.bf16.mxu0 %v1378_v20  ;;  %v1426_v56 = vld [vmem:[%s1857_s0 + $0xc4] ss:$16 sps:$4 sm:$0xff]   ;;  %v1428_v57 = vld [vmem:[%s1857_s0 + $0xcc] ss:$16 sps:$4 sm:$0xff]   ;;  %v1430_v58 = vld [vmem:[%s1857_s0 + $0xc0] ss:$16 sps:$4 sm:$0xff]  }
  0x16   :  { %1286 = vmatprep.subr.bf16.mxu1 %v1379_v21  ;;  %v1431_v59 = vld [vmem:[%s1857_s0 + $0xc8] ss:$16 sps:$4 sm:$0xff]   ;;  %v1432_v60 = vld [vmem:[%s1857_s0 + $0xe4] ss:$16 sps:$4 sm:$0xff]   ;;  %v1434_v61 = vld [vmem:[%s1857_s0 + $0xec] ss:$16 sps:$4 sm:$0xff]  }
  0x17   :  { %v1436_v62 = vld [vmem:[%s1857_s0 + $0xe0] ss:$16 sps:$4 sm:$0xff]   ;;  %v1437_v63 = vld [vmem:[%s1857_s0 + $0xe8] ss:$16 sps:$4 sm:$0xff]   ;;  %v1438_v0 = vld [vmem:[%s1857_s0 + $0x104] ss:$16 sps:$4 sm:$0xff]  }
  0x18   :  { %1205 = vmatpush3.bf16.msra.mxu0 %v1380_v22  ;;  %v1440_v1 = vld [vmem:[%s1857_s0 + $0x10c] ss:$16 sps:$4 sm:$0xff]   ;;  %v1442_v2 = vld [vmem:[%s1857_s0 + $0x100] ss:$16 sps:$4 sm:$0xff]   ;;  %v1443_v3 = vld [vmem:[%s1857_s0 + $0x108] ss:$16 sps:$4 sm:$0xff]  }
  0x19   :  { %1287 = vmatpush3.bf16.msra.mxu1 %v1381_v23  ;;  %1206 = vmatprep.subr.bf16.mxu0 %v1382_v24  ;;  %v1444_v4 = vld [vmem:[%s1857_s0 + $0x124] ss:$16 sps:$4 sm:$0xff]   ;;  %v1446_v5 = vld [vmem:[%s1857_s0 + $0x12c] ss:$16 sps:$4 sm:$0xff]   ;;  %v1448_v8 = vld [vmem:[%s1857_s0 + $0x120] ss:$16 sps:$4 sm:$0xff]  }
  0x1a   :  { %1288 = vmatprep.subr.bf16.mxu1 %v1383_v25  ;;  %v1449_v9 = vld [vmem:[%s1857_s0 + $0x128] ss:$16 sps:$4 sm:$0xff]   ;;  %v1704_v16 = vld [vmem:[%s1858_s2] ss:$0 sm:$0xff] }
  0x1c   :  { %1207 = vmatpush3.bf16.msra.mxu0 %v1384_v26 }
  0x1d   :  { %1289 = vmatpush3.bf16.msra.mxu1 %v1385_v27  ;;  %1208 = vmatprep.subr.bf16.mxu0 %v1386_v28 }
  0x1e   :  { %1290 = vmatprep.subr.bf16.mxu1 %v1387_v29 }
  0x20   :  { %1209 = vmatpush3.bf16.msra.mxu0 %v1388_v30 }
  0x21   :  { %1291 = vmatpush3.bf16.msra.mxu1 %v1389_v31 }
  0x23   :  { %569 = vmatmul.mubr.bf16.vlgmr.msra.gmra.mrb[0].mxu0 %v1390_v32 }
  0x24   :  { %689 = vmatmul.mubr.bf16.vlgmr.msra.gmra.mrb[0].mxu1 %v1393_v34  ;;  %576 = vmatprep.mubr.bf16.mxu0 %v1396_v36 }
  0x25   :  { %696 = vmatprep.mubr.bf16.mxu1 %v1398_v37 }
  0x2b   :  { %577 = vmatmul.mubr.bf16.gmra.mrb[4].mxu0 %v1400_v38 }
  0x2c   :  { %697 = vmatmul.mubr.bf16.gmra.mrb[4].mxu1 %v1401_v39  ;;  %584 = vmatprep.mubr.bf16.mxu0 %v1402_v40 }
  0x2d   :  { %704 = vmatprep.mubr.bf16.mxu1 %v1404_v41 }
  0x33   :  { %585 = vmatmul.mubr.bf16.gmra.mrb[8].mxu0 %v1406_v42 }
  0x34   :  { %705 = vmatmul.mubr.bf16.gmra.mrb[8].mxu1 %v1407_v43  ;;  %592 = vmatprep.mubr.bf16.mxu0 %v1408_v44 }
  0x35   :  { %712 = vmatprep.mubr.bf16.mxu1 %v1410_v45 }
  0x3b   :  { %593 = vmatmul.mubr.bf16.gmra.mrb[12].mxu0 %v1412_v46 }
  0x3c   :  { %713 = vmatmul.mubr.bf16.gmra.mrb[12].mxu1 %v1413_v47  ;;  %600 = vmatprep.mubr.bf16.mxu0 %v1414_v48 }
  0x3d   :  { %720 = vmatprep.mubr.bf16.mxu1 %v1416_v49 }
  0x43   :  { %601 = vmatmul.mubr.bf16.gmra.mrb[16].mxu0 %v1418_v50 }
  0x44   :  { %721 = vmatmul.mubr.bf16.gmra.mrb[16].mxu1 %v1419_v51  ;;  %608 = vmatprep.mubr.bf16.mxu0 %v1420_v52 }
  0x45   :  { %728 = vmatprep.mubr.bf16.mxu1 %v1422_v53 }
  0x4b   :  { %609 = vmatmul.mubr.bf16.gmra.mrb[20].mxu0 %v1424_v54 }
  0x4c   :  { %729 = vmatmul.mubr.bf16.gmra.mrb[20].mxu1 %v1425_v55  ;;  %616 = vmatprep.mubr.bf16.mxu0 %v1426_v56 }
  0x4d   :  { %736 = vmatprep.mubr.bf16.mxu1 %v1428_v57 }
  0x53   :  { %617 = vmatmul.mubr.bf16.gmra.mrb[24].mxu0 %v1430_v58 }
  0x54   :  { %737 = vmatmul.mubr.bf16.gmra.mrb[24].mxu1 %v1431_v59  ;;  %624 = vmatprep.mubr.bf16.mxu0 %v1432_v60 }
  0x55   :  { %744 = vmatprep.mubr.bf16.mxu1 %v1434_v61 }
  0x5b   :  { %625 = vmatmul.mubr.bf16.gmra.mrb[28].mxu0 %v1436_v62 }
  0x5c   :  { %745 = vmatmul.mubr.bf16.gmra.mrb[28].mxu1 %v1437_v63  ;;  %632 = vmatprep.mubr.bf16.mxu0 %v1438_v0 }
  0x5d   :  { %752 = vmatprep.mubr.bf16.mxu1 %v1440_v1 }
  0x63   :  { %633 = vmatmul.mubr.bf16.gmra.mrb[32].mxu0 %v1442_v2 }
  0x64   :  { %753 = vmatmul.mubr.bf16.gmra.mrb[32].mxu1 %v1443_v3  ;;  %640 = vmatprep.mubr.bf16.mxu0 %v1444_v4 }
  0x65   :  { %760 = vmatprep.mubr.bf16.mxu1 %v1446_v5 }
  0x6b   :  { %641 = vmatmul.mubr.bf16.gmra.mrb[36].mxu0 %v1448_v8 }
  0x6c   :  { %761 = vmatmul.mubr.bf16.gmra.mrb[36].mxu1 %v1449_v9  ;;  %648 = vmatprep.mubr.bf16.mxu0 %v1117_v10 }
  0x6d   :  { %768 = vmatprep.mubr.bf16.mxu1 %v1119_v11 }
  0x73   :  { %649 = vmatmul.mubr.bf16.gmra.mrb[40].mxu0 %v1116_v12 }
  0x74   :  { %769 = vmatmul.mubr.bf16.gmra.mrb[40].mxu1 %v1118_v13 }
  0xf6   :  { %v1210_v14 = vpop.f32.mrb[0].mxu0 }
  0xf7   :  { %v1292_v15 = vpop.f32.mrb[0].mxu1  ;;  %v1211_v17 = vpop.f32.mrb[1].mxu0 }
  0xf8   :  { %v1212_v18 = vadd.f32 %v1211_v17, %v1210_v14  ;;  %v1293_v19 = vpop.f32.mrb[1].mxu1  ;;  %v1213_v20 = vpop.f32.mrb[2].mxu0 }
  0xf9   :  { %v1294_v21 = vadd.f32 %v1293_v19, %v1292_v15  ;;  %v1295_v22 = vpop.f32.mrb[2].mxu1  ;;  %v1214_v23 = vpop.f32.mrb[3].mxu0 }
  0xfa   :  { %v571_v24 = vadd.f32 %v1212_v18, %v1704_v16  ;;  %v1215_v25 = vadd.f32 %v1214_v23, %v1213_v20  ;;  %v1296_v26 = vpop.f32.mrb[3].mxu1 }
  0xfb   :  { %v1297_v27 = vadd.f32 %v1296_v26, %v1295_v22 }
  0xfc   :  { %v691_v28 = vadd.f32 %v1294_v21, %v571_v24  ;;  %v574_v29 = vadd.f32 %v1215_v25, %v1704_v16 }
  0xfe   :  { %vm776_vm0 = vcmp.ge.f32.partialorder %v691_v28, 0.0  ;;  %v797_v30 = vmul.f32 0.01, %v691_v28  ;;  %v694_v31 = vadd.f32 %v1297_v27, %v574_v29  ;;  %v1216_v32 = vpop.f32.mrb[4].mxu0 }
  0xff   :  { %v1298_v33 = vpop.f32.mrb[4].mxu1  ;;  %v1217_v34 = vpop.f32.mrb[5].mxu0 }
 0x100   :  { %v818_v35 = vsel %vm776_vm0, %v691_v28, %v797_v30  ;;  %vm777_vm3 = vcmp.ge.f32.partialorder %v694_v31, 0.0  ;;  %v798_v36 = vmul.f32 0.01, %v694_v31  ;;  %v1218_v37 = vadd.f32 %v1217_v34, %v1216_v32  ;;  %v1299_v38 = vpop.f32.mrb[5].mxu1  ;;  %v1219_v39 = vpop.f32.mrb[6].mxu0 }
 0x101   :  { %v1173_v40 = vpack.c.bf16 %v818_v35, %v818_v35  ;;  %v996_v41 = vmul.f32 %v818_v35, %v818_v35  ;;  %v1300_v42 = vadd.f32 %v1299_v38, %v1298_v33  ;;  %v1301_v43 = vpop.f32.mrb[6].mxu1  ;;  %v1220_v44 = vpop.f32.mrb[7].mxu0  ;;  %v948_v49 = vsel %vm947_vm2, %v818_v35, 0.0 }
 0x102   :  { %v819_v45 = vsel %vm777_vm3, %v694_v31, %v798_v36  ;;  %v579_v46 = vadd.f32 %v1218_v37, %v1704_v16  ;;  %v1221_v47 = vadd.f32 %v1220_v44, %v1219_v39  ;;  %v1302_v48 = vpop.f32.mrb[7].mxu1 }
 0x103   :  { %925 = vst.msk [vmem:[%s1859_s3] sm:$0xf] %vm924_vm1, %v1173_v40  ;;  %v1174_v50 = vpack.c.bf16 %v819_v45, %v819_v45  ;;  %v949_v51 = vsel %vm947_vm2, %v819_v45, 0.0  ;;  %v997_v52 = vmul.f32 %v819_v45, %v819_v45  ;;  %v1303_v56 = vadd.f32 %v1302_v48, %v1301_v43 }
 0x104   :  { %v950_v53 = vadd.f32 %v949_v51, %v948_v49  ;;  %v699_v54 = vadd.f32 %v1300_v42, %v579_v46  ;;  %v582_v55 = vadd.f32 %v1221_v47, %v1704_v16  ;;  %v1017_v57 = vsel %vm947_vm2, %v996_v41, 0.0 }
 0x105   :  { %926 = vst.msk [vmem:[%s1859_s3 + $0x4] sm:$0xf] %vm924_vm1, %v1174_v50  ;;  %v1018_v58 = vsel %vm947_vm2, %v997_v52, 0.0 }
 0x106   :  { %v1019_v59 = vadd.f32 %v1018_v58, %v1017_v57  ;;  %vm778_vm4 = vcmp.ge.f32.partialorder %v699_v54, 0.0  ;;  %v799_v60 = vmul.f32 0.01, %v699_v54  ;;  %v702_v61 = vadd.f32 %v1303_v56, %v582_v55  ;;  %v1222_v62 = vpop.f32.mrb[8].mxu0 }
 0x107   :  { %v1304_v63 = vpop.f32.mrb[8].mxu1  ;;  %v1223_v0 = vpop.f32.mrb[9].mxu0 }
 0x108   :  { %v820_v1 = vsel %vm778_vm4, %v699_v54, %v799_v60  ;;  %vm779_vm5 = vcmp.ge.f32.partialorder %v702_v61, 0.0  ;;  %v800_v2 = vmul.f32 0.01, %v702_v61  ;;  %v1224_v3 = vadd.f32 %v1223_v0, %v1222_v62  ;;  %v1305_v4 = vpop.f32.mrb[9].mxu1  ;;  %v1225_v5 = vpop.f32.mrb[10].mxu0 }
 0x109   :  { %v1175_v6 = vpack.c.bf16 %v820_v1, %v820_v1  ;;  %v951_v7 = vsel %vm947_vm2, %v820_v1, 0.0  ;;  %v998_v8 = vmul.f32 %v820_v1, %v820_v1  ;;  %v1306_v9 = vadd.f32 %v1305_v4, %v1304_v63  ;;  %v1307_v10 = vpop.f32.mrb[10].mxu1  ;;  %v1226_v11 = vpop.f32.mrb[11].mxu0 }
 0x10a   :  { %v952_v12 = vadd.f32 %v951_v7, %v950_v53  ;;  %v821_v13 = vsel %vm779_vm5, %v702_v61, %v800_v2  ;;  %v587_v14 = vadd.f32 %v1224_v3, %v1704_v16  ;;  %v1227_v15 = vadd.f32 %v1226_v11, %v1225_v5  ;;  %v1308_v17 = vpop.f32.mrb[11].mxu1 }
 0x10b   :  { %927 = vst.msk [vmem:[%s1859_s3 + $0x8] sm:$0xf] %vm924_vm1, %v1175_v6  ;;  %v1020_v18 = vsel %vm947_vm2, %v998_v8, 0.0  ;;  %v1176_v19 = vpack.c.bf16 %v821_v13, %v821_v13  ;;  %v953_v20 = vsel %vm947_vm2, %v821_v13, 0.0  ;;  %v999_v21 = vmul.f32 %v821_v13, %v821_v13 }
 0x10c   :  { %v1021_v22 = vadd.f32 %v1020_v18, %v1019_v59  ;;  %v954_v23 = vadd.f32 %v953_v20, %v952_v12  ;;  %v707_v24 = vadd.f32 %v1306_v9, %v587_v14  ;;  %v590_v25 = vadd.f32 %v1227_v15, %v1704_v16 }
 0x10d   :  { %928 = vst.msk [vmem:[%s1859_s3 + $0xc] sm:$0xf] %vm924_vm1, %v1176_v19  ;;  %v1022_v26 = vsel %vm947_vm2, %v999_v21, 0.0  ;;  %v1309_v27 = vadd.f32 %v1308_v17, %v1307_v10 }
 0x10e   :  { %v1023_v28 = vadd.f32 %v1022_v26, %v1021_v22  ;;  %vm780_vm6 = vcmp.ge.f32.partialorder %v707_v24, 0.0  ;;  %v801_v29 = vmul.f32 0.01, %v707_v24  ;;  %v1228_v30 = vpop.f32.mrb[12].mxu0 }
 0x10f   :  { %v710_v31 = vadd.f32 %v1309_v27, %v590_v25  ;;  %v1310_v32 = vpop.f32.mrb[12].mxu1  ;;  %v1229_v33 = vpop.f32.mrb[13].mxu0 }
 0x110   :  { %v822_v34 = vsel %vm780_vm6, %v707_v24, %v801_v29  ;;  %v1230_v35 = vadd.f32 %v1229_v33, %v1228_v30  ;;  %v1311_v36 = vpop.f32.mrb[13].mxu1  ;;  %v1231_v37 = vpop.f32.mrb[14].mxu0 }
 0x111   :  { %v1177_v38 = vpack.c.bf16 %v822_v34, %v822_v34  ;;  %v955_v39 = vsel %vm947_vm2, %v822_v34, 0.0  ;;  %v1000_v40 = vmul.f32 %v822_v34, %v822_v34  ;;  %vm781_vm7 = vcmp.ge.f32.partialorder %v710_v31, 0.0  ;;  %v1313_v41 = vpop.f32.mrb[14].mxu1  ;;  %v1232_v42 = vpop.f32.mrb[15].mxu0 }
 0x112   :  { %v956_v43 = vadd.f32 %v955_v39, %v954_v23  ;;  %v802_v44 = vmul.f32 0.01, %v710_v31  ;;  %v595_v45 = vadd.f32 %v1230_v35, %v1704_v16  ;;  %v1312_v46 = vadd.f32 %v1311_v36, %v1310_v32  ;;  %v1314_v47 = vpop.f32.mrb[15].mxu1 }
 0x113   :  { %929 = vst.msk [vmem:[%s1859_s3 + $0x10] sm:$0xf] %vm924_vm1, %v1177_v38  ;;  %v1024_v48 = vsel %vm947_vm2, %v1000_v40, 0.0  ;;  %v1233_v49 = vadd.f32 %v1232_v42, %v1231_v37  ;;  %v1315_v50 = vadd.f32 %v1314_v47, %v1313_v41 }
 0x114   :  { %v1025_v51 = vadd.f32 %v1024_v48, %v1023_v28  ;;  %v823_v52 = vsel %vm781_vm7, %v710_v31, %v802_v44  ;;  %v715_v53 = vadd.f32 %v1312_v46, %v595_v45 }
 0x115   :  { %v1178_v54 = vpack.c.bf16 %v823_v52, %v823_v52  ;;  %v957_v55 = vsel %vm947_vm2, %v823_v52, 0.0  ;;  %v1001_v56 = vmul.f32 %v823_v52, %v823_v52  ;;  %v598_v57 = vadd.f32 %v1233_v49, %v1704_v16 }
 0x116   :  { %v958_v58 = vadd.f32 %v957_v55, %v956_v43  ;;  %vm782_vm8 = vcmp.ge.f32.partialorder %v715_v53, 0.0  ;;  %v803_v59 = vmul.f32 0.01, %v715_v53  ;;  %v1234_v60 = vpop.f32.mrb[16].mxu0 }
 0x117   :  { %930 = vst.msk [vmem:[%s1859_s3 + $0x14] sm:$0xf] %vm924_vm1, %v1178_v54  ;;  %v1026_v61 = vsel %vm947_vm2, %v1001_v56, 0.0  ;;  %v718_v62 = vadd.f32 %v1315_v50, %v598_v57  ;;  %v1316_v63 = vpop.f32.mrb[16].mxu1  ;;  %v1235_v0 = vpop.f32.mrb[17].mxu0 }
 0x118   :  { %v1027_v1 = vadd.f32 %v1026_v61, %v1025_v51  ;;  %v824_v2 = vsel %vm782_vm8, %v715_v53, %v803_v59  ;;  %v1236_v3 = vadd.f32 %v1235_v0, %v1234_v60  ;;  %v1317_v4 = vpop.f32.mrb[17].mxu1  ;;  %v1237_v5 = vpop.f32.mrb[18].mxu0 }
 0x119   :  { %v1179_v6 = vpack.c.bf16 %v824_v2, %v824_v2  ;;  %v959_v7 = vsel %vm947_vm2, %v824_v2, 0.0  ;;  %v1002_v8 = vmul.f32 %v824_v2, %v824_v2  ;;  %vm783_vm9 = vcmp.ge.f32.partialorder %v718_v62, 0.0  ;;  %v1319_v9 = vpop.f32.mrb[18].mxu1  ;;  %v1238_v10 = vpop.f32.mrb[19].mxu0 }
 0x11a   :  { %v960_v11 = vadd.f32 %v959_v7, %v958_v58  ;;  %v804_v12 = vmul.f32 0.01, %v718_v62  ;;  %v603_v13 = vadd.f32 %v1236_v3, %v1704_v16  ;;  %v1318_v14 = vadd.f32 %v1317_v4, %v1316_v63  ;;  %v1320_v15 = vpop.f32.mrb[19].mxu1 }
 0x11b   :  { %931 = vst.msk [vmem:[%s1859_s3 + $0x18] sm:$0xf] %vm924_vm1, %v1179_v6  ;;  %v1028_v17 = vsel %vm947_vm2, %v1002_v8, 0.0  ;;  %v1239_v18 = vadd.f32 %v1238_v10, %v1237_v5  ;;  %v1321_v19 = vadd.f32 %v1320_v15, %v1319_v9 }
 0x11c   :  { %v1029_v20 = vadd.f32 %v1028_v17, %v1027_v1  ;;  %v825_v21 = vsel %vm783_vm9, %v718_v62, %v804_v12  ;;  %v723_v22 = vadd.f32 %v1318_v14, %v603_v13  ;;  %vm987_vm9 = vcmask 517120  }
 0x11d   :  { %v1180_v23 = vpack.c.bf16 %v825_v21, %v825_v21  ;;  %v961_v24 = vsel %vm947_vm2, %v825_v21, 0.0  ;;  %v1003_v25 = vmul.f32 %v825_v21, %v825_v21  ;;  %v606_v26 = vadd.f32 %v1239_v18, %v1704_v16 }
 0x11e   :  { %v962_v27 = vadd.f32 %v961_v24, %v960_v11  ;;  %vm784_vm10 = vcmp.ge.f32.partialorder %v723_v22, 0.0  ;;  %v805_v28 = vmul.f32 0.01, %v723_v22  ;;  %v1240_v29 = vpop.f32.mrb[20].mxu0 }
 0x11f   :  { %932 = vst.msk [vmem:[%s1859_s3 + $0x1c] sm:$0xf] %vm924_vm1, %v1180_v23  ;;  %v1030_v30 = vsel %vm947_vm2, %v1003_v25, 0.0  ;;  %v726_v31 = vadd.f32 %v1321_v19, %v606_v26  ;;  %v1322_v32 = vpop.f32.mrb[20].mxu1  ;;  %v1241_v33 = vpop.f32.mrb[21].mxu0 }
 0x120   :  { %v1031_v34 = vadd.f32 %v1030_v30, %v1029_v20  ;;  %v826_v35 = vsel %vm784_vm10, %v723_v22, %v805_v28  ;;  %v1242_v36 = vadd.f32 %v1241_v33, %v1240_v29  ;;  %v1323_v37 = vpop.f32.mrb[21].mxu1  ;;  %v1243_v38 = vpop.f32.mrb[22].mxu0  ;;  %vm945_vm10 = vcmask 516096  }
 0x121   :  { %v1181_v39 = vpack.c.bf16 %v826_v35, %v826_v35  ;;  %v963_v40 = vsel %vm947_vm2, %v826_v35, 0.0  ;;  %v1004_v41 = vmul.f32 %v826_v35, %v826_v35  ;;  %vm785_vm11 = vcmp.ge.f32.partialorder %v726_v31, 0.0  ;;  %v1325_v42 = vpop.f32.mrb[22].mxu1  ;;  %v1244_v43 = vpop.f32.mrb[23].mxu0 }
 0x122   :  { %v964_v44 = vadd.f32 %v963_v40, %v962_v27  ;;  %v806_v45 = vmul.f32 0.01, %v726_v31  ;;  %v611_v46 = vadd.f32 %v1242_v36, %v1704_v16  ;;  %v1324_v47 = vadd.f32 %v1323_v37, %v1322_v32  ;;  %v1326_v48 = vpop.f32.mrb[23].mxu1 }
 0x123   :  { %933 = vst.msk [vmem:[%s1859_s3 + $0x20] sm:$0xf] %vm924_vm1, %v1181_v39  ;;  %v1032_v49 = vsel %vm947_vm2, %v1004_v41, 0.0  ;;  %v1245_v50 = vadd.f32 %v1244_v43, %v1243_v38  ;;  %v1327_v51 = vadd.f32 %v1326_v48, %v1325_v42 }
 0x124   :  { %v1033_v52 = vadd.f32 %v1032_v49, %v1031_v34  ;;  %v827_v53 = vsel %vm785_vm11, %v726_v31, %v806_v45  ;;  %v731_v54 = vadd.f32 %v1324_v47, %v611_v46 }
 0x125   :  { %v1182_v55 = vpack.c.bf16 %v827_v53, %v827_v53  ;;  %v965_v56 = vsel %vm947_vm2, %v827_v53, 0.0  ;;  %v1005_v57 = vmul.f32 %v827_v53, %v827_v53  ;;  %v614_v58 = vadd.f32 %v1245_v50, %v1704_v16 }
 0x126   :  { %v966_v59 = vadd.f32 %v965_v56, %v964_v44  ;;  %vm786_vm12 = vcmp.ge.f32.partialorder %v731_v54, 0.0  ;;  %v807_v60 = vmul.f32 0.01, %v731_v54  ;;  %v1246_v61 = vpop.f32.mrb[24].mxu0 }
 0x127   :  { %934 = vst.msk [vmem:[%s1859_s3 + $0x24] sm:$0xf] %vm924_vm1, %v1182_v55  ;;  %v1034_v62 = vsel %vm947_vm2, %v1005_v57, 0.0  ;;  %v734_v63 = vadd.f32 %v1327_v51, %v614_v58  ;;  %v1328_v0 = vpop.f32.mrb[24].mxu1  ;;  %v1247_v1 = vpop.f32.mrb[25].mxu0 }
 0x128   :  { %v1035_v2 = vadd.f32 %v1034_v62, %v1033_v52  ;;  %v828_v3 = vsel %vm786_vm12, %v731_v54, %v807_v60  ;;  %v1248_v4 = vadd.f32 %v1247_v1, %v1246_v61  ;;  %v1329_v5 = vpop.f32.mrb[25].mxu1  ;;  %v1249_v6 = vpop.f32.mrb[26].mxu0 }
 0x129   :  { %v1183_v7 = vpack.c.bf16 %v828_v3, %v828_v3  ;;  %v967_v8 = vsel %vm947_vm2, %v828_v3, 0.0  ;;  %v1006_v9 = vmul.f32 %v828_v3, %v828_v3  ;;  %vm787_vm13 = vcmp.ge.f32.partialorder %v734_v63, 0.0  ;;  %v1331_v10 = vpop.f32.mrb[26].mxu1  ;;  %v1250_v11 = vpop.f32.mrb[27].mxu0 }
 0x12a   :  { %v968_v12 = vadd.f32 %v967_v8, %v966_v59  ;;  %v808_v13 = vmul.f32 0.01, %v734_v63  ;;  %v619_v14 = vadd.f32 %v1248_v4, %v1704_v16  ;;  %v1330_v15 = vadd.f32 %v1329_v5, %v1328_v0  ;;  %v1332_v17 = vpop.f32.mrb[27].mxu1 }
 0x12b   :  { %935 = vst.msk [vmem:[%s1859_s3 + $0x28] sm:$0xf] %vm924_vm1, %v1183_v7  ;;  %v1036_v18 = vsel %vm947_vm2, %v1006_v9, 0.0  ;;  %v1251_v19 = vadd.f32 %v1250_v11, %v1249_v6  ;;  %v1333_v20 = vadd.f32 %v1332_v17, %v1331_v10 }
 0x12c   :  { %v1037_v21 = vadd.f32 %v1036_v18, %v1035_v2  ;;  %v829_v22 = vsel %vm787_vm13, %v734_v63, %v808_v13  ;;  %v739_v23 = vadd.f32 %v1330_v15, %v619_v14 }
 0x12d   :  { %v1184_v24 = vpack.c.bf16 %v829_v22, %v829_v22  ;;  %v969_v25 = vsel %vm947_vm2, %v829_v22, 0.0  ;;  %v1007_v26 = vmul.f32 %v829_v22, %v829_v22  ;;  %v622_v27 = vadd.f32 %v1251_v19, %v1704_v16 }
 0x12e   :  { %v970_v28 = vadd.f32 %v969_v25, %v968_v12  ;;  %vm788_vm14 = vcmp.ge.f32.partialorder %v739_v23, 0.0  ;;  %v809_v29 = vmul.f32 0.01, %v739_v23  ;;  %v1252_v30 = vpop.f32.mrb[28].mxu0 }
 0x12f   :  { %936 = vst.msk [vmem:[%s1859_s3 + $0x2c] sm:$0xf] %vm924_vm1, %v1184_v24  ;;  %v1038_v31 = vsel %vm947_vm2, %v1007_v26, 0.0  ;;  %v742_v32 = vadd.f32 %v1333_v20, %v622_v27  ;;  %v1334_v33 = vpop.f32.mrb[28].mxu1  ;;  %v1253_v34 = vpop.f32.mrb[29].mxu0 }
 0x130   :  { %v1039_v35 = vadd.f32 %v1038_v31, %v1037_v21  ;;  %v830_v36 = vsel %vm788_vm14, %v739_v23, %v809_v29  ;;  %v1254_v37 = vadd.f32 %v1253_v34, %v1252_v30  ;;  %v1335_v38 = vpop.f32.mrb[29].mxu1  ;;  %v1255_v39 = vpop.f32.mrb[30].mxu0 }
 0x131   :  { %v1185_v40 = vpack.c.bf16 %v830_v36, %v830_v36  ;;  %v971_v41 = vsel %vm947_vm2, %v830_v36, 0.0  ;;  %v1008_v42 = vmul.f32 %v830_v36, %v830_v36  ;;  %vm789_vm15 = vcmp.ge.f32.partialorder %v742_v32, 0.0  ;;  %v1337_v43 = vpop.f32.mrb[30].mxu1  ;;  %v1256_v44 = vpop.f32.mrb[31].mxu0 }
 0x132   :  { %v972_v45 = vadd.f32 %v971_v41, %v970_v28  ;;  %v810_v46 = vmul.f32 0.01, %v742_v32  ;;  %v627_v47 = vadd.f32 %v1254_v37, %v1704_v16  ;;  %v1336_v48 = vadd.f32 %v1335_v38, %v1334_v33  ;;  %v1338_v49 = vpop.f32.mrb[31].mxu1 }
 0x133   :  { %937 = vst.msk [vmem:[%s1859_s3 + $0x30] sm:$0xf] %vm924_vm1, %v1185_v40  ;;  %v1040_v50 = vsel %vm947_vm2, %v1008_v42, 0.0  ;;  %v1257_v51 = vadd.f32 %v1256_v44, %v1255_v39  ;;  %v1339_v52 = vadd.f32 %v1338_v49, %v1337_v43 }
 0x134   :  { %v1041_v53 = vadd.f32 %v1040_v50, %v1039_v35  ;;  %v831_v54 = vsel %vm789_vm15, %v742_v32, %v810_v46  ;;  %v747_v55 = vadd.f32 %v1336_v48, %v627_v47 }
 0x135   :  { %v1186_v56 = vpack.c.bf16 %v831_v54, %v831_v54  ;;  %v973_v57 = vsel %vm947_vm2, %v831_v54, 0.0  ;;  %v1009_v58 = vmul.f32 %v831_v54, %v831_v54  ;;  %v630_v59 = vadd.f32 %v1257_v51, %v1704_v16 }
 0x136   :  { %v974_v60 = vadd.f32 %v973_v57, %v972_v45  ;;  %vm790_vm0 = vcmp.ge.f32.partialorder %v747_v55, 0.0  ;;  %v811_v61 = vmul.f32 0.01, %v747_v55  ;;  %v1258_v62 = vpop.f32.mrb[32].mxu0 }
 0x137   :  { %938 = vst.msk [vmem:[%s1859_s3 + $0x34] sm:$0xf] %vm924_vm1, %v1186_v56  ;;  %v1042_v63 = vsel %vm947_vm2, %v1009_v58, 0.0  ;;  %v750_v0 = vadd.f32 %v1339_v52, %v630_v59  ;;  %v1340_v1 = vpop.f32.mrb[32].mxu1  ;;  %v1259_v2 = vpop.f32.mrb[33].mxu0 }
 0x138   :  { %v1043_v3 = vadd.f32 %v1042_v63, %v1041_v53  ;;  %v832_v4 = vsel %vm790_vm0, %v747_v55, %v811_v61  ;;  %v1260_v5 = vadd.f32 %v1259_v2, %v1258_v62  ;;  %v1341_v6 = vpop.f32.mrb[33].mxu1  ;;  %v1261_v7 = vpop.f32.mrb[34].mxu0 }
 0x139   :  { %v1187_v8 = vpack.c.bf16 %v832_v4, %v832_v4  ;;  %v975_v9 = vsel %vm947_vm2, %v832_v4, 0.0  ;;  %v1010_v10 = vmul.f32 %v832_v4, %v832_v4  ;;  %vm791_vm3 = vcmp.ge.f32.partialorder %v750_v0, 0.0  ;;  %v1343_v11 = vpop.f32.mrb[34].mxu1  ;;  %v1262_v12 = vpop.f32.mrb[35].mxu0 }
 0x13a   :  { %v976_v13 = vadd.f32 %v975_v9, %v974_v60  ;;  %v812_v14 = vmul.f32 0.01, %v750_v0  ;;  %v635_v15 = vadd.f32 %v1260_v5, %v1704_v16  ;;  %v1342_v17 = vadd.f32 %v1341_v6, %v1340_v1  ;;  %v1344_v18 = vpop.f32.mrb[35].mxu1 }
 0x13b   :  { %939 = vst.msk [vmem:[%s1859_s3 + $0x38] sm:$0xf] %vm924_vm1, %v1187_v8  ;;  %v1044_v19 = vsel %vm947_vm2, %v1010_v10, 0.0  ;;  %v1263_v20 = vadd.f32 %v1262_v12, %v1261_v7  ;;  %v1345_v21 = vadd.f32 %v1344_v18, %v1343_v11 }
 0x13c   :  { %v1045_v22 = vadd.f32 %v1044_v19, %v1043_v3  ;;  %v833_v23 = vsel %vm791_vm3, %v750_v0, %v812_v14  ;;  %v755_v24 = vadd.f32 %v1342_v17, %v635_v15 }
 0x13d   :  { %v1188_v25 = vpack.c.bf16 %v833_v23, %v833_v23  ;;  %v977_v26 = vsel %vm947_vm2, %v833_v23, 0.0  ;;  %v1011_v27 = vmul.f32 %v833_v23, %v833_v23  ;;  %v638_v28 = vadd.f32 %v1263_v20, %v1704_v16 }
 0x13e   :  { %v978_v29 = vadd.f32 %v977_v26, %v976_v13  ;;  %vm792_vm4 = vcmp.ge.f32.partialorder %v755_v24, 0.0  ;;  %v813_v30 = vmul.f32 0.01, %v755_v24  ;;  %v1264_v31 = vpop.f32.mrb[36].mxu0 }
 0x13f   :  { %940 = vst.msk [vmem:[%s1859_s3 + $0x3c] sm:$0xf] %vm924_vm1, %v1188_v25  ;;  %v1046_v32 = vsel %vm947_vm2, %v1011_v27, 0.0  ;;  %v758_v33 = vadd.f32 %v1345_v21, %v638_v28  ;;  %v1346_v34 = vpop.f32.mrb[36].mxu1  ;;  %v1265_v35 = vpop.f32.mrb[37].mxu0 }
 0x140   :  { %v1047_v36 = vadd.f32 %v1046_v32, %v1045_v22  ;;  %v834_v37 = vsel %vm792_vm4, %v755_v24, %v813_v30  ;;  %v1266_v38 = vadd.f32 %v1265_v35, %v1264_v31  ;;  %v1347_v39 = vpop.f32.mrb[37].mxu1  ;;  %v1267_v40 = vpop.f32.mrb[38].mxu0 }
 0x141   :  { %v1189_v41 = vpack.c.bf16 %v834_v37, %v834_v37  ;;  %v979_v42 = vsel %vm947_vm2, %v834_v37, 0.0  ;;  %v1012_v43 = vmul.f32 %v834_v37, %v834_v37  ;;  %vm793_vm5 = vcmp.ge.f32.partialorder %v758_v33, 0.0  ;;  %v1349_v44 = vpop.f32.mrb[38].mxu1  ;;  %v1268_v45 = vpop.f32.mrb[39].mxu0 }
 0x142   :  { %v980_v46 = vadd.f32 %v979_v42, %v978_v29  ;;  %v814_v47 = vmul.f32 0.01, %v758_v33  ;;  %v643_v48 = vadd.f32 %v1266_v38, %v1704_v16  ;;  %v1348_v49 = vadd.f32 %v1347_v39, %v1346_v34  ;;  %v1350_v50 = vpop.f32.mrb[39].mxu1 }
 0x143   :  { %941 = vst.msk [vmem:[%s1859_s3 + $0x40] sm:$0xf] %vm924_vm1, %v1189_v41  ;;  %v1048_v51 = vsel %vm947_vm2, %v1012_v43, 0.0  ;;  %v1269_v52 = vadd.f32 %v1268_v45, %v1267_v40  ;;  %v1351_v53 = vadd.f32 %v1350_v50, %v1349_v44 }
 0x144   :  { %v1049_v54 = vadd.f32 %v1048_v51, %v1047_v36  ;;  %v835_v55 = vsel %vm793_vm5, %v758_v33, %v814_v47  ;;  %v763_v56 = vadd.f32 %v1348_v49, %v643_v48 }
 0x145   :  { %v1190_v57 = vpack.c.bf16 %v835_v55, %v835_v55  ;;  %v981_v58 = vsel %vm947_vm2, %v835_v55, 0.0  ;;  %v1013_v59 = vmul.f32 %v835_v55, %v835_v55  ;;  %v646_v60 = vadd.f32 %v1269_v52, %v1704_v16 }
 0x146   :  { %v982_v61 = vadd.f32 %v981_v58, %v980_v46  ;;  %vm794_vm6 = vcmp.ge.f32.partialorder %v763_v56, 0.0  ;;  %v815_v62 = vmul.f32 0.01, %v763_v56  ;;  %v1270_v63 = vpop.f32.mrb[40].mxu0 }
 0x147   :  { %942 = vst.msk [vmem:[%s1859_s3 + $0x44] sm:$0xf] %vm924_vm1, %v1190_v57  ;;  %v1050_v0 = vsel %vm947_vm2, %v1013_v59, 0.0  ;;  %v766_v1 = vadd.f32 %v1351_v53, %v646_v60  ;;  %v1352_v2 = vpop.f32.mrb[40].mxu1  ;;  %v1271_v3 = vpop.f32.mrb[41].mxu0 }
 0x148   :  { %v1051_v4 = vadd.f32 %v1050_v0, %v1049_v54  ;;  %v836_v5 = vsel %vm794_vm6, %v763_v56, %v815_v62  ;;  %v1272_v6 = vadd.f32 %v1271_v3, %v1270_v63  ;;  %v1353_v7 = vpop.f32.mrb[41].mxu1  ;;  %v1273_v8 = vpop.f32.mrb[42].mxu0 }
 0x149   :  { %v1191_v9 = vpack.c.bf16 %v836_v5, %v836_v5  ;;  %v983_v10 = vsel %vm947_vm2, %v836_v5, 0.0  ;;  %v1014_v11 = vmul.f32 %v836_v5, %v836_v5  ;;  %vm795_vm7 = vcmp.ge.f32.partialorder %v766_v1, 0.0  ;;  %v1355_v12 = vpop.f32.mrb[42].mxu1  ;;  %v1274_v13 = vpop.f32.mrb[43].mxu0 }
 0x14a   :  { %v984_v14 = vadd.f32 %v983_v10, %v982_v61  ;;  %v816_v15 = vmul.f32 0.01, %v766_v1  ;;  %v651_v17 = vadd.f32 %v1272_v6, %v1704_v16  ;;  %v1354_v18 = vadd.f32 %v1353_v7, %v1352_v2  ;;  %v1356_v19 = vpop.f32.mrb[43].mxu1 }
 0x14b   :  { %943 = vst.msk [vmem:[%s1859_s3 + $0x48] sm:$0xf] %vm924_vm1, %v1191_v9  ;;  %v1052_v20 = vsel %vm947_vm2, %v1014_v11, 0.0 }
 0x14c   :  { %v1053_v21 = vadd.f32 %v1052_v20, %v1051_v4  ;;  %v837_v22 = vsel %vm795_vm7, %v766_v1, %v816_v15  ;;  %v771_v23 = vadd.f32 %v1354_v18, %v651_v17 }
 0x14d   :  { %v1192_v24 = vpack.c.bf16 %v837_v22, %v837_v22  ;;  %v985_v25 = vsel %vm947_vm2, %v837_v22, 0.0  ;;  %v1015_v26 = vmul.f32 %v837_v22, %v837_v22 }
 0x14e   :  { %v986_v27 = vadd.f32 %v985_v25, %v984_v14  ;;  %vm796_vm8 = vcmp.ge.f32.partialorder %v771_v23, 0.0  ;;  %v817_v28 = vmul.f32 0.01, %v771_v23 }
 0x14f   :  { %944 = vst.msk [vmem:[%s1859_s3 + $0x4c] sm:$0xf] %vm924_vm1, %v1192_v24  ;;  %v1054_v16 = vsel %vm947_vm2, %v1015_v26, 0.0  ;;  %vm1064_vm1 = vcmask 1040384  }
 0x150   :  { %v1055_v29 = vadd.f32 %v1054_v16, %v1053_v21  ;;  %v838_v30 = vsel %vm796_vm8, %v771_v23, %v817_v28 }
 0x151   :  { %v1193_v31 = vpack.c.bf16 %v838_v30, %v838_v30  ;;  %v988_v32 = vsel %vm987_vm9, %v838_v30, 0.0  ;;  %v1016_v33 = vmul.f32 %v838_v30, %v838_v30 }
 0x152   :  { %v989_v34 = vadd.f32 %v988_v32, %v986_v27 }
 0x153   :  { %946 = vst.msk [vmem:[%s1859_s3 + $0x50] sm:$0x1] %vm945_vm10, %v1193_v31  ;;  %v1056_v35 = vsel %vm987_vm9, %v1016_v33, 0.0 }
 0x154   :  { %v990_v36 = vrot.slane %v989_v34, 4  ;;  %v1057_v37 = vadd.f32 %v1056_v35, %v1055_v29 }
 0x156   :  { %v991_v38 = vadd.f32 %v990_v36, %v989_v34  ;;  %v1058_v39 = vrot.slane %v1057_v37, 4 }
 0x158   :  { %v992_v40 = vrot.slane %v991_v38, 2  ;;  %v1059_v41 = vadd.f32 %v1058_v39, %v1057_v37 }
 0x15a   :  { %v993_v42 = vadd.f32 %v992_v40, %v991_v38  ;;  %v1060_v43 = vrot.slane %v1059_v41, 2 }
 0x15c   :  { %v994_v44 = vrot.slane %v993_v42, 1  ;;  %v1061_v45 = vadd.f32 %v1060_v43, %v1059_v41 }
 0x15e   :  { %v1062_v46 = vrot.slane %v1061_v45, 1  ;;  %v995_v47 = vadd.f32 %v994_v44, %v993_v42 }
 0x160   :  { %v1063_v48 = vadd.f32 %v1062_v46, %v1061_v45 }
 0x162   :  { %v1065_v49 = vsel %vm1064_vm1, %v995_v47, %v1063_v48 }
 0x163   :  { %1066 = vst.msk [vmem:[%s1860_s4] sm:$0x3] %vm987_vm9, %v1065_v49 }

// kernel: tile.43
= control target key start
LH: loop header
LB: loop body
LE: loop exit
PB: predicated region body
PF: predicated region fallthrough
CT: control target
= control target key end

     0   :  { %s28_s0 = inlined_call_operand.vmem [shape: f32[64], index: 0, kind: input, shape index: {}]   ;;  %s29_s1 = inlined_call_operand.vmem [shape: f32[9,64], index: 1, kind: output, shape index: {}]  }
   0x1   :  { %v4_v0 = vld [vmem:[%s28_s0] ss:$0 sm:$0xff] }
   0x2   :  { %5 = vst [vmem:[%s29_s1] sm:$0xff] %v4_v0  ;;  %8 = vst [vmem:[%s29_s1 + $0x8] sm:$0xff] %v4_v0 }

// kernel: mul.37
= control target key start
LH: loop header
LB: loop body
LE: loop exit
PB: predicated region body
PF: predicated region fallthrough
CT: control target
= control target key end

     0   :  { %vm3_vm0 = vcmask 523264   ;;  %s13_s11 = smov 64   ;;  %vm9_vm1 = vcmask 1048064   ;;  %s36_s0 = inlined_call_operand.vmem [shape: f32[9,64], index: 0, kind: input, shape index: {}]   ;;  %s37_s1 = inlined_call_operand.vmem [shape: f32[576], index: 1, kind: output, shape index: {}]  }
   0x1   :  { %v2_v0 = vld [vmem:[%s36_s0] ss:$2 sm:$0x1f]   ;;  %v11_v1 = vld [vmem:[%s36_s0 + $0x1] ss:$2 sm:$0xf]  }
   0x2   :  { %4 = vst.msk [vmem:[%s37_s1] sm:$0x1f] %vm3_vm0, %v2_v0   ;;  %7 = vrot.lane.b32.xlu0 %v11_v1, %s13_s11 }
  0x74   :  { %v8_v2 = vpop.permute.xlu0 %7  }
  0x75   :  { %10 = vst.msk [vmem:[%s37_s1] sm:$0xf] %vm9_vm1, %v8_v2  }

// kernel: tile.53
= control target key start
LH: loop header
LB: loop body
LE: loop exit
PB: predicated region body
PF: predicated region fallthrough
CT: control target
= control target key end

     0   :  { %s58_s0 = inlined_call_operand.vmem [shape: f32[64], index: 0, kind: input, shape index: {}]   ;;  %s59_s1 = inlined_call_operand.vmem [shape: f32[49,64], index: 1, kind: output, shape index: {}]  }
   0x1   :  { %v4_v0 = vld [vmem:[%s58_s0] ss:$0 sm:$0xff] }
   0x2   :  { %5 = vst [vmem:[%s59_s1] sm:$0xff] %v4_v0  ;;  %18 = vst [vmem:[%s59_s1 + $0x8] sm:$0xff] %v4_v0 }
   0x3   :  { %19 = vst [vmem:[%s59_s1 + $0x10] sm:$0xff] %v4_v0  ;;  %20 = vst [vmem:[%s59_s1 + $0x18] sm:$0xff] %v4_v0 }
   0x4   :  { %21 = vst [vmem:[%s59_s1 + $0x20] sm:$0xff] %v4_v0  ;;  %22 = vst [vmem:[%s59_s1 + $0x28] sm:$0xff] %v4_v0 }
   0x5   :  { %23 = vst [vmem:[%s59_s1 + $0x30] sm:$0xff] %v4_v0 }

// kernel: mul.43
= control target key start
LH: loop header
LB: loop body
LE: loop exit
PB: predicated region body
PF: predicated region fallthrough
CT: control target
= control target key end

     0   :  { %vm3_vm0 = vcmask 523264   ;;  %s52_s10 = smov 64   ;;  %vm24_vm1 = vcmask 1048064   ;;  %s105_s0 = inlined_call_operand.vmem [shape: f32[49,64], index: 0, kind: input, shape index: {}]   ;;  %s106_s1 = inlined_call_operand.vmem [shape: f32[3136], index: 1, kind: output, shape index: {}]  }
   0x1   :  { %v46_v0 = vld [vmem:[%s105_s0 + $0x1] ss:$2 sm:$0xff]   ;;  %v2_v2 = vld [vmem:[%s105_s0] ss:$2 sm:$0xff]   ;;  %v47_v4 = vld [vmem:[%s105_s0 + $0x11] ss:$2 sm:$0xff]  }
   0x2   :  { %v49_v1 = vld [vmem:[%s105_s0 + $0x21] ss:$2 sm:$0xff]   ;;  %22 = vrot.lane.b32.xlu0 %v46_v0, %s52_s10  ;;  %v42_v3 = vld [vmem:[%s105_s0 + $0x20] ss:$2 sm:$0xff]   ;;  %4 = vst.msk [vmem:[%s106_s1] sm:$0xff] %vm3_vm0, %v2_v2  }
   0x3   :  { %35 = vrot.lane.b32.xlu1 %v49_v1, %s52_s10  ;;  %43 = vst.msk [vmem:[%s106_s1 + $0x10] sm:$0xff] %vm3_vm0, %v42_v3   ;;  %v44_v5 = vld [vmem:[%s105_s0 + $0x30] sm:$0x1]  }
   0x4   :  { %v40_v6 = vld [vmem:[%s105_s0 + $0x10] ss:$2 sm:$0xff]   ;;  %45 = vst.msk [vmem:[%s106_s1 + $0x18] sm:$0x1] %vm3_vm0, %v44_v5  }
   0x5   :  { %41 = vst.msk [vmem:[%s106_s1 + $0x8] sm:$0xff] %vm3_vm0, %v40_v6  }
   0x6   :  { %28 = vrot.lane.b32.xlu0 %v47_v4, %s52_s10 }
  0x74   :  { %v23_v7 = vpop.permute.xlu0 %22  }
  0x75   :  { %v36_v8 = vpop.permute.xlu1 %35   ;;  %25 = vst.msk [vmem:[%s106_s1] sm:$0xff] %vm24_vm1, %v23_v7  }
  0x76   :  { %50 = vst.msk [vmem:[%s106_s1 + $0x10] sm:$0xff] %vm24_vm1, %v36_v8  }
  0x78   :  { %v29_v9 = vpop.permute.xlu0 %28  }
  0x79   :  { %48 = vst.msk [vmem:[%s106_s1 + $0x8] sm:$0xff] %vm24_vm1, %v29_v9  }

// kernel: base_network_forward.6
= control target key start
LH: loop header
LB: loop body
LE: loop exit
PB: predicated region body
PF: predicated region fallthrough
CT: control target
= control target key end

     0   :  { %v1359_v34 = vmov 0.0   ;;  %vm1360_vm0 = vmmov 0   ;;  %vm518_vm1 = vcmask 523264   ;;  %vm896_vm4 = vcmask 519168   ;;  %s1779_s1 = inlined_call_operand.vmem [shape: bf16[576,64], index: 1, kind: input, shape index: {}]   ;;  %s1780_s0 = inlined_call_operand.vmem [shape: bf16[98,576], index: 0, kind: input, shape index: {}]   ;;  %s1781_s2 = inlined_call_operand.vmem [shape: f32[1,64], index: 2, kind: input, shape index: {}]   ;;  %s1782_s3 = inlined_call_operand.vmem [shape: bf16[98,64], index: 3, kind: output, shape index: {0}]   ;;  %s1783_s4 = inlined_call_operand.vmem [shape: f32[1,2,64], index: 4, kind: output, shape index: {1}]  }
   0x1   :  { %v1276_v0 = vld [vmem:[%s1779_s1 + $0x40] sm:$0xff]   ;;  %v1280_v4 = vld [vmem:[%s1779_s1 + $0x48] sm:$0xff]   ;;  %v1284_v8 = vld [vmem:[%s1779_s1 + $0x50] sm:$0xff]   ;;  %vm909_vm14 = vcmask 516096  }
   0x2   :  { %v1277_v1 = vld [vmem:[%s1779_s1 + $0xc0] sm:$0xff]   ;;  %1103 = vmatprep.subr.bf16.mxu0 %v1276_v0  ;;  %v1281_v5 = vld [vmem:[%s1779_s1 + $0xc8] sm:$0xff]   ;;  %v1285_v9 = vld [vmem:[%s1779_s1 + $0xd0] sm:$0xff]  }
   0x3   :  { %v1278_v2 = vld [vmem:[%s1779_s1] sm:$0xff]   ;;  %1161 = vmatprep.subr.bf16.mxu1 %v1277_v1  ;;  %v1282_v6 = vld [vmem:[%s1779_s1 + $0x8] sm:$0xff]   ;;  %v1286_v10 = vld [vmem:[%s1779_s1 + $0x10] sm:$0xff]  }
   0x4   :  { %v1279_v3 = vld [vmem:[%s1779_s1 + $0x80] sm:$0xff]   ;;  %1104 = vmatpush3.bf16.msra.mxu0 %v1278_v2  ;;  %v1283_v7 = vld [vmem:[%s1779_s1 + $0x88] sm:$0xff]   ;;  %v1287_v11 = vld [vmem:[%s1779_s1 + $0x90] sm:$0xff]  }
   0x5   :  { %1162 = vmatpush3.bf16.msra.mxu1 %v1279_v3  ;;  %1105 = vmatprep.subr.bf16.mxu0 %v1280_v4  ;;  %v1288_v12 = vld [vmem:[%s1779_s1 + $0x58] sm:$0xff]   ;;  %v1292_v16 = vld [vmem:[%s1779_s1 + $0x60] sm:$0xff]   ;;  %v1296_v20 = vld [vmem:[%s1779_s1 + $0x68] sm:$0xff]  }
   0x6   :  { %1163 = vmatprep.subr.bf16.mxu1 %v1281_v5  ;;  %v1289_v13 = vld [vmem:[%s1779_s1 + $0xd8] sm:$0xff]   ;;  %v1293_v17 = vld [vmem:[%s1779_s1 + $0xe0] sm:$0xff]   ;;  %v1297_v21 = vld [vmem:[%s1779_s1 + $0xe8] sm:$0xff]  }
   0x7   :  { %v1290_v14 = vld [vmem:[%s1779_s1 + $0x18] sm:$0xff]   ;;  %v1294_v18 = vld [vmem:[%s1779_s1 + $0x20] sm:$0xff]   ;;  %v1298_v22 = vld [vmem:[%s1779_s1 + $0x28] sm:$0xff]  }
   0x8   :  { %1106 = vmatpush3.bf16.msra.mxu0 %v1282_v6  ;;  %v1291_v15 = vld [vmem:[%s1779_s1 + $0x98] sm:$0xff]   ;;  %v1295_v19 = vld [vmem:[%s1779_s1 + $0xa0] sm:$0xff]   ;;  %v1299_v23 = vld [vmem:[%s1779_s1 + $0xa8] sm:$0xff]  }
   0x9   :  { %1164 = vmatpush3.bf16.msra.mxu1 %v1283_v7  ;;  %1107 = vmatprep.subr.bf16.mxu0 %v1284_v8  ;;  %v1300_v24 = vld [vmem:[%s1779_s1 + $0x70] sm:$0xff]   ;;  %v1304_v28 = vld [vmem:[%s1779_s1 + $0x78] sm:$0xff]   ;;  %v1313_v36 = vld [vmem:[%s1780_s0 + $0xc] ss:$20 sps:$4 sm:$0xff]  }
   0xa   :  { %1165 = vmatprep.subr.bf16.mxu1 %v1285_v9  ;;  %v1301_v25 = vld [vmem:[%s1779_s1 + $0xf0] sm:$0xff]   ;;  %v1305_v29 = vld [vmem:[%s1779_s1 + $0xf8] sm:$0xff]   ;;  %v1314_v37 = vld [vmem:[%s1779_s1 + $0x100] sm:$0xff]   ;;  %660 = vmatprep.mubr.bf16.mxu1 %v1313_v36 }
   0xb   :  { %v1302_v26 = vld [vmem:[%s1779_s1 + $0x30] sm:$0xff]   ;;  %v1306_v30 = vld [vmem:[%s1779_s1 + $0x38] sm:$0xff]   ;;  %v1315_v38 = vld [vmem:[%s1780_s0 + $0x2c] ss:$20 sps:$4 sm:$0xff]  }
   0xc   :  { %1108 = vmatpush3.bf16.msra.mxu0 %v1286_v10  ;;  %v1303_v27 = vld [vmem:[%s1779_s1 + $0xb0] sm:$0xff]   ;;  %v1307_v31 = vld [vmem:[%s1779_s1 + $0xb8] sm:$0xff]   ;;  %v1325_v43 = vld [vmem:[%s1779_s1 + $0x108] sm:$0xff]  }
   0xd   :  { %1166 = vmatpush3.bf16.msra.mxu1 %v1287_v11  ;;  %1109 = vmatprep.subr.bf16.mxu0 %v1288_v12  ;;  %v1308_v32 = vld [vmem:[%s1780_s0] ss:$20 sps:$4 sm:$0xff]   ;;  %v1310_v33 = vld [vmem:[%s1780_s0 + $0x4] ss:$20 sps:$4 sm:$0xff]   ;;  %v1311_v35 = vld [vmem:[%s1780_s0 + $0x8] ss:$20 sps:$4 sm:$0xff]  }
   0xe   :  { %1167 = vmatprep.subr.bf16.mxu1 %v1289_v13  ;;  %572 = vmatprep.mubr.bf16.mxu0 %v1310_v33  ;;  %v1317_v39 = vld [vmem:[%s1780_s0 + $0x34] ss:$20 sps:$4 sm:$0xff]   ;;  %v1320_v41 = vld [vmem:[%s1780_s0 + $0x30] ss:$20 sps:$4 sm:$0xff]   ;;  %v1327_v47 = vld [vmem:[%s1780_s0 + $0x58] ss:$20 sps:$4 sm:$0xff]  }
   0xf   :  { %v1319_v40 = vld [vmem:[%s1780_s0 + $0x28] ss:$20 sps:$4 sm:$0xff]   ;;  %v1334_v45 = vld [vmem:[%s1779_s1 + $0x110] sm:$0xff]   ;;  %v1330_v49 = vld [vmem:[%s1780_s0 + $0x84] ss:$20 sps:$4 sm:$0xff]  }
  0x10   :  { %1110 = vmatpush3.bf16.msra.mxu0 %v1290_v14  ;;  %v1321_v42 = vld [vmem:[%s1780_s0 + $0x54] ss:$20 sps:$4 sm:$0xff]   ;;  %v1323_v44 = vld [vmem:[%s1780_s0 + $0x5c] ss:$20 sps:$4 sm:$0xff]   ;;  %v1332_v51 = vld [vmem:[%s1780_s0 + $0x78] ss:$20 sps:$4 sm:$0xff]  }
  0x11   :  { %1168 = vmatpush3.bf16.msra.mxu1 %v1291_v15  ;;  %1111 = vmatprep.subr.bf16.mxu0 %v1292_v16  ;;  %v1326_v46 = vld [vmem:[%s1780_s0 + $0x50] ss:$20 sps:$4 sm:$0xff]   ;;  %v1347_v50 = vld [vmem:[%s1779_s1 + $0x118] sm:$0xff]   ;;  %v1333_v52 = vld [vmem:[%s1780_s0 + $0x80] ss:$20 sps:$4 sm:$0xff]  }
  0x12   :  { %1169 = vmatprep.subr.bf16.mxu1 %v1293_v17  ;;  %v1328_v48 = vld [vmem:[%s1780_s0 + $0x7c] ss:$20 sps:$4 sm:$0xff]   ;;  %v1335_v53 = vld [vmem:[%s1780_s0 + $0xa4] ss:$20 sps:$4 sm:$0xff]   ;;  %v1337_v54 = vld [vmem:[%s1780_s0 + $0xac] ss:$20 sps:$4 sm:$0xff]  }
  0x13   :  { %v1339_v55 = vld [vmem:[%s1780_s0 + $0xa0] ss:$20 sps:$4 sm:$0xff]   ;;  %v1340_v56 = vld [vmem:[%s1780_s0 + $0xa8] ss:$20 sps:$4 sm:$0xff]   ;;  %v1346_v62 = vld [vmem:[%s1780_s0 + $0xd0] ss:$20 sps:$4 sm:$0xff]  }
  0x14   :  { %1112 = vmatpush3.bf16.msra.mxu0 %v1294_v18  ;;  %v1341_v57 = vld [vmem:[%s1780_s0 + $0xcc] ss:$20 sps:$4 sm:$0xff]   ;;  %v1343_v58 = vld [vmem:[%s1780_s0 + $0xd4] ss:$20 sps:$4 sm:$0xff]   ;;  %v54_v60 = vld [vmem:[%s1780_s0 + $0xf8] sm:$0x11] }
  0x15   :  { %1170 = vmatpush3.bf16.msra.mxu1 %v1295_v19  ;;  %1113 = vmatprep.subr.bf16.mxu0 %v1296_v20  ;;  %v53_v59 = vld [vmem:[%s1780_s0 + $0xf0] sm:$0x11]  ;;  %v1345_v61 = vld [vmem:[%s1780_s0 + $0xc8] ss:$20 sps:$4 sm:$0xff]   ;;  %v1032_v0 = vcombine.high %v54_v60, %v54_v60  ;;  %v1031_v2 = vcombine.low %v54_v60, %v54_v60  ;;  %v1354_v5 = vld [vmem:[%s1780_s0 + $0x38] ss:$20 sps:$4 sm:$0xff]  }
  0x16   :  { %1171 = vmatprep.subr.bf16.mxu1 %v1297_v21  ;;  %v1030_v63 = vcombine.high %v53_v59, %v53_v59  ;;  %v1029_v1 = vcombine.low %v53_v59, %v53_v59  ;;  %v1352_v3 = vld [vmem:[%s1780_s0 + $0x10] ss:$20 sps:$4 sm:$0xff]   ;;  %v1355_v6 = vld [vmem:[%s1780_s0 + $0xd8] ss:$20 sps:$4 sm:$0xff]   ;;  %v1356_v7 = vld [vmem:[%s1780_s0 + $0x60] ss:$20 sps:$4 sm:$0xff]  }
  0x17   :  { %v1353_v4 = vld [vmem:[%s1780_s0 + $0xb0] ss:$20 sps:$4 sm:$0xff]   ;;  %v1357_v8 = vld [vmem:[%s1780_s0 + $0x100] ss:$0 sps:$4 sm:$0x11]  }
  0x18   :  { %1114 = vmatpush3.bf16.msra.mxu0 %v1298_v22  ;;  %v1358_v9 = vld [vmem:[%s1780_s0 + $0x88] ss:$20 sps:$4 sm:$0xff]   ;;  %v1625_v11 = vld [vmem:[%s1781_s2] ss:$0 sm:$0xff] }
  0x19   :  { %1172 = vmatpush3.bf16.msra.mxu1 %v1299_v23  ;;  %1115 = vmatprep.subr.bf16.mxu0 %v1300_v24 }
  0x1a   :  { %1173 = vmatprep.subr.bf16.mxu1 %v1301_v25 }
  0x1c   :  { %1116 = vmatpush3.bf16.msra.mxu0 %v1302_v26 }
  0x1d   :  { %1174 = vmatpush3.bf16.msra.mxu1 %v1303_v27  ;;  %1117 = vmatprep.subr.bf16.mxu0 %v1304_v28 }
  0x1e   :  { %1175 = vmatprep.subr.bf16.mxu1 %v1305_v29 }
  0x20   :  { %1118 = vmatpush3.bf16.msra.mxu0 %v1306_v30 }
  0x21   :  { %1176 = vmatpush3.bf16.msra.mxu1 %v1307_v31  ;;  %1230 = vmatprep.subr.bf16.mxu0 %v1359_v34 }
  0x22   :  { %1266 = vmatprep.subr.bf16.mxu1 %v1359_v34 }
  0x23   :  { %573 = vmatmul.mubr.bf16.vlgmr.msra.gmra.mrb[0].mxu0 %v1308_v32 }
  0x24   :  { %661 = vmatmul.mubr.bf16.vlgmr.msra.gmra.mrb[0].mxu1 %v1311_v35  ;;  %1231 = vmatpush3.bf16.msra.mxu0 %v1314_v37 }
  0x25   :  { %580 = vmatprep.mubr.bf16.mxu0 %v1315_v38  ;;  %1232 = vmatprep.subr.bf16.mxu0 %v1359_v34 }
  0x26   :  { %668 = vmatprep.mubr.bf16.mxu1 %v1317_v39  ;;  %1270 = vmatpush3.bf16.msra.mxu1 %v1314_v37 }
  0x27   :  { %1267 = vmatprep.subr.bf16.mxu1 %v1359_v34 }
  0x28   :  { %1233 = vmatpush3.bf16.msra.mxu0 %v1325_v43 }
  0x29   :  { %1234 = vmatprep.subr.bf16.mxu0 %v1359_v34 }
  0x2a   :  { %1271 = vmatpush3.bf16.msra.mxu1 %v1325_v43 }
  0x2b   :  { %581 = vmatmul.mubr.bf16.gmra.mrb[4].mxu0 %v1319_v40  ;;  %1268 = vmatprep.subr.bf16.mxu1 %v1359_v34 }
  0x2c   :  { %669 = vmatmul.mubr.bf16.gmra.mrb[4].mxu1 %v1320_v41  ;;  %588 = vmatprep.mubr.bf16.mxu0 %v1321_v42 }
  0x2d   :  { %676 = vmatprep.mubr.bf16.mxu1 %v1323_v44  ;;  %1235 = vmatpush3.bf16.msra.mxu0 %v1334_v45 }
  0x2e   :  { %1272 = vmatpush3.bf16.msra.mxu1 %v1334_v45  ;;  %1236 = vmatprep.subr.bf16.mxu0 %v1359_v34 }
  0x2f   :  { %1269 = vmatprep.subr.bf16.mxu1 %v1359_v34 }
  0x31   :  { %1237 = vmatpush3.bf16.msra.mxu0 %v1347_v50 }
  0x32   :  { %1273 = vmatpush3.bf16.msra.mxu1 %v1347_v50 }
  0x33   :  { %589 = vmatmul.mubr.bf16.gmra.mrb[8].mxu0 %v1326_v46 }
  0x34   :  { %677 = vmatmul.mubr.bf16.gmra.mrb[8].mxu1 %v1327_v47  ;;  %596 = vmatprep.mubr.bf16.mxu0 %v1328_v48 }
  0x35   :  { %684 = vmatprep.mubr.bf16.mxu1 %v1330_v49 }
  0x3b   :  { %597 = vmatmul.mubr.bf16.gmra.mrb[12].mxu0 %v1332_v51 }
  0x3c   :  { %685 = vmatmul.mubr.bf16.gmra.mrb[12].mxu1 %v1333_v52  ;;  %604 = vmatprep.mubr.bf16.mxu0 %v1335_v53 }
  0x3d   :  { %692 = vmatprep.mubr.bf16.mxu1 %v1337_v54 }
  0x43   :  { %605 = vmatmul.mubr.bf16.gmra.mrb[16].mxu0 %v1339_v55 }
  0x44   :  { %693 = vmatmul.mubr.bf16.gmra.mrb[16].mxu1 %v1340_v56  ;;  %612 = vmatprep.mubr.bf16.mxu0 %v1341_v57 }
  0x45   :  { %700 = vmatprep.mubr.bf16.mxu1 %v1343_v58 }
  0x4b   :  { %613 = vmatmul.mubr.bf16.gmra.mrb[20].mxu0 %v1345_v61 }
  0x4c   :  { %701 = vmatmul.mubr.bf16.gmra.mrb[20].mxu1 %v1346_v62  ;;  %620 = vmatprep.mubr.bf16.mxu0 %v1030_v63 }
  0x4d   :  { %708 = vmatprep.mubr.bf16.mxu1 %v1032_v0 }
  0x53   :  { %621 = vmatmul.mubr.bf16.gmra.mrb[24].mxu0 %v1029_v1 }
  0x54   :  { %709 = vmatmul.mubr.bf16.gmra.mrb[24].mxu1 %v1031_v2  ;;  %1238 = vmatprep.mubr.msk.bf16.mxu0 %vm1360_vm0, %v1359_v34 }
  0x55   :  { %1254 = vmatprep.mubr.msk.bf16.mxu1 %vm1360_vm0, %v1359_v34 }
  0x5b   :  { %1239 = vmatmul.mubr.msk.bf16.vlgmr.msra.gmra.mrb[28].mxu0 %vm518_vm1, %v1352_v3 }
  0x5c   :  { %1255 = vmatmul.mubr.msk.bf16.vlgmr.msra.gmra.mrb[28].mxu1 %vm518_vm1, %v1353_v4  ;;  %1242 = vmatprep.mubr.msk.bf16.mxu0 %vm1360_vm0, %v1359_v34 }
  0x5d   :  { %1258 = vmatprep.mubr.msk.bf16.mxu1 %vm1360_vm0, %v1359_v34 }
  0x63   :  { %1243 = vmatmul.mubr.msk.bf16.gmra.mrb[32].mxu0 %vm518_vm1, %v1354_v5 }
  0x64   :  { %1259 = vmatmul.mubr.msk.bf16.gmra.mrb[32].mxu1 %vm518_vm1, %v1355_v6  ;;  %1246 = vmatprep.mubr.msk.bf16.mxu0 %vm1360_vm0, %v1359_v34 }
  0x65   :  { %1262 = vmatprep.mubr.msk.bf16.mxu1 %vm1360_vm0, %v1359_v34 }
  0x6b   :  { %1247 = vmatmul.mubr.msk.bf16.gmra.mrb[36].mxu0 %vm518_vm1, %v1356_v7 }
  0x6c   :  { %1263 = vmatmul.mubr.msk.bf16.gmra.mrb[36].mxu1 %vm518_vm1, %v1357_v8  ;;  %1250 = vmatprep.mubr.msk.bf16.mxu0 %vm1360_vm0, %v1359_v34 }
  0x73   :  { %1251 = vmatmul.mubr.msk.bf16.gmra.mrb[40].mxu0 %vm518_vm1, %v1358_v9 }
  0xf6   :  { %v1119_v10 = vpop.f32.mrb[0].mxu0 }
  0xf7   :  { %v1120_v12 = vpop.f32.mrb[1].mxu0  ;;  %v1177_v13 = vpop.f32.mrb[0].mxu1 }
  0xf8   :  { %v1121_v14 = vadd.f32 %v1120_v12, %v1119_v10  ;;  %v1122_v15 = vpop.f32.mrb[2].mxu0  ;;  %v1178_v16 = vpop.f32.mrb[1].mxu1 }
  0xf9   :  { %v1123_v17 = vpop.f32.mrb[3].mxu0  ;;  %v1179_v18 = vadd.f32 %v1178_v16, %v1177_v13  ;;  %v1180_v19 = vpop.f32.mrb[2].mxu1 }
  0xfa   :  { %v575_v20 = vadd.f32 %v1121_v14, %v1625_v11  ;;  %v1124_v21 = vadd.f32 %v1123_v17, %v1122_v15  ;;  %v1181_v22 = vpop.f32.mrb[3].mxu1 }
  0xfb   :  { %v1182_v23 = vadd.f32 %v1181_v22, %v1180_v19 }
  0xfc   :  { %v578_v24 = vadd.f32 %v1124_v21, %v1625_v11  ;;  %v1629_v25 = vadd.f32 %v1179_v18, %v575_v20 }
  0xfe   :  { %v1125_v26 = vpop.f32.mrb[4].mxu0  ;;  %v1631_v27 = vadd.f32 %v1182_v23, %v578_v24 }
  0xff   :  { %v1126_v28 = vpop.f32.mrb[5].mxu0  ;;  %v1183_v29 = vpop.f32.mrb[4].mxu1 }
 0x100   :  { %v1127_v30 = vadd.f32 %v1126_v28, %v1125_v26  ;;  %v1128_v31 = vpop.f32.mrb[6].mxu0  ;;  %v1184_v32 = vpop.f32.mrb[5].mxu1 }
 0x101   :  { %v1129_v33 = vpop.f32.mrb[7].mxu0  ;;  %v1185_v34 = vadd.f32 %v1184_v32, %v1183_v29  ;;  %v1186_v35 = vpop.f32.mrb[6].mxu1 }
 0x102   :  { %v583_v36 = vadd.f32 %v1127_v30, %v1625_v11  ;;  %v1130_v37 = vadd.f32 %v1129_v33, %v1128_v31  ;;  %v1187_v38 = vpop.f32.mrb[7].mxu1 }
 0x103   :  { %v1188_v39 = vadd.f32 %v1187_v38, %v1186_v35 }
 0x104   :  { %v586_v40 = vadd.f32 %v1130_v37, %v1625_v11  ;;  %v1635_v41 = vadd.f32 %v1185_v34, %v583_v36 }
 0x106   :  { %v1131_v42 = vpop.f32.mrb[8].mxu0  ;;  %v1637_v43 = vadd.f32 %v1188_v39, %v586_v40 }
 0x107   :  { %v1132_v44 = vpop.f32.mrb[9].mxu0  ;;  %v1189_v45 = vpop.f32.mrb[8].mxu1 }
 0x108   :  { %v1133_v46 = vadd.f32 %v1132_v44, %v1131_v42  ;;  %v1134_v47 = vpop.f32.mrb[10].mxu0  ;;  %v1190_v48 = vpop.f32.mrb[9].mxu1 }
 0x109   :  { %v1135_v49 = vpop.f32.mrb[11].mxu0  ;;  %v1191_v50 = vadd.f32 %v1190_v48, %v1189_v45  ;;  %v1192_v51 = vpop.f32.mrb[10].mxu1 }
 0x10a   :  { %v591_v52 = vadd.f32 %v1133_v46, %v1625_v11  ;;  %v1136_v53 = vadd.f32 %v1135_v49, %v1134_v47  ;;  %v1193_v54 = vpop.f32.mrb[11].mxu1 }
 0x10b   :  { %v1194_v55 = vadd.f32 %v1193_v54, %v1192_v51 }
 0x10c   :  { %v594_v56 = vadd.f32 %v1136_v53, %v1625_v11  ;;  %v1641_v57 = vadd.f32 %v1191_v50, %v591_v52 }
 0x10e   :  { %v1137_v58 = vpop.f32.mrb[12].mxu0  ;;  %v1643_v59 = vadd.f32 %v1194_v55, %v594_v56 }
 0x10f   :  { %v1138_v60 = vpop.f32.mrb[13].mxu0  ;;  %v1195_v61 = vpop.f32.mrb[12].mxu1 }
 0x110   :  { %v1139_v62 = vadd.f32 %v1138_v60, %v1137_v58  ;;  %v1140_v63 = vpop.f32.mrb[14].mxu0  ;;  %v1196_v0 = vpop.f32.mrb[13].mxu1 }
 0x111   :  { %v1141_v1 = vpop.f32.mrb[15].mxu0  ;;  %v1197_v2 = vadd.f32 %v1196_v0, %v1195_v61  ;;  %v1198_v3 = vpop.f32.mrb[14].mxu1 }
 0x112   :  { %v599_v4 = vadd.f32 %v1139_v62, %v1625_v11  ;;  %v1142_v5 = vadd.f32 %v1141_v1, %v1140_v63  ;;  %v1199_v6 = vpop.f32.mrb[15].mxu1 }
 0x113   :  { %v1200_v7 = vadd.f32 %v1199_v6, %v1198_v3 }
 0x114   :  { %v602_v8 = vadd.f32 %v1142_v5, %v1625_v11  ;;  %v1647_v9 = vadd.f32 %v1197_v2, %v599_v4 }
 0x116   :  { %v1143_v10 = vpop.f32.mrb[16].mxu0  ;;  %v1649_v12 = vadd.f32 %v1200_v7, %v602_v8 }
 0x117   :  { %v1144_v13 = vpop.f32.mrb[17].mxu0  ;;  %v1201_v14 = vpop.f32.mrb[16].mxu1 }
 0x118   :  { %v1145_v15 = vadd.f32 %v1144_v13, %v1143_v10  ;;  %v1146_v16 = vpop.f32.mrb[18].mxu0  ;;  %v1202_v17 = vpop.f32.mrb[17].mxu1 }
 0x119   :  { %v1147_v18 = vpop.f32.mrb[19].mxu0  ;;  %v1203_v19 = vadd.f32 %v1202_v17, %v1201_v14  ;;  %v1204_v20 = vpop.f32.mrb[18].mxu1 }
 0x11a   :  { %v607_v21 = vadd.f32 %v1145_v15, %v1625_v11  ;;  %v1148_v22 = vadd.f32 %v1147_v18, %v1146_v16  ;;  %v1205_v23 = vpop.f32.mrb[19].mxu1 }
 0x11b   :  { %v1206_v24 = vadd.f32 %v1205_v23, %v1204_v20 }
 0x11c   :  { %v610_v26 = vadd.f32 %v1148_v22, %v1625_v11  ;;  %v695_v28 = vadd.f32 %v1203_v19, %v607_v21 }
 0x11e   :  { %v1149_v29 = vpop.f32.mrb[20].mxu0  ;;  %v698_v30 = vadd.f32 %v1206_v24, %v610_v26 }
 0x11f   :  { %v1150_v31 = vpop.f32.mrb[21].mxu0  ;;  %v1207_v32 = vpop.f32.mrb[20].mxu1 }
 0x120   :  { %v1151_v33 = vadd.f32 %v1150_v31, %v1149_v29  ;;  %v1152_v34 = vpop.f32.mrb[22].mxu0  ;;  %v1208_v35 = vpop.f32.mrb[21].mxu1 }
 0x121   :  { %v1153_v36 = vpop.f32.mrb[23].mxu0  ;;  %v1209_v37 = vadd.f32 %v1208_v35, %v1207_v32  ;;  %v1210_v38 = vpop.f32.mrb[22].mxu1 }
 0x122   :  { %v615_v39 = vadd.f32 %v1151_v33, %v1625_v11  ;;  %v1154_v40 = vadd.f32 %v1153_v36, %v1152_v34  ;;  %v1211_v42 = vpop.f32.mrb[23].mxu1 }
 0x123   :  { %v1212_v44 = vadd.f32 %v1211_v42, %v1210_v38 }
 0x124   :  { %v618_v45 = vadd.f32 %v1154_v40, %v1625_v11  ;;  %v703_v46 = vadd.f32 %v1209_v37, %v615_v39 }
 0x126   :  { %v1155_v47 = vpop.f32.mrb[24].mxu0  ;;  %v1655_v48 = vadd.f32 %v1212_v44, %v618_v45 }
 0x127   :  { %v1156_v49 = vpop.f32.mrb[25].mxu0  ;;  %v1213_v50 = vpop.f32.mrb[24].mxu1 }
 0x128   :  { %v1157_v51 = vadd.f32 %v1156_v49, %v1155_v47  ;;  %v1158_v52 = vpop.f32.mrb[26].mxu0  ;;  %v1214_v53 = vpop.f32.mrb[25].mxu1 }
 0x129   :  { %v1159_v54 = vpop.f32.mrb[27].mxu0  ;;  %v1215_v55 = vadd.f32 %v1214_v53, %v1213_v50  ;;  %v1216_v56 = vpop.f32.mrb[26].mxu1 }
 0x12a   :  { %v623_v58 = vadd.f32 %v1157_v51, %v1625_v11  ;;  %v1217_v60 = vpop.f32.mrb[27].mxu1 }
 0x12c   :  { %v1658_v61 = vadd.f32 %v1215_v55, %v623_v58 }
 0x12e   :  { %v750_v62 = vpop.f32.mrb[28].mxu0 }
 0x12f   :  { %v751_v63 = vadd.f32 %v750_v62, %v1629_v25  ;;  %v782_v0 = vpop.f32.mrb[28].mxu1  ;;  %v1240_v1 = vpop.f32.mrb[29].mxu0 }
 0x130   :  { %v783_v2 = vadd.f32 %v782_v0, %v695_v28  ;;  %v1256_v3 = vpop.f32.mrb[29].mxu1  ;;  %v753_v4 = vpop.f32.mrb[30].mxu0 }
 0x131   :  { %vm804_vm2 = vcmp.ge.f32.partialorder %v751_v63, 0.0  ;;  %v817_v5 = vmul.f32 0.01, %v751_v63  ;;  %v754_v6 = vadd.f32 %v753_v4, %v1631_v27  ;;  %v785_v7 = vpop.f32.mrb[30].mxu1  ;;  %v1241_v8 = vpop.f32.mrb[31].mxu0 }
 0x132   :  { %vm812_vm3 = vcmp.ge.f32.partialorder %v783_v2, 0.0  ;;  %v825_v10 = vmul.f32 0.01, %v783_v2  ;;  %v786_v11 = vadd.f32 %v785_v7, %v698_v30  ;;  %v1257_v13 = vpop.f32.mrb[31].mxu1 }
 0x133   :  { %v830_v14 = vsel %vm804_vm2, %v751_v63, %v817_v5  ;;  %vm805_vm5 = vcmp.ge.f32.partialorder %v754_v6, 0.0  ;;  %v818_v15 = vmul.f32 0.01, %v754_v6  ;;  %vm934_vm2 = vcmask 517120  }
 0x134   :  { %v1090_v25 = vpack.c.bf16 %v830_v14, %v830_v14  ;;  %v943_v16 = vmul.f32 %v830_v14, %v830_v14  ;;  %v1662_v17 = vsel %vm812_vm3, %v783_v2, %v825_v10  ;;  %v911_v27 = vsel %vm518_vm1, %v830_v14, 0.0 }
 0x135   :  { %v1098_v18 = vpack.c.bf16 %v1662_v17, %v1662_v17  ;;  %v831_v19 = vsel %vm805_vm5, %v754_v6, %v818_v15  ;;  %vm813_vm6 = vcmp.ge.f32.partialorder %v786_v11, 0.0  ;;  %v826_v26 = vmul.f32 0.01, %v786_v11 }
 0x136   :  { %897 = vst.msk [vmem:[%s1782_s3] sm:$0xf] %vm896_vm4, %v1090_v25  ;;  %v1091_v20 = vpack.c.bf16 %v831_v19, %v831_v19  ;;  %v912_v21 = vsel %vm518_vm1, %v831_v19, 0.0  ;;  %v944_v22 = vmul.f32 %v831_v19, %v831_v19  ;;  %v758_v23 = vpop.f32.mrb[32].mxu0  ;;  %v956_v30 = vsel %vm518_vm1, %v943_v16, 0.0 }
 0x137   :  { %905 = vst.msk [vmem:[%s1782_s3 + $0x20] sm:$0xf] %vm896_vm4, %v1098_v18  ;;  %v913_v24 = vadd.f32 %v912_v21, %v911_v27  ;;  %v790_v28 = vpop.f32.mrb[32].mxu1  ;;  %v1244_v29 = vpop.f32.mrb[33].mxu0  ;;  %v759_v32 = vadd.f32 %v758_v23, %v1635_v41  ;;  %v1683_v37 = vsel %vm813_vm6, %v786_v11, %v826_v26  ;;  %vm987_vm3 = vcmask 1040384  }
 0x138   :  { %898 = vst.msk [vmem:[%s1782_s3 + $0x4] sm:$0xf] %vm896_vm4, %v1091_v20  ;;  %v957_v31 = vsel %vm518_vm1, %v944_v22, 0.0  ;;  %v791_v33 = vadd.f32 %v790_v28, %v703_v46  ;;  %v1260_v34 = vpop.f32.mrb[33].mxu1  ;;  %v761_v35 = vpop.f32.mrb[34].mxu0  ;;  %v1099_v42 = vpack.c.bf16 %v1683_v37, %v1683_v37 }
 0x139   :  { %v958_v36 = vadd.f32 %v957_v31, %v956_v30  ;;  %v762_v38 = vadd.f32 %v761_v35, %v1637_v43  ;;  %v793_v39 = vpop.f32.mrb[34].mxu1  ;;  %v1245_v40 = vpop.f32.mrb[35].mxu0  ;;  %vm806_vm7 = vcmp.ge.f32.partialorder %v759_v32, 0.0  ;;  %v819_v45 = vmul.f32 0.01, %v759_v32 }
 0x13a   :  { %v1261_v44 = vpop.f32.mrb[35].mxu1  ;;  %vm814_vm8 = vcmp.ge.f32.partialorder %v791_v33, 0.0  ;;  %v827_v47 = vmul.f32 0.01, %v791_v33  ;;  %906 = vst.msk [vmem:[%s1782_s3 + $0x24] sm:$0xf] %vm896_vm4, %v1099_v42  ;;  %v794_v46 = vadd.f32 %v793_v39, %v1655_v48 }
 0x13b   :  { %vm807_vm9 = vcmp.ge.f32.partialorder %v762_v38, 0.0  ;;  %v820_v41 = vmul.f32 0.01, %v762_v38  ;;  %v832_v43 = vsel %vm806_vm7, %v759_v32, %v819_v45 }
 0x13c   :  { %v1693_v49 = vsel %vm814_vm8, %v791_v33, %v827_v47  ;;  %v1092_v50 = vpack.c.bf16 %v832_v43, %v832_v43  ;;  %v914_v51 = vsel %vm518_vm1, %v832_v43, 0.0  ;;  %v945_v52 = vmul.f32 %v832_v43, %v832_v43 }
 0x13d   :  { %v1100_v53 = vpack.c.bf16 %v1693_v49, %v1693_v49  ;;  %v915_v55 = vadd.f32 %v914_v51, %v913_v24  ;;  %v833_v56 = vsel %vm807_vm9, %v762_v38, %v820_v41  ;;  %vm815_vm10 = vcmp.ge.f32.partialorder %v794_v46, 0.0 }
 0x13e   :  { %v766_v54 = vpop.f32.mrb[36].mxu0  ;;  %899 = vst.msk [vmem:[%s1782_s3 + $0x8] sm:$0xf] %vm896_vm4, %v1092_v50  ;;  %v959_v48 = vsel %vm518_vm1, %v945_v52, 0.0  ;;  %v1093_v62 = vpack.c.bf16 %v833_v56, %v833_v56  ;;  %v916_v63 = vsel %vm518_vm1, %v833_v56, 0.0  ;;  %v946_v0 = vmul.f32 %v833_v56, %v833_v56 }
 0x13f   :  { %v798_v58 = vpop.f32.mrb[36].mxu1  ;;  %v1248_v60 = vpop.f32.mrb[37].mxu0  ;;  %907 = vst.msk [vmem:[%s1782_s3 + $0x28] sm:$0xf] %vm896_vm4, %v1100_v53  ;;  %v960_v3 = vadd.f32 %v959_v48, %v958_v36  ;;  %v917_v4 = vadd.f32 %v916_v63, %v915_v55  ;;  %v828_v8 = vmul.f32 0.01, %v794_v46  ;;  %v767_v10 = vadd.f32 %v766_v54, %v1641_v57 }
 0x140   :  { %v769_v1 = vpop.f32.mrb[38].mxu0  ;;  %v1264_v2 = vpop.f32.mrb[37].mxu1  ;;  %900 = vst.msk [vmem:[%s1782_s3 + $0xc] sm:$0xf] %vm896_vm4, %v1093_v62  ;;  %v961_v7 = vsel %vm518_vm1, %v946_v0, 0.0  ;;  %v799_v11 = vadd.f32 %v798_v58, %v1658_v61  ;;  %v926_v58 = vsel %vm518_vm1, %v1662_v17, 0.0  ;;  %v952_v60 = vmul.f32 %v1683_v37, %v1683_v37 }
 0x141   :  { %v1249_v5 = vpop.f32.mrb[39].mxu0  ;;  %v801_v6 = vpop.f32.mrb[38].mxu1  ;;  %v962_v14 = vadd.f32 %v961_v7, %v960_v3  ;;  %v770_v15 = vadd.f32 %v769_v1, %v1643_v59  ;;  %v1716_v25 = vsel %vm815_vm10, %v794_v46, %v828_v8  ;;  %vm808_vm11 = vcmp.ge.f32.partialorder %v767_v10, 0.0 }
 0x142   :  { %v1265_v13 = vpop.f32.mrb[39].mxu1  ;;  %v821_v16 = vmul.f32 0.01, %v767_v10  ;;  %v1101_v18 = vpack.c.bf16 %v1716_v25, %v1716_v25  ;;  %vm816_vm12 = vcmp.ge.f32.partialorder %v799_v11, 0.0  ;;  %v829_v19 = vmul.f32 0.01, %v799_v11 }
 0x143   :  { %vm809_vm13 = vcmp.ge.f32.partialorder %v770_v15, 0.0  ;;  %v822_v20 = vmul.f32 0.01, %v770_v15  ;;  %v928_v1 = vsel %vm518_vm1, %v1683_v37, 0.0  ;;  %v930_v5 = vsel %vm518_vm1, %v1693_v49, 0.0 }
 0x144   :  { %v834_v27 = vsel %vm808_vm11, %v767_v10, %v821_v16  ;;  %908 = vst.msk [vmem:[%s1782_s3 + $0x2c] sm:$0xf] %vm896_vm4, %v1101_v18  ;;  %v842_v24 = vsel %vm816_vm12, %v799_v11, %v829_v19  ;;  %v954_v6 = vmul.f32 %v1716_v25, %v1716_v25  ;;  %v932_v37 = vsel %vm518_vm1, %v1716_v25, 0.0 }
 0x145   :  { %v1094_v57 = vpack.c.bf16 %v834_v27, %v834_v27  ;;  %v918_v59 = vsel %vm518_vm1, %v834_v27, 0.0  ;;  %v947_v61 = vmul.f32 %v834_v27, %v834_v27  ;;  %v835_v26 = vsel %vm809_vm13, %v770_v15, %v822_v20 }
 0x146   :  { %v774_v21 = vpop.f32.mrb[40].mxu0  ;;  %v919_v23 = vadd.f32 %v918_v59, %v917_v4  ;;  %v1102_v31 = vpack.c.bf16 %v842_v24, %v842_v24  ;;  %v1095_v34 = vpack.c.bf16 %v835_v26, %v835_v26  ;;  %v920_v35 = vsel %vm518_vm1, %v835_v26, 0.0 }
 0x147   :  { %v1252_v22 = vpop.f32.mrb[41].mxu0  ;;  %v775_v28 = vadd.f32 %v774_v21, %v1647_v9  ;;  %901 = vst.msk [vmem:[%s1782_s3 + $0x10] sm:$0xf] %vm896_vm4, %v1094_v57  ;;  %v963_v30 = vsel %vm518_vm1, %v947_v61, 0.0  ;;  %v948_v36 = vmul.f32 %v835_v26, %v835_v26  ;;  %v973_v4 = vsel %vm518_vm1, %v952_v60, 0.0 }
 0x148   :  { %v777_v29 = vpop.f32.mrb[42].mxu0  ;;  %v964_v33 = vadd.f32 %v963_v30, %v962_v14  ;;  %910 = vst.msk [vmem:[%s1782_s3 + $0x30] sm:$0x1] %vm909_vm14, %v1102_v31  ;;  %v921_v9 = vadd.f32 %v920_v35, %v919_v23  ;;  %v955_v11 = vmul.f32 %v842_v24, %v842_v24  ;;  %v977_v15 = vsel %vm518_vm1, %v954_v6, 0.0 }
 0x149   :  { %v1253_v32 = vpop.f32.mrb[43].mxu0  ;;  %vm810_vm15 = vcmp.ge.f32.partialorder %v775_v28, 0.0  ;;  %v823_v38 = vmul.f32 0.01, %v775_v28  ;;  %902 = vst.msk [vmem:[%s1782_s3 + $0x14] sm:$0xf] %vm896_vm4, %v1095_v34  ;;  %v778_v40 = vadd.f32 %v777_v29, %v1649_v12  ;;  %v951_v12 = vmul.f32 %v1662_v17, %v1662_v17 }
 0x14a   :  { %v965_v39 = vsel %vm518_vm1, %v948_v36, 0.0  ;;  %v953_v17 = vmul.f32 %v1693_v49, %v1693_v49  ;;  %v935_v16 = vsel %vm934_vm2, %v842_v24, 0.0  ;;  %v979_v19 = vsel %vm934_vm2, %v955_v11, 0.0 }
 0x14b   :  { %v966_v42 = vadd.f32 %v965_v39, %v964_v33  ;;  %v836_v44 = vsel %vm810_vm15, %v775_v28, %v823_v38  ;;  %vm811_vm0 = vcmp.ge.f32.partialorder %v778_v40, 0.0  ;;  %v824_v43 = vmul.f32 0.01, %v778_v40 }
 0x14c   :  { %v1096_v45 = vpack.c.bf16 %v836_v44, %v836_v44  ;;  %v922_v47 = vsel %vm518_vm1, %v836_v44, 0.0  ;;  %v949_v41 = vmul.f32 %v836_v44, %v836_v44  ;;  %v971_v0 = vsel %vm518_vm1, %v951_v12, 0.0 }
 0x14d   :  { %v923_v46 = vadd.f32 %v922_v47, %v921_v9  ;;  %v837_v52 = vsel %vm811_vm0, %v778_v40, %v824_v43  ;;  %v975_v10 = vsel %vm518_vm1, %v953_v17, 0.0 }
 0x14e   :  { %903 = vst.msk [vmem:[%s1782_s3 + $0x18] sm:$0xf] %vm896_vm4, %v1096_v45  ;;  %v967_v50 = vsel %vm518_vm1, %v949_v41, 0.0  ;;  %v1097_v53 = vpack.c.bf16 %v837_v52, %v837_v52  ;;  %v924_v54 = vsel %vm518_vm1, %v837_v52, 0.0  ;;  %v950_v55 = vmul.f32 %v837_v52, %v837_v52 }
 0x14f   :  { %v968_v51 = vadd.f32 %v967_v50, %v966_v42  ;;  %v925_v56 = vadd.f32 %v924_v54, %v923_v46 }
 0x150   :  { %904 = vst.msk [vmem:[%s1782_s3 + $0x1c] sm:$0xf] %vm896_vm4, %v1097_v53  ;;  %v969_v48 = vsel %vm518_vm1, %v950_v55, 0.0 }
 0x151   :  { %v927_v62 = vadd.f32 %v926_v58, %v925_v56  ;;  %v970_v63 = vadd.f32 %v969_v48, %v968_v51 }
 0x153   :  { %v929_v2 = vadd.f32 %v928_v1, %v927_v62  ;;  %v972_v3 = vadd.f32 %v971_v0, %v970_v63 }
 0x155   :  { %v931_v7 = vadd.f32 %v930_v5, %v929_v2  ;;  %v974_v8 = vadd.f32 %v973_v4, %v972_v3 }
 0x157   :  { %v933_v13 = vadd.f32 %v932_v37, %v931_v7  ;;  %v976_v14 = vadd.f32 %v975_v10, %v974_v8 }
 0x159   :  { %v936_v18 = vadd.f32 %v935_v16, %v933_v13  ;;  %v978_v49 = vadd.f32 %v977_v15, %v976_v14 }
 0x15b   :  { %v937_v27 = vrot.slane %v936_v18, 4  ;;  %v980_v20 = vadd.f32 %v979_v19, %v978_v49 }
 0x15d   :  { %v938_v21 = vadd.f32 %v937_v27, %v936_v18  ;;  %v981_v57 = vrot.slane %v980_v20, 4 }
 0x15f   :  { %v939_v59 = vrot.slane %v938_v21, 2  ;;  %v982_v61 = vadd.f32 %v981_v57, %v980_v20 }
 0x161   :  { %v940_v22 = vadd.f32 %v939_v59, %v938_v21  ;;  %v983_v23 = vrot.slane %v982_v61, 2 }
 0x163   :  { %v941_v25 = vrot.slane %v940_v22, 1  ;;  %v984_v26 = vadd.f32 %v983_v23, %v982_v61 }
 0x165   :  { %v985_v28 = vrot.slane %v984_v26, 1  ;;  %v942_v29 = vadd.f32 %v941_v25, %v940_v22 }
 0x167   :  { %v986_v30 = vadd.f32 %v985_v28, %v984_v26 }
 0x169   :  { %v988_v31 = vsel %vm987_vm3, %v942_v29, %v986_v30 }
 0x16a   :  { %989 = vst.msk [vmem:[%s1783_s4] sm:$0x3] %vm934_vm2, %v988_v31 }

// kernel: base_network_forward.7
= control target key start
LH: loop header
LB: loop body
LE: loop exit
PB: predicated region body
PF: predicated region fallthrough
CT: control target
= control target key end

     0   :  { %v414_v36 = vlaneseq  ;;  %v4205_v37 = vmov 1966171168   ;;  %s5539_s0 = inlined_call_operand.vmem [shape: bf16[2,3136], index: 0, kind: input, shape index: {}]   ;;  %s5540_s1 = inlined_call_operand.vmem [shape: bf16[3136,256], index: 1, kind: input, shape index: {}]   ;;  %s5541_s2 = inlined_call_operand.vmem [shape: f32[1,256], index: 2, kind: input, shape index: {}]   ;;  %s5542_s3 = inlined_call_operand.hbm [shape: f32[2,256], index: 3, kind: output, shape index: {}]  }
   0x1   :  { %v3588_v0 = vld [vmem:[%s5540_s1 + $0x4] ss:$8 sps:$4 sm:$0xff]   ;;  %v3592_v2 = vld [vmem:[%s5540_s1] ss:$8 sps:$4 sm:$0xff]   ;;  %v3594_v4 = vld [vmem:[%s5540_s1 + $0x14] ss:$8 sps:$4 sm:$0xff]   ;;  %v430_v38 = vunpack.c.l.s4 %v4205_v37 }
   0x2   :  { %v3590_v1 = vld [vmem:[%s5540_s1 + $0x604] ss:$8 sps:$4 sm:$0xff]   ;;  %2577 = vmatprep.subr.bf16.mxu1 %v3588_v0  ;;  %v3593_v3 = vld [vmem:[%s5540_s1 + $0x600] ss:$8 sps:$4 sm:$0xff]   ;;  %v3596_v5 = vld [vmem:[%s5540_s1 + $0x614] ss:$8 sps:$4 sm:$0xff]  }
   0x3   :  { %2823 = vmatprep.subr.bf16.mxu0 %v3590_v1  ;;  %2578 = vmatpush1.bf16.msra.mxu1 %v3592_v2  ;;  %v3598_v6 = vld [vmem:[%s5540_s1 + $0x10] ss:$8 sps:$4 sm:$0xff]   ;;  %v3600_v8 = vld [vmem:[%s5540_s1 + $0x24] ss:$8 sps:$4 sm:$0xff]   ;;  %v3604_v10 = vld [vmem:[%s5540_s1 + $0x20] ss:$8 sps:$4 sm:$0xff]   ;;  %v431_v43 = vunpack.c.0.s8 %v430_v38 }
   0x4   :  { %2824 = vmatpush1.bf16.msra.mxu0 %v3593_v3  ;;  %2579 = vmatprep.subr.bf16.mxu1 %v3594_v4  ;;  %v3599_v7 = vld [vmem:[%s5540_s1 + $0x610] ss:$8 sps:$4 sm:$0xff]   ;;  %v3602_v9 = vld [vmem:[%s5540_s1 + $0x624] ss:$8 sps:$4 sm:$0xff]   ;;  %v3605_v11 = vld [vmem:[%s5540_s1 + $0x620] ss:$8 sps:$4 sm:$0xff]  }
   0x5   :  { %2825 = vmatprep.subr.bf16.mxu0 %v3596_v5  ;;  %v3606_v12 = vld [vmem:[%s5540_s1 + $0x34] ss:$8 sps:$4 sm:$0xff]   ;;  %v3610_v14 = vld [vmem:[%s5540_s1 + $0x30] ss:$8 sps:$4 sm:$0xff]   ;;  %v3612_v16 = vld [vmem:[%s5540_s1 + $0x44] ss:$8 sps:$4 sm:$0xff]  }
   0x6   :  { %v3608_v13 = vld [vmem:[%s5540_s1 + $0x634] ss:$8 sps:$4 sm:$0xff]   ;;  %v3611_v15 = vld [vmem:[%s5540_s1 + $0x630] ss:$8 sps:$4 sm:$0xff]   ;;  %v3614_v17 = vld [vmem:[%s5540_s1 + $0x644] ss:$8 sps:$4 sm:$0xff]  }
   0x7   :  { %2580 = vmatpush1.bf16.msra.mxu1 %v3598_v6  ;;  %v3616_v18 = vld [vmem:[%s5540_s1 + $0x40] ss:$8 sps:$4 sm:$0xff]   ;;  %v3618_v20 = vld [vmem:[%s5540_s1 + $0x54] ss:$8 sps:$4 sm:$0xff]   ;;  %v3622_v22 = vld [vmem:[%s5540_s1 + $0x50] ss:$8 sps:$4 sm:$0xff]  }
   0x8   :  { %2826 = vmatpush1.bf16.msra.mxu0 %v3599_v7  ;;  %2581 = vmatprep.subr.bf16.mxu1 %v3600_v8  ;;  %v3617_v19 = vld [vmem:[%s5540_s1 + $0x640] ss:$8 sps:$4 sm:$0xff]   ;;  %v3620_v21 = vld [vmem:[%s5540_s1 + $0x654] ss:$8 sps:$4 sm:$0xff]   ;;  %v3623_v23 = vld [vmem:[%s5540_s1 + $0x650] ss:$8 sps:$4 sm:$0xff]  }
   0x9   :  { %2827 = vmatprep.subr.bf16.mxu0 %v3602_v9  ;;  %v3624_v24 = vld [vmem:[%s5540_s1 + $0x64] ss:$8 sps:$4 sm:$0xff]   ;;  %v3628_v26 = vld [vmem:[%s5540_s1 + $0x60] ss:$8 sps:$4 sm:$0xff]   ;;  %v3630_v28 = vld [vmem:[%s5540_s1 + $0x74] ss:$8 sps:$4 sm:$0xff]  }
   0xa   :  { %v3626_v25 = vld [vmem:[%s5540_s1 + $0x664] ss:$8 sps:$4 sm:$0xff]   ;;  %v3629_v27 = vld [vmem:[%s5540_s1 + $0x660] ss:$8 sps:$4 sm:$0xff]   ;;  %v3632_v29 = vld [vmem:[%s5540_s1 + $0x674] ss:$8 sps:$4 sm:$0xff]  }
   0xb   :  { %2582 = vmatpush1.bf16.msra.mxu1 %v3604_v10  ;;  %v3634_v30 = vld [vmem:[%s5540_s1 + $0x70] ss:$8 sps:$4 sm:$0xff]   ;;  %v3636_v32 = vld [vmem:[%s5540_s1 + $0x84] ss:$8 sps:$4 sm:$0xff]   ;;  %v3640_v34 = vld [vmem:[%s5540_s1 + $0x80] ss:$8 sps:$4 sm:$0xff]  }
   0xc   :  { %2828 = vmatpush1.bf16.msra.mxu0 %v3605_v11  ;;  %2583 = vmatprep.subr.bf16.mxu1 %v3606_v12  ;;  %v3635_v31 = vld [vmem:[%s5540_s1 + $0x670] ss:$8 sps:$4 sm:$0xff]   ;;  %v3638_v33 = vld [vmem:[%s5540_s1 + $0x684] ss:$8 sps:$4 sm:$0xff]   ;;  %v3641_v35 = vld [vmem:[%s5540_s1 + $0x680] ss:$8 sps:$4 sm:$0xff]  }
   0xd   :  { %2829 = vmatprep.subr.bf16.mxu0 %v3608_v13  ;;  %v3642_v39 = vld [vmem:[%s5540_s1 + $0x94] ss:$8 sps:$4 sm:$0xff]   ;;  %v3646_v41 = vld [vmem:[%s5540_s1 + $0x90] ss:$8 sps:$4 sm:$0xff]   ;;  %v4345_v42 = vshrl.u32 %v414_v36, 7  ;;  %v4374_v52 = vld [vmem:[%s5539_s0] sm:$0xff] }
   0xe   :  { %v3644_v40 = vld [vmem:[%s5540_s1 + $0x694] ss:$8 sps:$4 sm:$0xff]   ;;  %v3647_v44 = vld [vmem:[%s5540_s1 + $0x690] ss:$8 sps:$4 sm:$0xff]   ;;  %v3648_v45 = vld [vmem:[%s5540_s1 + $0xa4] ss:$8 sps:$4 sm:$0xff]  }
   0xf   :  { %2584 = vmatpush1.bf16.msra.mxu1 %v3610_v14  ;;  %v3650_v46 = vld [vmem:[%s5540_s1 + $0x6a4] ss:$8 sps:$4 sm:$0xff]   ;;  %v3652_v47 = vld [vmem:[%s5540_s1 + $0xa0] ss:$8 sps:$4 sm:$0xff]   ;;  %v4363_v49 = vsub.s32 %v431_v43, %v4345_v42  ;;  %v3654_v50 = vld [vmem:[%s5540_s1 + $0xb4] ss:$8 sps:$4 sm:$0xff]  }
  0x10   :  { %2830 = vmatpush1.bf16.msra.mxu0 %v3611_v15  ;;  %2585 = vmatprep.subr.bf16.mxu1 %v3612_v16  ;;  %v3653_v48 = vld [vmem:[%s5540_s1 + $0x6a0] ss:$8 sps:$4 sm:$0xff]   ;;  %v3656_v51 = vld [vmem:[%s5540_s1 + $0x6b4] ss:$8 sps:$4 sm:$0xff]   ;;  %v3658_v53 = vld [vmem:[%s5540_s1 + $0xb0] ss:$8 sps:$4 sm:$0xff]  }
  0x11   :  { %2831 = vmatprep.subr.bf16.mxu0 %v3614_v17  ;;  %v435_v54 = vrot.slane %v4374_v52, %v4363_v49  ;;  %v3659_v55 = vld [vmem:[%s5540_s1 + $0x6b0] ss:$8 sps:$4 sm:$0xff]   ;;  %v17_v56 = vld [vmem:[%s5539_s0 + $0x8] sm:$0xff]  ;;  %v3666_v1 = vld [vmem:[%s5540_s1 + $0xd4] ss:$8 sps:$4 sm:$0xff]  }
  0x12   :  { %v3660_v57 = vld [vmem:[%s5540_s1 + $0xc4] ss:$8 sps:$4 sm:$0xff]   ;;  %v477_v60 = vcombine.high %v17_v56, %v17_v56  ;;  %v3664_v63 = vld [vmem:[%s5540_s1 + $0xc0] ss:$8 sps:$4 sm:$0xff]   ;;  %v3668_v2 = vld [vmem:[%s5540_s1 + $0x6d4] ss:$8 sps:$4 sm:$0xff]  }
  0x13   :  { %2586 = vmatpush1.bf16.msra.mxu1 %v3616_v18  ;;  %v3662_v58 = vld [vmem:[%s5540_s1 + $0x6c4] ss:$8 sps:$4 sm:$0xff]   ;;  %v443_v59 = vcombine.high %v435_v54, %v435_v54  ;;  %v3665_v0 = vld [vmem:[%s5540_s1 + $0x6c0] ss:$8 sps:$4 sm:$0xff]   ;;  %v3670_v5 = vld [vmem:[%s5540_s1 + $0xd0] ss:$8 sps:$4 sm:$0xff]   ;;  %v4445_v17 = vrot.slane %v435_v54, %v4363_v49 }
  0x14   :  { %2832 = vmatpush1.bf16.msra.mxu0 %v3617_v19  ;;  %2587 = vmatprep.subr.bf16.mxu1 %v3618_v20  ;;  %v491_v62 = vrot.slane %v477_v60, %v4363_v49  ;;  %v3671_v6 = vld [vmem:[%s5540_s1 + $0x6d0] ss:$8 sps:$4 sm:$0xff]   ;;  %v3672_v7 = vld [vmem:[%s5540_s1 + $0xe4] ss:$8 sps:$4 sm:$0xff]   ;;  %v3676_v9 = vld [vmem:[%s5540_s1 + $0xe0] ss:$8 sps:$4 sm:$0xff]  }
  0x15   :  { %2833 = vmatprep.subr.bf16.mxu0 %v3620_v21  ;;  %v465_v61 = vrot.slane %v443_v59, %v4363_v49  ;;  %v3674_v8 = vld [vmem:[%s5540_s1 + $0x6e4] ss:$8 sps:$4 sm:$0xff]   ;;  %v3677_v10 = vld [vmem:[%s5540_s1 + $0x6e0] ss:$8 sps:$4 sm:$0xff]   ;;  %v3678_v11 = vld [vmem:[%s5540_s1 + $0xf4] ss:$8 sps:$4 sm:$0xff]  }
  0x16   :  { %v493_v3 = vcombine.high %v491_v62, %v491_v62  ;;  %v3680_v12 = vld [vmem:[%s5540_s1 + $0x6f4] ss:$8 sps:$4 sm:$0xff]   ;;  %v3682_v13 = vld [vmem:[%s5540_s1 + $0xf0] ss:$8 sps:$4 sm:$0xff]   ;;  %v3687_v15 = vld [vmem:[%s5540_s1 + $0x104] ss:$8 sps:$4 sm:$0xff]   ;;  %v4448_v18 = vrot.slane %v491_v62, %v4363_v49 }
  0x17   :  { %2588 = vmatpush1.bf16.msra.mxu1 %v3622_v22  ;;  %2609 = vmatprep.mubr.bf16.mxu1 %v465_v61  ;;  %v3683_v14 = vld [vmem:[%s5540_s1 + $0x6f0] ss:$8 sps:$4 sm:$0xff]   ;;  %v3691_v16 = vld [vmem:[%s5540_s1 + $0x704] ss:$8 sps:$4 sm:$0xff]   ;;  %v3685_v19 = vld [vmem:[%s5540_s1 + $0x100] ss:$8 sps:$4 sm:$0xff]  }
  0x18   :  { %2834 = vmatpush1.bf16.msra.mxu0 %v3623_v23  ;;  %2589 = vmatprep.subr.bf16.mxu1 %v3624_v24  ;;  %v521_v4 = vrot.slane %v493_v3, %v4363_v49  ;;  %v3689_v20 = vld [vmem:[%s5540_s1 + $0x700] ss:$8 sps:$4 sm:$0xff]   ;;  %v3694_v21 = vld [vmem:[%s5540_s1 + $0x114] ss:$8 sps:$4 sm:$0xff]   ;;  %v475_v23 = vcombine.high %v465_v61, %v465_v61  ;;  %v3715_v36 = vld [vmem:[%s5540_s1 + $0x744] ss:$8 sps:$4 sm:$0xff]  }
  0x19   :  { %2835 = vmatprep.subr.bf16.mxu0 %v3626_v25  ;;  %v3697_v22 = vld [vmem:[%s5540_s1 + $0x714] ss:$8 sps:$4 sm:$0xff]   ;;  %v3692_v25 = vld [vmem:[%s5540_s1 + $0x110] ss:$8 sps:$4 sm:$0xff]   ;;  %v3710_v37 = vld [vmem:[%s5540_s1 + $0x140] ss:$8 sps:$4 sm:$0xff]  }
  0x1a   :  { %2855 = vmatprep.mubr.bf16.mxu0 %v521_v4  ;;  %v525_v24 = vcombine.high %v521_v4, %v521_v4  ;;  %v3713_v38 = vld [vmem:[%s5540_s1 + $0x740] ss:$8 sps:$4 sm:$0xff]   ;;  %v3719_v43 = vld [vmem:[%s5540_s1 + $0x750] ss:$8 sps:$4 sm:$0xff]   ;;  %v3736_v54 = vld [vmem:[%s5540_s1 + $0x184] ss:$8 sps:$4 sm:$0xff]  }
  0x1b   :  { %2590 = vmatpush1.bf16.msra.mxu1 %v3628_v26  ;;  %v3695_v26 = vld [vmem:[%s5540_s1 + $0x710] ss:$8 sps:$4 sm:$0xff]   ;;  %v3734_v56 = vld [vmem:[%s5540_s1 + $0x180] ss:$8 sps:$4 sm:$0xff]   ;;  %v3745_v59 = vld [vmem:[%s5540_s1 + $0x794] ss:$8 sps:$4 sm:$0xff]  }
  0x1c   :  { %2836 = vmatpush1.bf16.msra.mxu0 %v3629_v27  ;;  %2591 = vmatprep.subr.bf16.mxu1 %v3630_v28  ;;  %v3700_v27 = vld [vmem:[%s5540_s1 + $0x124] ss:$8 sps:$4 sm:$0xff]   ;;  %v3740_v60 = vld [vmem:[%s5540_s1 + $0x190] ss:$8 sps:$4 sm:$0xff]   ;;  %v3757_v3 = vld [vmem:[%s5540_s1 + $0x7b4] ss:$8 sps:$4 sm:$0xff]  }
  0x1d   :  { %2837 = vmatprep.subr.bf16.mxu0 %v3632_v29  ;;  %v3703_v28 = vld [vmem:[%s5540_s1 + $0x724] ss:$8 sps:$4 sm:$0xff]   ;;  %v3698_v29 = vld [vmem:[%s5540_s1 + $0x120] ss:$8 sps:$4 sm:$0xff]   ;;  %v3743_v61 = vld [vmem:[%s5540_s1 + $0x790] ss:$8 sps:$4 sm:$0xff]  }
  0x1e   :  { %v3748_v62 = vld [vmem:[%s5540_s1 + $0x1a4] ss:$8 sps:$4 sm:$0xff]   ;;  %v3752_v4 = vld [vmem:[%s5540_s1 + $0x1b0] ss:$8 sps:$4 sm:$0xff]  }
  0x1f   :  { %2592 = vmatpush1.bf16.msra.mxu1 %v3634_v30  ;;  %v3701_v30 = vld [vmem:[%s5540_s1 + $0x720] ss:$8 sps:$4 sm:$0xff]  }
  0x20   :  { %2838 = vmatpush1.bf16.msra.mxu0 %v3635_v31  ;;  %2593 = vmatprep.subr.bf16.mxu1 %v3636_v32  ;;  %v3706_v31 = vld [vmem:[%s5540_s1 + $0x134] ss:$8 sps:$4 sm:$0xff]  }
  0x21   :  { %2839 = vmatprep.subr.bf16.mxu0 %v3638_v33  ;;  %v3709_v32 = vld [vmem:[%s5540_s1 + $0x734] ss:$8 sps:$4 sm:$0xff]   ;;  %v3704_v33 = vld [vmem:[%s5540_s1 + $0x130] ss:$8 sps:$4 sm:$0xff]  }
  0x23   :  { %2594 = vmatpush1.bf16.msra.mxu1 %v3640_v34  ;;  %v3707_v34 = vld [vmem:[%s5540_s1 + $0x730] ss:$8 sps:$4 sm:$0xff]  }
  0x24   :  { %2840 = vmatpush1.bf16.msra.mxu0 %v3641_v35  ;;  %2595 = vmatprep.subr.bf16.mxu1 %v3642_v39  ;;  %v3712_v35 = vld [vmem:[%s5540_s1 + $0x144] ss:$8 sps:$4 sm:$0xff]   ;;  %v3718_v39 = vld [vmem:[%s5540_s1 + $0x154] ss:$8 sps:$4 sm:$0xff]  }
  0x25   :  { %2841 = vmatprep.subr.bf16.mxu0 %v3644_v40  ;;  %v3721_v40 = vld [vmem:[%s5540_s1 + $0x754] ss:$8 sps:$4 sm:$0xff]  }
  0x27   :  { %2596 = vmatpush1.bf16.msra.mxu1 %v3646_v41  ;;  %v3716_v41 = vld [vmem:[%s5540_s1 + $0x150] ss:$8 sps:$4 sm:$0xff]  }
  0x28   :  { %2842 = vmatpush1.bf16.msra.mxu0 %v3647_v44  ;;  %2597 = vmatprep.subr.bf16.mxu1 %v3648_v45  ;;  %v3724_v44 = vld [vmem:[%s5540_s1 + $0x164] ss:$8 sps:$4 sm:$0xff]  }
  0x29   :  { %2843 = vmatprep.subr.bf16.mxu0 %v3650_v46  ;;  %v3727_v45 = vld [vmem:[%s5540_s1 + $0x764] ss:$8 sps:$4 sm:$0xff]   ;;  %v3722_v46 = vld [vmem:[%s5540_s1 + $0x160] ss:$8 sps:$4 sm:$0xff]  }
  0x2b   :  { %2598 = vmatpush1.bf16.msra.mxu1 %v3652_v47  ;;  %v3725_v47 = vld [vmem:[%s5540_s1 + $0x760] ss:$8 sps:$4 sm:$0xff]  }
  0x2c   :  { %2844 = vmatpush1.bf16.msra.mxu0 %v3653_v48  ;;  %2599 = vmatprep.subr.bf16.mxu1 %v3654_v50  ;;  %v3730_v48 = vld [vmem:[%s5540_s1 + $0x174] ss:$8 sps:$4 sm:$0xff]  }
  0x2d   :  { %2845 = vmatprep.subr.bf16.mxu0 %v3656_v51  ;;  %v3733_v50 = vld [vmem:[%s5540_s1 + $0x774] ss:$8 sps:$4 sm:$0xff]   ;;  %v3728_v51 = vld [vmem:[%s5540_s1 + $0x170] ss:$8 sps:$4 sm:$0xff]  }
  0x2f   :  { %2600 = vmatpush1.bf16.msra.mxu1 %v3658_v53  ;;  %v3731_v53 = vld [vmem:[%s5540_s1 + $0x770] ss:$8 sps:$4 sm:$0xff]  }
  0x30   :  { %2846 = vmatpush1.bf16.msra.mxu0 %v3659_v55  ;;  %2601 = vmatprep.subr.bf16.mxu1 %v3660_v57  ;;  %v3739_v55 = vld [vmem:[%s5540_s1 + $0x784] ss:$8 sps:$4 sm:$0xff]   ;;  %v3737_v57 = vld [vmem:[%s5540_s1 + $0x780] ss:$8 sps:$4 sm:$0xff]  }
  0x31   :  { %2847 = vmatprep.subr.bf16.mxu0 %v3662_v58  ;;  %v3742_v58 = vld [vmem:[%s5540_s1 + $0x194] ss:$8 sps:$4 sm:$0xff]  }
  0x33   :  { %2602 = vmatpush1.bf16.msra.mxu1 %v3664_v63  ;;  %v3751_v63 = vld [vmem:[%s5540_s1 + $0x7a4] ss:$8 sps:$4 sm:$0xff]  }
  0x34   :  { %2848 = vmatpush1.bf16.msra.mxu0 %v3665_v0  ;;  %2603 = vmatprep.subr.bf16.mxu1 %v3666_v1  ;;  %v3746_v0 = vld [vmem:[%s5540_s1 + $0x1a0] ss:$8 sps:$4 sm:$0xff]  }
  0x35   :  { %2849 = vmatprep.subr.bf16.mxu0 %v3668_v2  ;;  %v3749_v1 = vld [vmem:[%s5540_s1 + $0x7a0] ss:$8 sps:$4 sm:$0xff]   ;;  %v3754_v2 = vld [vmem:[%s5540_s1 + $0x1b4] ss:$8 sps:$4 sm:$0xff]  }
  0x37   :  { %2604 = vmatpush1.bf16.msra.mxu1 %v3670_v5  ;;  %v3755_v5 = vld [vmem:[%s5540_s1 + $0x7b0] ss:$8 sps:$4 sm:$0xff]  }
  0x38   :  { %2850 = vmatpush1.bf16.msra.mxu0 %v3671_v6  ;;  %2605 = vmatprep.subr.bf16.mxu1 %v3672_v7  ;;  %v3760_v6 = vld [vmem:[%s5540_s1 + $0x1c4] ss:$8 sps:$4 sm:$0xff]  }
  0x39   :  { %2851 = vmatprep.subr.bf16.mxu0 %v3674_v8  ;;  %v3763_v7 = vld [vmem:[%s5540_s1 + $0x7c4] ss:$8 sps:$4 sm:$0xff]   ;;  %v3758_v8 = vld [vmem:[%s5540_s1 + $0x1c0] ss:$8 sps:$4 sm:$0xff]  }
  0x3b   :  { %2606 = vmatpush1.bf16.msra.mxu1 %v3676_v9  ;;  %v3761_v9 = vld [vmem:[%s5540_s1 + $0x7c0] ss:$8 sps:$4 sm:$0xff]  }
  0x3c   :  { %2852 = vmatpush1.bf16.msra.mxu0 %v3677_v10  ;;  %2607 = vmatprep.subr.bf16.mxu1 %v3678_v11  ;;  %v3766_v10 = vld [vmem:[%s5540_s1 + $0x1d4] ss:$8 sps:$4 sm:$0xff]  }
  0x3d   :  { %2853 = vmatprep.subr.bf16.mxu0 %v3680_v12  ;;  %v3769_v11 = vld [vmem:[%s5540_s1 + $0x7d4] ss:$8 sps:$4 sm:$0xff]   ;;  %v3764_v12 = vld [vmem:[%s5540_s1 + $0x1d0] ss:$8 sps:$4 sm:$0xff]  }
  0x3f   :  { %2608 = vmatpush1.bf16.msra.mxu1 %v3682_v13  ;;  %v3767_v13 = vld [vmem:[%s5540_s1 + $0x7d0] ss:$8 sps:$4 sm:$0xff]  }
  0x40   :  { %2854 = vmatpush1.bf16.msra.mxu0 %v3683_v14  ;;  %2618 = vmatprep.subr.bf16.mxu1 %v3687_v15  ;;  %v3772_v14 = vld [vmem:[%s5540_s1 + $0x1e4] ss:$8 sps:$4 sm:$0xff]  }
  0x41   :  { %2864 = vmatprep.subr.bf16.mxu0 %v3691_v16  ;;  %v3775_v15 = vld [vmem:[%s5540_s1 + $0x7e4] ss:$8 sps:$4 sm:$0xff]   ;;  %v428_v16 = vcombine.high %v4374_v52, %v4374_v52  ;;  %v3781_v52 = vld [vmem:[%s5540_s1 + $0x7f4] ss:$8 sps:$4 sm:$0xff]  }
  0x42   :  { %2610 = vmatmul.mubr.bf16.vlgmr.msra.gmra.mrb[0].mxu1 %v4445_v17 }
  0x43   :  { %2856 = vmatmul.mubr.bf16.vlgmr.msra.gmra.mrb[0].mxu0 %v4448_v18  ;;  %2619 = vmatpush1.bf16.msra.mxu1 %v3685_v19  ;;  %v3770_v19 = vld [vmem:[%s5540_s1 + $0x1e0] ss:$8 sps:$4 sm:$0xff]  }
  0x44   :  { %2865 = vmatpush1.bf16.msra.mxu0 %v3689_v20  ;;  %2620 = vmatprep.subr.bf16.mxu1 %v3694_v21  ;;  %v3773_v20 = vld [vmem:[%s5540_s1 + $0x7e0] ss:$8 sps:$4 sm:$0xff]   ;;  %v3778_v21 = vld [vmem:[%s5540_s1 + $0x1f4] ss:$8 sps:$4 sm:$0xff]  }
  0x45   :  { %2866 = vmatprep.subr.bf16.mxu0 %v3697_v22  ;;  %2650 = vmatprep.mubr.bf16.mxu1 %v475_v23  ;;  %v4635_v22 = vrot.slane %v428_v16, %v4363_v49  ;;  %v3776_v23 = vld [vmem:[%s5540_s1 + $0x1f0] ss:$8 sps:$4 sm:$0xff]  }
  0x46   :  { %2896 = vmatprep.mubr.bf16.mxu0 %v525_v24  ;;  %v3779_v24 = vld [vmem:[%s5540_s1 + $0x7f0] ss:$8 sps:$4 sm:$0xff]  }
  0x47   :  { %2621 = vmatpush1.bf16.msra.mxu1 %v3692_v25  ;;  %v3784_v25 = vld [vmem:[%s5540_s1 + $0x204] ss:$8 sps:$4 sm:$0xff]   ;;  %v3848_v16 = vld [vmem:[%s5540_s1 + $0x2b0] ss:$8 sps:$4 sm:$0xff]  }
  0x48   :  { %2867 = vmatpush1.bf16.msra.mxu0 %v3695_v26  ;;  %2622 = vmatprep.subr.bf16.mxu1 %v3700_v27  ;;  %v3787_v26 = vld [vmem:[%s5540_s1 + $0x804] ss:$8 sps:$4 sm:$0xff]   ;;  %v444_v27 = vcombine.high %v4635_v22, %v4635_v22 }
  0x49   :  { %2868 = vmatprep.subr.bf16.mxu0 %v3703_v28  ;;  %v473_v28 = vcombine.high %v4445_v17, %v4445_v17  ;;  %v3793_v17 = vld [vmem:[%s5540_s1 + $0x814] ss:$8 sps:$4 sm:$0xff]  }
  0x4b   :  { %2623 = vmatpush1.bf16.msra.mxu1 %v3698_v29  ;;  %v523_v29 = vcombine.high %v4448_v18, %v4448_v18  ;;  %v4668_v18 = vrot.slane %v444_v27, %v4363_v49  ;;  %v3863_v27 = vld [vmem:[%s5540_s1 + $0x8d0] ss:$8 sps:$4 sm:$0xff]  }
  0x4c   :  { %2869 = vmatpush1.bf16.msra.mxu0 %v3701_v30  ;;  %2624 = vmatprep.subr.bf16.mxu1 %v3706_v31  ;;  %v3782_v30 = vld [vmem:[%s5540_s1 + $0x200] ss:$8 sps:$4 sm:$0xff]  }
  0x4d   :  { %2870 = vmatprep.subr.bf16.mxu0 %v3709_v32  ;;  %v3785_v31 = vld [vmem:[%s5540_s1 + $0x800] ss:$8 sps:$4 sm:$0xff]   ;;  %v3790_v32 = vld [vmem:[%s5540_s1 + $0x214] ss:$8 sps:$4 sm:$0xff]  }
  0x4f   :  { %2625 = vmatpush1.bf16.msra.mxu1 %v3704_v33  ;;  %v4673_v33 = vld [vmem:[%s5539_s0 + $0x10] sm:$0xff] }
  0x50   :  { %2871 = vmatpush1.bf16.msra.mxu0 %v3707_v34  ;;  %2626 = vmatprep.subr.bf16.mxu1 %v3712_v35  ;;  %v3788_v34 = vld [vmem:[%s5540_s1 + $0x210] ss:$8 sps:$4 sm:$0xff]   ;;  %v4680_v35 = vrot.slane %v4673_v33, %v4363_v49 }
  0x51   :  { %2872 = vmatprep.subr.bf16.mxu0 %v3715_v36  ;;  %v3791_v36 = vld [vmem:[%s5540_s1 + $0x810] ss:$8 sps:$4 sm:$0xff]  }
  0x53   :  { %2627 = vmatpush1.bf16.msra.mxu1 %v3710_v37  ;;  %v3796_v37 = vld [vmem:[%s5540_s1 + $0x224] ss:$8 sps:$4 sm:$0xff]  }
  0x54   :  { %2873 = vmatpush1.bf16.msra.mxu0 %v3713_v38  ;;  %2628 = vmatprep.subr.bf16.mxu1 %v3718_v39  ;;  %v3799_v38 = vld [vmem:[%s5540_s1 + $0x824] ss:$8 sps:$4 sm:$0xff]   ;;  %v541_v39 = vcombine.high %v4680_v35, %v4680_v35 }
  0x55   :  { %2874 = vmatprep.subr.bf16.mxu0 %v3721_v40  ;;  %v3794_v40 = vld [vmem:[%s5540_s1 + $0x220] ss:$8 sps:$4 sm:$0xff]  }
  0x57   :  { %2629 = vmatpush1.bf16.msra.mxu1 %v3716_v41  ;;  %v4698_v41 = vrot.slane %v541_v39, %v4363_v49  ;;  %v3878_v39 = vld [vmem:[%s5540_s1 + $0x300] ss:$8 sps:$4 sm:$0xff]  }
  0x58   :  { %2875 = vmatpush1.bf16.msra.mxu0 %v3719_v43  ;;  %2630 = vmatprep.subr.bf16.mxu1 %v3724_v44  ;;  %v3797_v43 = vld [vmem:[%s5540_s1 + $0x820] ss:$8 sps:$4 sm:$0xff]   ;;  %v3802_v44 = vld [vmem:[%s5540_s1 + $0x234] ss:$8 sps:$4 sm:$0xff]  }
  0x59   :  { %2876 = vmatprep.subr.bf16.mxu0 %v3727_v45  ;;  %v3805_v45 = vld [vmem:[%s5540_s1 + $0x834] ss:$8 sps:$4 sm:$0xff]  }
  0x5b   :  { %2631 = vmatpush1.bf16.msra.mxu1 %v3722_v46  ;;  %v3800_v46 = vld [vmem:[%s5540_s1 + $0x230] ss:$8 sps:$4 sm:$0xff]  }
  0x5c   :  { %2877 = vmatpush1.bf16.msra.mxu0 %v3725_v47  ;;  %2632 = vmatprep.subr.bf16.mxu1 %v3730_v48  ;;  %v3803_v47 = vld [vmem:[%s5540_s1 + $0x830] ss:$8 sps:$4 sm:$0xff]   ;;  %v3808_v48 = vld [vmem:[%s5540_s1 + $0x244] ss:$8 sps:$4 sm:$0xff]  }
  0x5d   :  { %2878 = vmatprep.subr.bf16.mxu0 %v3733_v50  ;;  %v3811_v50 = vld [vmem:[%s5540_s1 + $0x844] ss:$8 sps:$4 sm:$0xff]  }
  0x5f   :  { %2633 = vmatpush1.bf16.msra.mxu1 %v3728_v51  ;;  %v3806_v51 = vld [vmem:[%s5540_s1 + $0x240] ss:$8 sps:$4 sm:$0xff]  }
  0x60   :  { %2879 = vmatpush1.bf16.msra.mxu0 %v3731_v53  ;;  %2634 = vmatprep.subr.bf16.mxu1 %v3736_v54  ;;  %v3809_v53 = vld [vmem:[%s5540_s1 + $0x840] ss:$8 sps:$4 sm:$0xff]   ;;  %v3814_v54 = vld [vmem:[%s5540_s1 + $0x254] ss:$8 sps:$4 sm:$0xff]  }
  0x61   :  { %2880 = vmatprep.subr.bf16.mxu0 %v3739_v55  ;;  %v3817_v55 = vld [vmem:[%s5540_s1 + $0x854] ss:$8 sps:$4 sm:$0xff]  }
  0x63   :  { %2635 = vmatpush1.bf16.msra.mxu1 %v3734_v56  ;;  %v3812_v56 = vld [vmem:[%s5540_s1 + $0x250] ss:$8 sps:$4 sm:$0xff]  }
  0x64   :  { %2881 = vmatpush1.bf16.msra.mxu0 %v3737_v57  ;;  %2636 = vmatprep.subr.bf16.mxu1 %v3742_v58  ;;  %v3815_v57 = vld [vmem:[%s5540_s1 + $0x850] ss:$8 sps:$4 sm:$0xff]   ;;  %v3820_v58 = vld [vmem:[%s5540_s1 + $0x264] ss:$8 sps:$4 sm:$0xff]  }
  0x65   :  { %2882 = vmatprep.subr.bf16.mxu0 %v3745_v59  ;;  %v3823_v59 = vld [vmem:[%s5540_s1 + $0x864] ss:$8 sps:$4 sm:$0xff]  }
  0x67   :  { %2637 = vmatpush1.bf16.msra.mxu1 %v3740_v60  ;;  %v3818_v60 = vld [vmem:[%s5540_s1 + $0x260] ss:$8 sps:$4 sm:$0xff]  }
  0x68   :  { %2883 = vmatpush1.bf16.msra.mxu0 %v3743_v61  ;;  %2638 = vmatprep.subr.bf16.mxu1 %v3748_v62  ;;  %v3821_v61 = vld [vmem:[%s5540_s1 + $0x860] ss:$8 sps:$4 sm:$0xff]   ;;  %v3826_v62 = vld [vmem:[%s5540_s1 + $0x274] ss:$8 sps:$4 sm:$0xff]  }
  0x69   :  { %2884 = vmatprep.subr.bf16.mxu0 %v3751_v63  ;;  %v3829_v63 = vld [vmem:[%s5540_s1 + $0x874] ss:$8 sps:$4 sm:$0xff]  }
  0x6b   :  { %2639 = vmatpush1.bf16.msra.mxu1 %v3746_v0  ;;  %v3824_v0 = vld [vmem:[%s5540_s1 + $0x270] ss:$8 sps:$4 sm:$0xff]  }
  0x6c   :  { %2885 = vmatpush1.bf16.msra.mxu0 %v3749_v1  ;;  %2640 = vmatprep.subr.bf16.mxu1 %v3754_v2  ;;  %v3827_v1 = vld [vmem:[%s5540_s1 + $0x870] ss:$8 sps:$4 sm:$0xff]   ;;  %v3832_v2 = vld [vmem:[%s5540_s1 + $0x284] ss:$8 sps:$4 sm:$0xff]  }
  0x6d   :  { %2886 = vmatprep.subr.bf16.mxu0 %v3757_v3  ;;  %v3835_v3 = vld [vmem:[%s5540_s1 + $0x884] ss:$8 sps:$4 sm:$0xff]  }
  0x6f   :  { %2641 = vmatpush1.bf16.msra.mxu1 %v3752_v4  ;;  %v3830_v4 = vld [vmem:[%s5540_s1 + $0x280] ss:$8 sps:$4 sm:$0xff]  }
  0x70   :  { %2887 = vmatpush1.bf16.msra.mxu0 %v3755_v5  ;;  %2642 = vmatprep.subr.bf16.mxu1 %v3760_v6  ;;  %v3833_v5 = vld [vmem:[%s5540_s1 + $0x880] ss:$8 sps:$4 sm:$0xff]   ;;  %v3838_v6 = vld [vmem:[%s5540_s1 + $0x294] ss:$8 sps:$4 sm:$0xff]  }
  0x71   :  { %2888 = vmatprep.subr.bf16.mxu0 %v3763_v7  ;;  %v3841_v7 = vld [vmem:[%s5540_s1 + $0x894] ss:$8 sps:$4 sm:$0xff]  }
  0x73   :  { %2643 = vmatpush1.bf16.msra.mxu1 %v3758_v8  ;;  %v3836_v8 = vld [vmem:[%s5540_s1 + $0x290] ss:$8 sps:$4 sm:$0xff]  }
  0x74   :  { %2889 = vmatpush1.bf16.msra.mxu0 %v3761_v9  ;;  %2644 = vmatprep.subr.bf16.mxu1 %v3766_v10  ;;  %v3839_v9 = vld [vmem:[%s5540_s1 + $0x890] ss:$8 sps:$4 sm:$0xff]   ;;  %v3844_v10 = vld [vmem:[%s5540_s1 + $0x2a4] ss:$8 sps:$4 sm:$0xff]  }
  0x75   :  { %2890 = vmatprep.subr.bf16.mxu0 %v3769_v11  ;;  %v3847_v11 = vld [vmem:[%s5540_s1 + $0x8a4] ss:$8 sps:$4 sm:$0xff]  }
  0x77   :  { %2645 = vmatpush1.bf16.msra.mxu1 %v3764_v12  ;;  %v3842_v12 = vld [vmem:[%s5540_s1 + $0x2a0] ss:$8 sps:$4 sm:$0xff]  }
  0x78   :  { %2891 = vmatpush1.bf16.msra.mxu0 %v3767_v13  ;;  %2646 = vmatprep.subr.bf16.mxu1 %v3772_v14  ;;  %v3845_v13 = vld [vmem:[%s5540_s1 + $0x8a0] ss:$8 sps:$4 sm:$0xff]   ;;  %v3850_v14 = vld [vmem:[%s5540_s1 + $0x2b4] ss:$8 sps:$4 sm:$0xff]  }
  0x79   :  { %2892 = vmatprep.subr.bf16.mxu0 %v3775_v15  ;;  %v3853_v15 = vld [vmem:[%s5540_s1 + $0x8b4] ss:$8 sps:$4 sm:$0xff]  }
  0x7b   :  { %2647 = vmatpush1.bf16.msra.mxu1 %v3770_v19  ;;  %v3851_v19 = vld [vmem:[%s5540_s1 + $0x8b0] ss:$8 sps:$4 sm:$0xff]  }
  0x7c   :  { %2893 = vmatpush1.bf16.msra.mxu0 %v3773_v20  ;;  %2648 = vmatprep.subr.bf16.mxu1 %v3778_v21  ;;  %v3856_v20 = vld [vmem:[%s5540_s1 + $0x2c4] ss:$8 sps:$4 sm:$0xff]  }
  0x7d   :  { %2894 = vmatprep.subr.bf16.mxu0 %v3781_v52  ;;  %v3859_v21 = vld [vmem:[%s5540_s1 + $0x8c4] ss:$8 sps:$4 sm:$0xff]   ;;  %v3854_v52 = vld [vmem:[%s5540_s1 + $0x2c0] ss:$8 sps:$4 sm:$0xff]  }
  0x7f   :  { %2649 = vmatpush1.bf16.msra.mxu1 %v3776_v23  ;;  %v3857_v23 = vld [vmem:[%s5540_s1 + $0x8c0] ss:$8 sps:$4 sm:$0xff]  }
  0x80   :  { %2895 = vmatpush1.bf16.msra.mxu0 %v3779_v24  ;;  %2659 = vmatprep.subr.bf16.mxu1 %v3784_v25  ;;  %v3862_v24 = vld [vmem:[%s5540_s1 + $0x2d4] ss:$8 sps:$4 sm:$0xff]  }
  0x81   :  { %2905 = vmatprep.subr.bf16.mxu0 %v3787_v26  ;;  %v3865_v25 = vld [vmem:[%s5540_s1 + $0x8d4] ss:$8 sps:$4 sm:$0xff]   ;;  %v3860_v26 = vld [vmem:[%s5540_s1 + $0x2d0] ss:$8 sps:$4 sm:$0xff]  }
  0x82   :  { %2651 = vmatmul.mubr.bf16.vlgmr.msra.gmra.mrb[0].mxu1 %v473_v28  ;;  %v3868_v28 = vld [vmem:[%s5540_s1 + $0x2e4] ss:$8 sps:$4 sm:$0xff]  }
  0x83   :  { %2897 = vmatmul.mubr.bf16.vlgmr.msra.gmra.mrb[0].mxu0 %v523_v29  ;;  %2660 = vmatpush1.bf16.msra.mxu1 %v3782_v30  ;;  %v3871_v29 = vld [vmem:[%s5540_s1 + $0x8e4] ss:$8 sps:$4 sm:$0xff]   ;;  %v3866_v30 = vld [vmem:[%s5540_s1 + $0x2e0] ss:$8 sps:$4 sm:$0xff]  }
  0x84   :  { %2906 = vmatpush1.bf16.msra.mxu0 %v3785_v31  ;;  %2661 = vmatprep.subr.bf16.mxu1 %v3790_v32  ;;  %v3869_v31 = vld [vmem:[%s5540_s1 + $0x8e0] ss:$8 sps:$4 sm:$0xff]   ;;  %v3874_v32 = vld [vmem:[%s5540_s1 + $0x2f4] ss:$8 sps:$4 sm:$0xff]  }
  0x85   :  { %2907 = vmatprep.subr.bf16.mxu0 %v3793_v17  ;;  %2691 = vmatprep.mubr.bf16.mxu1 %v4668_v18  ;;  %v3877_v17 = vld [vmem:[%s5540_s1 + $0x8f4] ss:$8 sps:$4 sm:$0xff]  }
  0x86   :  { %2937 = vmatprep.mubr.bf16.mxu0 %v4698_v41 }
  0x87   :  { %2662 = vmatpush1.bf16.msra.mxu1 %v3788_v34  ;;  %v3872_v34 = vld [vmem:[%s5540_s1 + $0x2f0] ss:$8 sps:$4 sm:$0xff]  }
  0x88   :  { %2908 = vmatpush1.bf16.msra.mxu0 %v3791_v36  ;;  %2663 = vmatprep.subr.bf16.mxu1 %v3796_v37  ;;  %v3875_v36 = vld [vmem:[%s5540_s1 + $0x8f0] ss:$8 sps:$4 sm:$0xff]   ;;  %v3880_v37 = vld [vmem:[%s5540_s1 + $0x304] ss:$8 sps:$4 sm:$0xff]  }
  0x89   :  { %2909 = vmatprep.subr.bf16.mxu0 %v3799_v38  ;;  %v3883_v38 = vld [vmem:[%s5540_s1 + $0x904] ss:$8 sps:$4 sm:$0xff]  }
  0x8b   :  { %2664 = vmatpush1.bf16.msra.mxu1 %v3794_v40  ;;  %v4871_v40 = vrot.slane %v4635_v22, %v4363_v49  ;;  %v3889_v22 = vld [vmem:[%s5540_s1 + $0x914] ss:$8 sps:$4 sm:$0xff]  }
  0x8c   :  { %2910 = vmatpush1.bf16.msra.mxu0 %v3797_v43  ;;  %2665 = vmatprep.subr.bf16.mxu1 %v3802_v44  ;;  %v4875_v43 = vrot.slane %v4680_v35, %v4363_v49  ;;  %v3881_v44 = vld [vmem:[%s5540_s1 + $0x900] ss:$8 sps:$4 sm:$0xff]   ;;  %v476_v35 = vcombine.high %v4668_v18, %v4668_v18  ;;  %v3892_v18 = vld [vmem:[%s5540_s1 + $0x324] ss:$8 sps:$4 sm:$0xff]  }
  0x8d   :  { %2911 = vmatprep.subr.bf16.mxu0 %v3805_v45  ;;  %v3886_v45 = vld [vmem:[%s5540_s1 + $0x314] ss:$8 sps:$4 sm:$0xff]  }
  0x8f   :  { %2666 = vmatpush1.bf16.msra.mxu1 %v3800_v46  ;;  %v573_v46 = vcombine.high %v4698_v41, %v4698_v41  ;;  %v3895_v41 = vld [vmem:[%s5540_s1 + $0x924] ss:$8 sps:$4 sm:$0xff]  }
  0x90   :  { %2912 = vmatpush1.bf16.msra.mxu0 %v3803_v47  ;;  %2667 = vmatprep.subr.bf16.mxu1 %v3808_v48  ;;  %v3884_v47 = vld [vmem:[%s5540_s1 + $0x310] ss:$8 sps:$4 sm:$0xff]  }
  0x91   :  { %2913 = vmatprep.subr.bf16.mxu0 %v3811_v50  ;;  %v3887_v48 = vld [vmem:[%s5540_s1 + $0x910] ss:$8 sps:$4 sm:$0xff]   ;;  %v3890_v50 = vld [vmem:[%s5540_s1 + $0x320] ss:$8 sps:$4 sm:$0xff]  }
  0x93   :  { %2668 = vmatpush1.bf16.msra.mxu1 %v3806_v51  ;;  %v3893_v51 = vld [vmem:[%s5540_s1 + $0x920] ss:$8 sps:$4 sm:$0xff]  }
  0x94   :  { %2914 = vmatpush1.bf16.msra.mxu0 %v3809_v53  ;;  %2669 = vmatprep.subr.bf16.mxu1 %v3814_v54  ;;  %v3898_v53 = vld [vmem:[%s5540_s1 + $0x334] ss:$8 sps:$4 sm:$0xff]  }
  0x95   :  { %2915 = vmatprep.subr.bf16.mxu0 %v3817_v55  ;;  %v3901_v54 = vld [vmem:[%s5540_s1 + $0x934] ss:$8 sps:$4 sm:$0xff]   ;;  %v3896_v55 = vld [vmem:[%s5540_s1 + $0x330] ss:$8 sps:$4 sm:$0xff]  }
  0x97   :  { %2670 = vmatpush1.bf16.msra.mxu1 %v3812_v56  ;;  %v3899_v56 = vld [vmem:[%s5540_s1 + $0x930] ss:$8 sps:$4 sm:$0xff]  }
  0x98   :  { %2916 = vmatpush1.bf16.msra.mxu0 %v3815_v57  ;;  %2671 = vmatprep.subr.bf16.mxu1 %v3820_v58  ;;  %v3904_v57 = vld [vmem:[%s5540_s1 + $0x344] ss:$8 sps:$4 sm:$0xff]  }
  0x99   :  { %2917 = vmatprep.subr.bf16.mxu0 %v3823_v59  ;;  %v3907_v58 = vld [vmem:[%s5540_s1 + $0x944] ss:$8 sps:$4 sm:$0xff]   ;;  %v3902_v59 = vld [vmem:[%s5540_s1 + $0x340] ss:$8 sps:$4 sm:$0xff]  }
  0x9b   :  { %2672 = vmatpush1.bf16.msra.mxu1 %v3818_v60  ;;  %v3905_v60 = vld [vmem:[%s5540_s1 + $0x940] ss:$8 sps:$4 sm:$0xff]  }
  0x9c   :  { %2918 = vmatpush1.bf16.msra.mxu0 %v3821_v61  ;;  %2673 = vmatprep.subr.bf16.mxu1 %v3826_v62  ;;  %v3910_v61 = vld [vmem:[%s5540_s1 + $0x354] ss:$8 sps:$4 sm:$0xff]  }
  0x9d   :  { %2919 = vmatprep.subr.bf16.mxu0 %v3829_v63  ;;  %v3913_v62 = vld [vmem:[%s5540_s1 + $0x954] ss:$8 sps:$4 sm:$0xff]   ;;  %v3908_v63 = vld [vmem:[%s5540_s1 + $0x350] ss:$8 sps:$4 sm:$0xff]  }
  0x9f   :  { %2674 = vmatpush1.bf16.msra.mxu1 %v3824_v0  ;;  %v3911_v0 = vld [vmem:[%s5540_s1 + $0x950] ss:$8 sps:$4 sm:$0xff]  }
  0xa0   :  { %2920 = vmatpush1.bf16.msra.mxu0 %v3827_v1  ;;  %2675 = vmatprep.subr.bf16.mxu1 %v3832_v2  ;;  %v3916_v1 = vld [vmem:[%s5540_s1 + $0x364] ss:$8 sps:$4 sm:$0xff]  }
  0xa1   :  { %2921 = vmatprep.subr.bf16.mxu0 %v3835_v3  ;;  %v3919_v2 = vld [vmem:[%s5540_s1 + $0x964] ss:$8 sps:$4 sm:$0xff]   ;;  %v3914_v3 = vld [vmem:[%s5540_s1 + $0x360] ss:$8 sps:$4 sm:$0xff]  }
  0xa3   :  { %2676 = vmatpush1.bf16.msra.mxu1 %v3830_v4  ;;  %v3917_v4 = vld [vmem:[%s5540_s1 + $0x960] ss:$8 sps:$4 sm:$0xff]  }
  0xa4   :  { %2922 = vmatpush1.bf16.msra.mxu0 %v3833_v5  ;;  %2677 = vmatprep.subr.bf16.mxu1 %v3838_v6  ;;  %v3922_v5 = vld [vmem:[%s5540_s1 + $0x374] ss:$8 sps:$4 sm:$0xff]  }
  0xa5   :  { %2923 = vmatprep.subr.bf16.mxu0 %v3841_v7  ;;  %v3925_v6 = vld [vmem:[%s5540_s1 + $0x974] ss:$8 sps:$4 sm:$0xff]   ;;  %v3920_v7 = vld [vmem:[%s5540_s1 + $0x370] ss:$8 sps:$4 sm:$0xff]  }
  0xa7   :  { %2678 = vmatpush1.bf16.msra.mxu1 %v3836_v8  ;;  %v3923_v8 = vld [vmem:[%s5540_s1 + $0x970] ss:$8 sps:$4 sm:$0xff]  }
  0xa8   :  { %2924 = vmatpush1.bf16.msra.mxu0 %v3839_v9  ;;  %2679 = vmatprep.subr.bf16.mxu1 %v3844_v10  ;;  %v3928_v9 = vld [vmem:[%s5540_s1 + $0x384] ss:$8 sps:$4 sm:$0xff]  }
  0xa9   :  { %2925 = vmatprep.subr.bf16.mxu0 %v3847_v11  ;;  %v3931_v10 = vld [vmem:[%s5540_s1 + $0x984] ss:$8 sps:$4 sm:$0xff]   ;;  %v3926_v11 = vld [vmem:[%s5540_s1 + $0x380] ss:$8 sps:$4 sm:$0xff]  }
  0xab   :  { %2680 = vmatpush1.bf16.msra.mxu1 %v3842_v12  ;;  %v3929_v12 = vld [vmem:[%s5540_s1 + $0x980] ss:$8 sps:$4 sm:$0xff]  }
  0xac   :  { %2926 = vmatpush1.bf16.msra.mxu0 %v3845_v13  ;;  %2681 = vmatprep.subr.bf16.mxu1 %v3850_v14  ;;  %v3934_v13 = vld [vmem:[%s5540_s1 + $0x394] ss:$8 sps:$4 sm:$0xff]  }
  0xad   :  { %2927 = vmatprep.subr.bf16.mxu0 %v3853_v15  ;;  %v3937_v14 = vld [vmem:[%s5540_s1 + $0x994] ss:$8 sps:$4 sm:$0xff]   ;;  %v3932_v15 = vld [vmem:[%s5540_s1 + $0x390] ss:$8 sps:$4 sm:$0xff]  }
  0xaf   :  { %2682 = vmatpush1.bf16.msra.mxu1 %v3848_v16  ;;  %v3935_v16 = vld [vmem:[%s5540_s1 + $0x990] ss:$8 sps:$4 sm:$0xff]  }
  0xb0   :  { %2928 = vmatpush1.bf16.msra.mxu0 %v3851_v19  ;;  %2683 = vmatprep.subr.bf16.mxu1 %v3856_v20  ;;  %v3940_v19 = vld [vmem:[%s5540_s1 + $0x3a4] ss:$8 sps:$4 sm:$0xff]  }
  0xb1   :  { %2929 = vmatprep.subr.bf16.mxu0 %v3859_v21  ;;  %v3943_v20 = vld [vmem:[%s5540_s1 + $0x9a4] ss:$8 sps:$4 sm:$0xff]   ;;  %v3938_v21 = vld [vmem:[%s5540_s1 + $0x3a0] ss:$8 sps:$4 sm:$0xff]  }
  0xb3   :  { %2684 = vmatpush1.bf16.msra.mxu1 %v3854_v52  ;;  %v3941_v52 = vld [vmem:[%s5540_s1 + $0x9a0] ss:$8 sps:$4 sm:$0xff]  }
  0xb4   :  { %2930 = vmatpush1.bf16.msra.mxu0 %v3857_v23  ;;  %2685 = vmatprep.subr.bf16.mxu1 %v3862_v24  ;;  %v3946_v23 = vld [vmem:[%s5540_s1 + $0x3b4] ss:$8 sps:$4 sm:$0xff]  }
  0xb5   :  { %2931 = vmatprep.subr.bf16.mxu0 %v3865_v25  ;;  %v3949_v24 = vld [vmem:[%s5540_s1 + $0x9b4] ss:$8 sps:$4 sm:$0xff]   ;;  %v3944_v25 = vld [vmem:[%s5540_s1 + $0x3b0] ss:$8 sps:$4 sm:$0xff]  }
  0xb7   :  { %2686 = vmatpush1.bf16.msra.mxu1 %v3860_v26  ;;  %v3947_v26 = vld [vmem:[%s5540_s1 + $0x9b0] ss:$8 sps:$4 sm:$0xff]  }
  0xb8   :  { %2932 = vmatpush1.bf16.msra.mxu0 %v3863_v27  ;;  %2687 = vmatprep.subr.bf16.mxu1 %v3868_v28  ;;  %v3952_v27 = vld [vmem:[%s5540_s1 + $0x3c4] ss:$8 sps:$4 sm:$0xff]  }
  0xb9   :  { %2933 = vmatprep.subr.bf16.mxu0 %v3871_v29  ;;  %v3955_v28 = vld [vmem:[%s5540_s1 + $0x9c4] ss:$8 sps:$4 sm:$0xff]   ;;  %v3950_v29 = vld [vmem:[%s5540_s1 + $0x3c0] ss:$8 sps:$4 sm:$0xff]  }
  0xbb   :  { %2688 = vmatpush1.bf16.msra.mxu1 %v3866_v30  ;;  %v3953_v30 = vld [vmem:[%s5540_s1 + $0x9c0] ss:$8 sps:$4 sm:$0xff]  }
  0xbc   :  { %2934 = vmatpush1.bf16.msra.mxu0 %v3869_v31  ;;  %2689 = vmatprep.subr.bf16.mxu1 %v3874_v32  ;;  %v3958_v31 = vld [vmem:[%s5540_s1 + $0x3d4] ss:$8 sps:$4 sm:$0xff]  }
  0xbd   :  { %2935 = vmatprep.subr.bf16.mxu0 %v3877_v17  ;;  %v3961_v32 = vld [vmem:[%s5540_s1 + $0x9d4] ss:$8 sps:$4 sm:$0xff]   ;;  %v3956_v17 = vld [vmem:[%s5540_s1 + $0x3d0] ss:$8 sps:$4 sm:$0xff]  }
  0xbf   :  { %2690 = vmatpush1.bf16.msra.mxu1 %v3872_v34  ;;  %v3959_v34 = vld [vmem:[%s5540_s1 + $0x9d0] ss:$8 sps:$4 sm:$0xff]  }
  0xc0   :  { %2936 = vmatpush1.bf16.msra.mxu0 %v3875_v36  ;;  %2700 = vmatprep.subr.bf16.mxu1 %v3880_v37  ;;  %v3964_v36 = vld [vmem:[%s5540_s1 + $0x3e4] ss:$8 sps:$4 sm:$0xff]  }
  0xc1   :  { %2946 = vmatprep.subr.bf16.mxu0 %v3883_v38  ;;  %v3967_v37 = vld [vmem:[%s5540_s1 + $0x9e4] ss:$8 sps:$4 sm:$0xff]   ;;  %v526_v38 = vcombine.high %v4673_v33, %v4673_v33  ;;  %v3973_v33 = vld [vmem:[%s5540_s1 + $0x9f4] ss:$8 sps:$4 sm:$0xff]  }
  0xc2   :  { %2692 = vmatmul.mubr.bf16.vlgmr.msra.gmra.mrb[0].mxu1 %v4871_v40 }
  0xc3   :  { %2938 = vmatmul.mubr.bf16.vlgmr.msra.gmra.mrb[0].mxu0 %v4875_v43  ;;  %2701 = vmatpush1.bf16.msra.mxu1 %v3878_v39  ;;  %v3962_v39 = vld [vmem:[%s5540_s1 + $0x3e0] ss:$8 sps:$4 sm:$0xff]  }
  0xc4   :  { %2947 = vmatpush1.bf16.msra.mxu0 %v3881_v44  ;;  %2702 = vmatprep.subr.bf16.mxu1 %v3886_v45  ;;  %v3965_v44 = vld [vmem:[%s5540_s1 + $0x9e0] ss:$8 sps:$4 sm:$0xff]   ;;  %v3970_v45 = vld [vmem:[%s5540_s1 + $0x3f4] ss:$8 sps:$4 sm:$0xff]  }
  0xc5   :  { %2948 = vmatprep.subr.bf16.mxu0 %v3889_v22  ;;  %2732 = vmatprep.mubr.bf16.mxu1 %v476_v35  ;;  %v5065_v22 = vld.sshfl [vmem:[%s5539_s0 + $0x8] sm:$0xff pattern:$0x75316420]  ;;  %v5068_v35 = vrot.slane %v526_v38, %v4363_v49 }
  0xc6   :  { %2978 = vmatprep.mubr.bf16.mxu0 %v573_v46  ;;  %v3968_v46 = vld [vmem:[%s5540_s1 + $0x3f0] ss:$8 sps:$4 sm:$0xff]  }
  0xc7   :  { %2703 = vmatpush1.bf16.msra.mxu1 %v3884_v47  ;;  %v3971_v47 = vld [vmem:[%s5540_s1 + $0x9f0] ss:$8 sps:$4 sm:$0xff]  }
  0xc8   :  { %2949 = vmatpush1.bf16.msra.mxu0 %v3887_v48  ;;  %2704 = vmatprep.subr.bf16.mxu1 %v3892_v18  ;;  %v3976_v48 = vld [vmem:[%s5540_s1 + $0x404] ss:$8 sps:$4 sm:$0xff]  }
  0xc9   :  { %2950 = vmatprep.subr.bf16.mxu0 %v3895_v41  ;;  %v3979_v18 = vld [vmem:[%s5540_s1 + $0xa04] ss:$8 sps:$4 sm:$0xff]   ;;  %v492_v41 = vcombine.high %v5065_v22, %v5065_v22 }
  0xcb   :  { %2705 = vmatpush1.bf16.msra.mxu1 %v3890_v50  ;;  %v542_v50 = vcombine.high %v5068_v35, %v5068_v35 }
  0xcc   :  { %2951 = vmatpush1.bf16.msra.mxu0 %v3893_v51  ;;  %2706 = vmatprep.subr.bf16.mxu1 %v3898_v53  ;;  %v3974_v51 = vld [vmem:[%s5540_s1 + $0x400] ss:$8 sps:$4 sm:$0xff]   ;;  %v474_v53 = vcombine.high %v4871_v40, %v4871_v40  ;;  %v5103_v40 = vrot.slane %v492_v41, %v4363_v49 }
  0xcd   :  { %2952 = vmatprep.subr.bf16.mxu0 %v3901_v54  ;;  %v571_v54 = vcombine.high %v4875_v43, %v4875_v43  ;;  %v5106_v43 = vrot.slane %v542_v50, %v4363_v49 }
  0xcf   :  { %2707 = vmatpush1.bf16.msra.mxu1 %v3896_v55  ;;  %v3977_v55 = vld [vmem:[%s5540_s1 + $0xa00] ss:$8 sps:$4 sm:$0xff]  }
  0xd0   :  { %2953 = vmatpush1.bf16.msra.mxu0 %v3899_v56  ;;  %2708 = vmatprep.subr.bf16.mxu1 %v3904_v57  ;;  %v3982_v56 = vld [vmem:[%s5540_s1 + $0x414] ss:$8 sps:$4 sm:$0xff]  }
  0xd1   :  { %2954 = vmatprep.subr.bf16.mxu0 %v3907_v58  ;;  %v3985_v57 = vld [vmem:[%s5540_s1 + $0xa14] ss:$8 sps:$4 sm:$0xff]   ;;  %v3980_v58 = vld [vmem:[%s5540_s1 + $0x410] ss:$8 sps:$4 sm:$0xff]  }
  0xd3   :  { %2709 = vmatpush1.bf16.msra.mxu1 %v3902_v59  ;;  %v3983_v59 = vld [vmem:[%s5540_s1 + $0xa10] ss:$8 sps:$4 sm:$0xff]  }
  0xd4   :  { %2955 = vmatpush1.bf16.msra.mxu0 %v3905_v60  ;;  %2710 = vmatprep.subr.bf16.mxu1 %v3910_v61  ;;  %v3988_v60 = vld [vmem:[%s5540_s1 + $0x424] ss:$8 sps:$4 sm:$0xff]  }
  0xd5   :  { %2956 = vmatprep.subr.bf16.mxu0 %v3913_v62  ;;  %v3991_v61 = vld [vmem:[%s5540_s1 + $0xa24] ss:$8 sps:$4 sm:$0xff]  }
  0xd7   :  { %2711 = vmatpush1.bf16.msra.mxu1 %v3908_v63 }
  0xd8   :  { %2957 = vmatpush1.bf16.msra.mxu0 %v3911_v0  ;;  %2712 = vmatprep.subr.bf16.mxu1 %v3916_v1 }
  0xd9   :  { %2958 = vmatprep.subr.bf16.mxu0 %v3919_v2 }
  0xdb   :  { %2713 = vmatpush1.bf16.msra.mxu1 %v3914_v3 }
  0xdc   :  { %2959 = vmatpush1.bf16.msra.mxu0 %v3917_v4  ;;  %2714 = vmatprep.subr.bf16.mxu1 %v3922_v5 }
  0xdd   :  { %2960 = vmatprep.subr.bf16.mxu0 %v3925_v6 }
  0xdf   :  { %2715 = vmatpush1.bf16.msra.mxu1 %v3920_v7 }
  0xe0   :  { %2961 = vmatpush1.bf16.msra.mxu0 %v3923_v8  ;;  %2716 = vmatprep.subr.bf16.mxu1 %v3928_v9 }
  0xe1   :  { %2962 = vmatprep.subr.bf16.mxu0 %v3931_v10 }
  0xe3   :  { %2717 = vmatpush1.bf16.msra.mxu1 %v3926_v11 }
  0xe4   :  { %2963 = vmatpush1.bf16.msra.mxu0 %v3929_v12  ;;  %2718 = vmatprep.subr.bf16.mxu1 %v3934_v13 }
  0xe5   :  { %2964 = vmatprep.subr.bf16.mxu0 %v3937_v14 }
  0xe7   :  { %2719 = vmatpush1.bf16.msra.mxu1 %v3932_v15 }
  0xe8   :  { %2965 = vmatpush1.bf16.msra.mxu0 %v3935_v16  ;;  %2720 = vmatprep.subr.bf16.mxu1 %v3940_v19 }
  0xe9   :  { %2966 = vmatprep.subr.bf16.mxu0 %v3943_v20 }
  0xeb   :  { %2721 = vmatpush1.bf16.msra.mxu1 %v3938_v21 }
  0xec   :  { %2967 = vmatpush1.bf16.msra.mxu0 %v3941_v52  ;;  %2722 = vmatprep.subr.bf16.mxu1 %v3946_v23 }
  0xed   :  { %2968 = vmatprep.subr.bf16.mxu0 %v3949_v24 }
  0xef   :  { %2723 = vmatpush1.bf16.msra.mxu1 %v3944_v25 }
  0xf0   :  { %2969 = vmatpush1.bf16.msra.mxu0 %v3947_v26  ;;  %2724 = vmatprep.subr.bf16.mxu1 %v3952_v27 }
  0xf1   :  { %2970 = vmatprep.subr.bf16.mxu0 %v3955_v28 }
  0xf3   :  { %2725 = vmatpush1.bf16.msra.mxu1 %v3950_v29 }
  0xf4   :  { %2971 = vmatpush1.bf16.msra.mxu0 %v3953_v30  ;;  %2726 = vmatprep.subr.bf16.mxu1 %v3958_v31 }
  0xf5   :  { %2972 = vmatprep.subr.bf16.mxu0 %v3961_v32 }
  0xf7   :  { %2727 = vmatpush1.bf16.msra.mxu1 %v3956_v17 }
  0xf8   :  { %2973 = vmatpush1.bf16.msra.mxu0 %v3959_v34  ;;  %2728 = vmatprep.subr.bf16.mxu1 %v3964_v36 }
  0xf9   :  { %2974 = vmatprep.subr.bf16.mxu0 %v3967_v37 }
  0xfb   :  { %2729 = vmatpush1.bf16.msra.mxu1 %v3962_v39 }
  0xfc   :  { %2975 = vmatpush1.bf16.msra.mxu0 %v3965_v44  ;;  %2730 = vmatprep.subr.bf16.mxu1 %v3970_v45 }
  0xfd   :  { %2976 = vmatprep.subr.bf16.mxu0 %v3973_v33 }
  0xff   :  { %2731 = vmatpush1.bf16.msra.mxu1 %v3968_v46 }
 0x100   :  { %2977 = vmatpush1.bf16.msra.mxu0 %v3971_v47  ;;  %2741 = vmatprep.subr.bf16.mxu1 %v3976_v48 }
 0x101   :  { %2987 = vmatprep.subr.bf16.mxu0 %v3979_v18 }
 0x102   :  { %2733 = vmatmul.mubr.bf16.vlgmr.msra.gmra.mrb[0].mxu1 %v474_v53 }
 0x103   :  { %2979 = vmatmul.mubr.bf16.vlgmr.msra.gmra.mrb[0].mxu0 %v571_v54  ;;  %2742 = vmatpush1.bf16.msra.mxu1 %v3974_v51 }
 0x104   :  { %2988 = vmatpush1.bf16.msra.mxu0 %v3977_v55  ;;  %2743 = vmatprep.subr.bf16.mxu1 %v3982_v56 }
 0x105   :  { %2989 = vmatprep.subr.bf16.mxu0 %v3985_v57 }
 0x106   :  { %8 = vsyncpa [#allocation3], 0  ;;  %2773 = vmatprep.mubr.bf16.mxu1 %v5103_v40  ;;  %3019 = vmatprep.mubr.bf16.mxu0 %v5106_v43  ;;  %v3986_v62 = vld [vmem:[%s5540_s1 + $0x420] ss:$8 sps:$4 sm:$0xff]   ;;  %v3994_v0 = vld [vmem:[%s5540_s1 + $0x434] ss:$8 sps:$4 sm:$0xff]  }
 0x107   :  { %2744 = vmatpush1.bf16.msra.mxu1 %v3980_v58  ;;  %v3989_v63 = vld [vmem:[%s5540_s1 + $0xa20] ss:$8 sps:$4 sm:$0xff]   ;;  %v3997_v1 = vld [vmem:[%s5540_s1 + $0xa34] ss:$8 sps:$4 sm:$0xff]   ;;  %v3992_v2 = vld [vmem:[%s5540_s1 + $0x430] ss:$8 sps:$4 sm:$0xff]  }
 0x108   :  { %2990 = vmatpush1.bf16.msra.mxu0 %v3983_v59  ;;  %2745 = vmatprep.subr.bf16.mxu1 %v3988_v60  ;;  %v3995_v3 = vld [vmem:[%s5540_s1 + $0xa30] ss:$8 sps:$4 sm:$0xff]   ;;  %v4000_v4 = vld [vmem:[%s5540_s1 + $0x444] ss:$8 sps:$4 sm:$0xff]   ;;  %v3998_v6 = vld [vmem:[%s5540_s1 + $0x440] ss:$8 sps:$4 sm:$0xff]   ;;  %v5292_v60 = vrot.slane %v5065_v22, %v4363_v49 }
 0x109   :  { %2991 = vmatprep.subr.bf16.mxu0 %v3991_v61  ;;  %v4003_v5 = vld [vmem:[%s5540_s1 + $0xa44] ss:$8 sps:$4 sm:$0xff]   ;;  %v4001_v7 = vld [vmem:[%s5540_s1 + $0xa40] ss:$8 sps:$4 sm:$0xff]   ;;  %v4006_v8 = vld [vmem:[%s5540_s1 + $0x454] ss:$8 sps:$4 sm:$0xff]   ;;  %v5296_v61 = vrot.slane %v5068_v35, %v4363_v49 }
 0x10a   :  { %v4009_v9 = vld [vmem:[%s5540_s1 + $0xa54] ss:$8 sps:$4 sm:$0xff]   ;;  %v4004_v10 = vld [vmem:[%s5540_s1 + $0x450] ss:$8 sps:$4 sm:$0xff]   ;;  %v4012_v12 = vld [vmem:[%s5540_s1 + $0x464] ss:$8 sps:$4 sm:$0xff]  }
 0x10b   :  { %2746 = vmatpush1.bf16.msra.mxu1 %v3986_v62  ;;  %v4007_v11 = vld [vmem:[%s5540_s1 + $0xa50] ss:$8 sps:$4 sm:$0xff]   ;;  %v4015_v13 = vld [vmem:[%s5540_s1 + $0xa64] ss:$8 sps:$4 sm:$0xff]   ;;  %v4010_v14 = vld [vmem:[%s5540_s1 + $0x460] ss:$8 sps:$4 sm:$0xff]  }
 0x10c   :  { %2992 = vmatpush1.bf16.msra.mxu0 %v3989_v63  ;;  %2747 = vmatprep.subr.bf16.mxu1 %v3994_v0  ;;  %v4013_v15 = vld [vmem:[%s5540_s1 + $0xa60] ss:$8 sps:$4 sm:$0xff]   ;;  %v4018_v16 = vld [vmem:[%s5540_s1 + $0x474] ss:$8 sps:$4 sm:$0xff]   ;;  %v4016_v20 = vld [vmem:[%s5540_s1 + $0x470] ss:$8 sps:$4 sm:$0xff]   ;;  %v524_v0 = vcombine.high %v5103_v40, %v5103_v40 }
 0x10d   :  { %2993 = vmatprep.subr.bf16.mxu0 %v3997_v1  ;;  %v4021_v19 = vld [vmem:[%s5540_s1 + $0xa74] ss:$8 sps:$4 sm:$0xff]   ;;  %v4019_v21 = vld [vmem:[%s5540_s1 + $0xa70] ss:$8 sps:$4 sm:$0xff]   ;;  %v4024_v52 = vld [vmem:[%s5540_s1 + $0x484] ss:$8 sps:$4 sm:$0xff]   ;;  %v574_v1 = vcombine.high %v5106_v43, %v5106_v43 }
 0x10e   :  { %v4027_v23 = vld [vmem:[%s5540_s1 + $0xa84] ss:$8 sps:$4 sm:$0xff]   ;;  %v4022_v24 = vld [vmem:[%s5540_s1 + $0x480] ss:$8 sps:$4 sm:$0xff]   ;;  %v4030_v26 = vld [vmem:[%s5540_s1 + $0x494] ss:$8 sps:$4 sm:$0xff]  }
 0x10f   :  { %2748 = vmatpush1.bf16.msra.mxu1 %v3992_v2  ;;  %v4025_v25 = vld [vmem:[%s5540_s1 + $0xa80] ss:$8 sps:$4 sm:$0xff]   ;;  %v4033_v27 = vld [vmem:[%s5540_s1 + $0xa94] ss:$8 sps:$4 sm:$0xff]   ;;  %v4028_v28 = vld [vmem:[%s5540_s1 + $0x490] ss:$8 sps:$4 sm:$0xff]  }
 0x110   :  { %2994 = vmatpush1.bf16.msra.mxu0 %v3995_v3  ;;  %2749 = vmatprep.subr.bf16.mxu1 %v4000_v4  ;;  %v4031_v29 = vld [vmem:[%s5540_s1 + $0xa90] ss:$8 sps:$4 sm:$0xff]   ;;  %v4036_v30 = vld [vmem:[%s5540_s1 + $0x4a4] ss:$8 sps:$4 sm:$0xff]   ;;  %v4034_v32 = vld [vmem:[%s5540_s1 + $0x4a0] ss:$8 sps:$4 sm:$0xff]  }
 0x111   :  { %2995 = vmatprep.subr.bf16.mxu0 %v4003_v5  ;;  %v4039_v31 = vld [vmem:[%s5540_s1 + $0xaa4] ss:$8 sps:$4 sm:$0xff]   ;;  %v4037_v17 = vld [vmem:[%s5540_s1 + $0xaa0] ss:$8 sps:$4 sm:$0xff]   ;;  %v4042_v34 = vld [vmem:[%s5540_s1 + $0x4b4] ss:$8 sps:$4 sm:$0xff]  }
 0x112   :  { %v4045_v36 = vld [vmem:[%s5540_s1 + $0xab4] ss:$8 sps:$4 sm:$0xff]   ;;  %v4040_v37 = vld [vmem:[%s5540_s1 + $0x4b0] ss:$8 sps:$4 sm:$0xff]   ;;  %v4048_v39 = vld [vmem:[%s5540_s1 + $0x4c4] ss:$8 sps:$4 sm:$0xff]  }
 0x113   :  { %2750 = vmatpush1.bf16.msra.mxu1 %v3998_v6  ;;  %v4043_v38 = vld [vmem:[%s5540_s1 + $0xab0] ss:$8 sps:$4 sm:$0xff]   ;;  %v4051_v44 = vld [vmem:[%s5540_s1 + $0xac4] ss:$8 sps:$4 sm:$0xff]   ;;  %v4046_v45 = vld [vmem:[%s5540_s1 + $0x4c0] ss:$8 sps:$4 sm:$0xff]  }
 0x114   :  { %2996 = vmatpush1.bf16.msra.mxu0 %v4001_v7  ;;  %2751 = vmatprep.subr.bf16.mxu1 %v4006_v8  ;;  %v4049_v33 = vld [vmem:[%s5540_s1 + $0xac0] ss:$8 sps:$4 sm:$0xff]   ;;  %v4054_v46 = vld [vmem:[%s5540_s1 + $0x4d4] ss:$8 sps:$4 sm:$0xff]   ;;  %v4052_v48 = vld [vmem:[%s5540_s1 + $0x4d0] ss:$8 sps:$4 sm:$0xff]  }
 0x115   :  { %2997 = vmatprep.subr.bf16.mxu0 %v4009_v9  ;;  %v4057_v47 = vld [vmem:[%s5540_s1 + $0xad4] ss:$8 sps:$4 sm:$0xff]   ;;  %v4055_v18 = vld [vmem:[%s5540_s1 + $0xad0] ss:$8 sps:$4 sm:$0xff]   ;;  %v4060_v41 = vld [vmem:[%s5540_s1 + $0x4e4] ss:$8 sps:$4 sm:$0xff]  }
 0x116   :  { %v4063_v50 = vld [vmem:[%s5540_s1 + $0xae4] ss:$8 sps:$4 sm:$0xff]   ;;  %v4058_v51 = vld [vmem:[%s5540_s1 + $0x4e0] ss:$8 sps:$4 sm:$0xff]   ;;  %v4066_v54 = vld [vmem:[%s5540_s1 + $0x4f4] ss:$8 sps:$4 sm:$0xff]  }
 0x117   :  { %2752 = vmatpush1.bf16.msra.mxu1 %v4004_v10  ;;  %v4061_v53 = vld [vmem:[%s5540_s1 + $0xae0] ss:$8 sps:$4 sm:$0xff]   ;;  %v4069_v55 = vld [vmem:[%s5540_s1 + $0xaf4] ss:$8 sps:$4 sm:$0xff]   ;;  %v4064_v56 = vld [vmem:[%s5540_s1 + $0x4f0] ss:$8 sps:$4 sm:$0xff]  }
 0x118   :  { %2998 = vmatpush1.bf16.msra.mxu0 %v4007_v11  ;;  %2753 = vmatprep.subr.bf16.mxu1 %v4012_v12  ;;  %v4067_v57 = vld [vmem:[%s5540_s1 + $0xaf0] ss:$8 sps:$4 sm:$0xff]   ;;  %v4072_v58 = vld [vmem:[%s5540_s1 + $0x504] ss:$8 sps:$4 sm:$0xff]   ;;  %v4070_v62 = vld [vmem:[%s5540_s1 + $0x500] ss:$8 sps:$4 sm:$0xff]  }
 0x119   :  { %2999 = vmatprep.subr.bf16.mxu0 %v4015_v13  ;;  %v4076_v59 = vld [vmem:[%s5540_s1 + $0xb04] ss:$8 sps:$4 sm:$0xff]   ;;  %v4074_v63 = vld [vmem:[%s5540_s1 + $0xb00] ss:$8 sps:$4 sm:$0xff]   ;;  %v4079_v22 = vld [vmem:[%s5540_s1 + $0x514] ss:$8 sps:$4 sm:$0xff]  }
 0x11a   :  { %v4082_v35 = vld [vmem:[%s5540_s1 + $0xb14] ss:$8 sps:$4 sm:$0xff]   ;;  %v4077_v2 = vld [vmem:[%s5540_s1 + $0x510] ss:$8 sps:$4 sm:$0xff]   ;;  %v4085_v40 = vld [vmem:[%s5540_s1 + $0x524] ss:$8 sps:$4 sm:$0xff]  }
 0x11b   :  { %2754 = vmatpush1.bf16.msra.mxu1 %v4010_v14  ;;  %v4080_v3 = vld [vmem:[%s5540_s1 + $0xb10] ss:$8 sps:$4 sm:$0xff]   ;;  %v4088_v43 = vld [vmem:[%s5540_s1 + $0xb24] ss:$8 sps:$4 sm:$0xff]   ;;  %v4083_v4 = vld [vmem:[%s5540_s1 + $0x520] ss:$8 sps:$4 sm:$0xff]  }
 0x11c   :  { %3000 = vmatpush1.bf16.msra.mxu0 %v4013_v15  ;;  %2755 = vmatprep.subr.bf16.mxu1 %v4018_v16  ;;  %v4086_v5 = vld [vmem:[%s5540_s1 + $0xb20] ss:$8 sps:$4 sm:$0xff]   ;;  %v4091_v6 = vld [vmem:[%s5540_s1 + $0x534] ss:$8 sps:$4 sm:$0xff]   ;;  %v4089_v8 = vld [vmem:[%s5540_s1 + $0x530] ss:$8 sps:$4 sm:$0xff]  }
 0x11d   :  { %3001 = vmatprep.subr.bf16.mxu0 %v4021_v19  ;;  %v4094_v7 = vld [vmem:[%s5540_s1 + $0xb34] ss:$8 sps:$4 sm:$0xff]   ;;  %v4092_v9 = vld [vmem:[%s5540_s1 + $0xb30] ss:$8 sps:$4 sm:$0xff]   ;;  %v4097_v10 = vld [vmem:[%s5540_s1 + $0x544] ss:$8 sps:$4 sm:$0xff]  }
 0x11e   :  { %v4100_v11 = vld [vmem:[%s5540_s1 + $0xb44] ss:$8 sps:$4 sm:$0xff]   ;;  %v4095_v12 = vld [vmem:[%s5540_s1 + $0x540] ss:$8 sps:$4 sm:$0xff]   ;;  %v4103_v14 = vld [vmem:[%s5540_s1 + $0x554] ss:$8 sps:$4 sm:$0xff]  }
 0x11f   :  { %2756 = vmatpush1.bf16.msra.mxu1 %v4016_v20  ;;  %v4098_v13 = vld [vmem:[%s5540_s1 + $0xb40] ss:$8 sps:$4 sm:$0xff]   ;;  %v4106_v15 = vld [vmem:[%s5540_s1 + $0xb54] ss:$8 sps:$4 sm:$0xff]   ;;  %v4101_v16 = vld [vmem:[%s5540_s1 + $0x550] ss:$8 sps:$4 sm:$0xff]  }
 0x120   :  { %3002 = vmatpush1.bf16.msra.mxu0 %v4019_v21  ;;  %2757 = vmatprep.subr.bf16.mxu1 %v4024_v52  ;;  %v4104_v19 = vld [vmem:[%s5540_s1 + $0xb50] ss:$8 sps:$4 sm:$0xff]   ;;  %v4109_v20 = vld [vmem:[%s5540_s1 + $0x564] ss:$8 sps:$4 sm:$0xff]   ;;  %v4107_v52 = vld [vmem:[%s5540_s1 + $0x560] ss:$8 sps:$4 sm:$0xff]  }
 0x121   :  { %3003 = vmatprep.subr.bf16.mxu0 %v4027_v23  ;;  %v4112_v21 = vld [vmem:[%s5540_s1 + $0xb64] ss:$8 sps:$4 sm:$0xff]   ;;  %v4110_v23 = vld [vmem:[%s5540_s1 + $0xb60] ss:$8 sps:$4 sm:$0xff]   ;;  %vm2573_vm0 = vcmask 523264  }
 0x123   :  { %2758 = vmatpush1.bf16.msra.mxu1 %v4022_v24  ;;  %v4115_v24 = vld [vmem:[%s5540_s1 + $0x574] ss:$8 sps:$4 sm:$0xff]  }
 0x124   :  { %3004 = vmatpush1.bf16.msra.mxu0 %v4025_v25  ;;  %2759 = vmatprep.subr.bf16.mxu1 %v4030_v26  ;;  %v4118_v25 = vld [vmem:[%s5540_s1 + $0xb74] ss:$8 sps:$4 sm:$0xff]   ;;  %v4113_v26 = vld [vmem:[%s5540_s1 + $0x570] ss:$8 sps:$4 sm:$0xff]  }
 0x125   :  { %3005 = vmatprep.subr.bf16.mxu0 %v4033_v27  ;;  %v4116_v27 = vld [vmem:[%s5540_s1 + $0xb70] ss:$8 sps:$4 sm:$0xff]  }
 0x127   :  { %2760 = vmatpush1.bf16.msra.mxu1 %v4028_v28  ;;  %v4121_v28 = vld [vmem:[%s5540_s1 + $0x584] ss:$8 sps:$4 sm:$0xff]  }
 0x128   :  { %3006 = vmatpush1.bf16.msra.mxu0 %v4031_v29  ;;  %2761 = vmatprep.subr.bf16.mxu1 %v4036_v30  ;;  %v4124_v29 = vld [vmem:[%s5540_s1 + $0xb84] ss:$8 sps:$4 sm:$0xff]   ;;  %v4119_v30 = vld [vmem:[%s5540_s1 + $0x580] ss:$8 sps:$4 sm:$0xff]  }
 0x129   :  { %3007 = vmatprep.subr.bf16.mxu0 %v4039_v31  ;;  %v4122_v31 = vld [vmem:[%s5540_s1 + $0xb80] ss:$8 sps:$4 sm:$0xff]  }
 0x12b   :  { %2762 = vmatpush1.bf16.msra.mxu1 %v4034_v32  ;;  %v4127_v32 = vld [vmem:[%s5540_s1 + $0x594] ss:$8 sps:$4 sm:$0xff]  }
 0x12c   :  { %3008 = vmatpush1.bf16.msra.mxu0 %v4037_v17  ;;  %2763 = vmatprep.subr.bf16.mxu1 %v4042_v34  ;;  %v4130_v17 = vld [vmem:[%s5540_s1 + $0xb94] ss:$8 sps:$4 sm:$0xff]   ;;  %v4125_v34 = vld [vmem:[%s5540_s1 + $0x590] ss:$8 sps:$4 sm:$0xff]  }
 0x12d   :  { %3009 = vmatprep.subr.bf16.mxu0 %v4045_v36  ;;  %v4128_v36 = vld [vmem:[%s5540_s1 + $0xb90] ss:$8 sps:$4 sm:$0xff]  }
 0x12f   :  { %2764 = vmatpush1.bf16.msra.mxu1 %v4040_v37  ;;  %v4133_v37 = vld [vmem:[%s5540_s1 + $0x5a4] ss:$8 sps:$4 sm:$0xff]  }
 0x130   :  { %3010 = vmatpush1.bf16.msra.mxu0 %v4043_v38  ;;  %2765 = vmatprep.subr.bf16.mxu1 %v4048_v39  ;;  %v4136_v38 = vld [vmem:[%s5540_s1 + $0xba4] ss:$8 sps:$4 sm:$0xff]   ;;  %v4131_v39 = vld [vmem:[%s5540_s1 + $0x5a0] ss:$8 sps:$4 sm:$0xff]  }
 0x131   :  { %3011 = vmatprep.subr.bf16.mxu0 %v4051_v44  ;;  %v4134_v44 = vld [vmem:[%s5540_s1 + $0xba0] ss:$8 sps:$4 sm:$0xff]  }
 0x133   :  { %2766 = vmatpush1.bf16.msra.mxu1 %v4046_v45  ;;  %v4139_v45 = vld [vmem:[%s5540_s1 + $0x5b4] ss:$8 sps:$4 sm:$0xff]  }
 0x134   :  { %3012 = vmatpush1.bf16.msra.mxu0 %v4049_v33  ;;  %2767 = vmatprep.subr.bf16.mxu1 %v4054_v46  ;;  %v4142_v33 = vld [vmem:[%s5540_s1 + $0xbb4] ss:$8 sps:$4 sm:$0xff]   ;;  %v4137_v46 = vld [vmem:[%s5540_s1 + $0x5b0] ss:$8 sps:$4 sm:$0xff]  }
 0x135   :  { %3013 = vmatprep.subr.bf16.mxu0 %v4057_v47  ;;  %v4140_v47 = vld [vmem:[%s5540_s1 + $0xbb0] ss:$8 sps:$4 sm:$0xff]  }
 0x137   :  { %2768 = vmatpush1.bf16.msra.mxu1 %v4052_v48  ;;  %v4145_v48 = vld [vmem:[%s5540_s1 + $0x5c4] ss:$8 sps:$4 sm:$0xff]  }
 0x138   :  { %3014 = vmatpush1.bf16.msra.mxu0 %v4055_v18  ;;  %2769 = vmatprep.subr.bf16.mxu1 %v4060_v41  ;;  %v4148_v18 = vld [vmem:[%s5540_s1 + $0xbc4] ss:$8 sps:$4 sm:$0xff]   ;;  %v4143_v41 = vld [vmem:[%s5540_s1 + $0x5c0] ss:$8 sps:$4 sm:$0xff]  }
 0x139   :  { %3015 = vmatprep.subr.bf16.mxu0 %v4063_v50  ;;  %v4146_v50 = vld [vmem:[%s5540_s1 + $0xbc0] ss:$8 sps:$4 sm:$0xff]  }
 0x13b   :  { %2770 = vmatpush1.bf16.msra.mxu1 %v4058_v51  ;;  %v4151_v51 = vld [vmem:[%s5540_s1 + $0x5d4] ss:$8 sps:$4 sm:$0xff]  }
 0x13c   :  { %3016 = vmatpush1.bf16.msra.mxu0 %v4061_v53  ;;  %2771 = vmatprep.subr.bf16.mxu1 %v4066_v54  ;;  %v4154_v53 = vld [vmem:[%s5540_s1 + $0xbd4] ss:$8 sps:$4 sm:$0xff]   ;;  %v4149_v54 = vld [vmem:[%s5540_s1 + $0x5d0] ss:$8 sps:$4 sm:$0xff]  }
 0x13d   :  { %3017 = vmatprep.subr.bf16.mxu0 %v4069_v55  ;;  %v4152_v55 = vld [vmem:[%s5540_s1 + $0xbd0] ss:$8 sps:$4 sm:$0xff]  }
 0x13f   :  { %2772 = vmatpush1.bf16.msra.mxu1 %v4064_v56  ;;  %v4157_v56 = vld [vmem:[%s5540_s1 + $0x5e4] ss:$8 sps:$4 sm:$0xff]  }
 0x140   :  { %3018 = vmatpush1.bf16.msra.mxu0 %v4067_v57  ;;  %2782 = vmatprep.subr.bf16.mxu1 %v4072_v58  ;;  %v4160_v57 = vld [vmem:[%s5540_s1 + $0xbe4] ss:$8 sps:$4 sm:$0xff]   ;;  %v4155_v58 = vld [vmem:[%s5540_s1 + $0x5e0] ss:$8 sps:$4 sm:$0xff]  }
 0x141   :  { %3028 = vmatprep.subr.bf16.mxu0 %v4076_v59  ;;  %v4158_v59 = vld [vmem:[%s5540_s1 + $0xbe0] ss:$8 sps:$4 sm:$0xff]  }
 0x142   :  { %2774 = vmatmul.mubr.bf16.vlgmr.msra.gmra.mrb[0].mxu1 %v5292_v60 }
 0x143   :  { %3020 = vmatmul.mubr.bf16.vlgmr.msra.gmra.mrb[0].mxu0 %v5296_v61  ;;  %2783 = vmatpush1.bf16.msra.mxu1 %v4070_v62  ;;  %v4163_v62 = vld [vmem:[%s5540_s1 + $0x5f4] ss:$8 sps:$4 sm:$0xff]  }
 0x144   :  { %3029 = vmatpush1.bf16.msra.mxu0 %v4074_v63  ;;  %2784 = vmatprep.subr.bf16.mxu1 %v4079_v22  ;;  %v4166_v63 = vld [vmem:[%s5540_s1 + $0xbf4] ss:$8 sps:$4 sm:$0xff]   ;;  %v4161_v22 = vld [vmem:[%s5540_s1 + $0x5f0] ss:$8 sps:$4 sm:$0xff]  }
 0x145   :  { %3030 = vmatprep.subr.bf16.mxu0 %v4082_v35  ;;  %2814 = vmatprep.mubr.bf16.mxu1 %v524_v0  ;;  %v4164_v35 = vld [vmem:[%s5540_s1 + $0xbf0] ss:$8 sps:$4 sm:$0xff]   ;;  %v4169_v0 = vld [vmem:[%s5540_s1 + $0xc04] ss:$8 sps:$4 sm:$0xff]  }
 0x146   :  { %3060 = vmatprep.mubr.bf16.mxu0 %v574_v1  ;;  %v522_v1 = vcombine.high %v5292_v60, %v5292_v60  ;;  %v4170_v60 = vld [vmem:[%s5540_s1 + $0xc10] ss:$8 sps:$4 sm:$0xff]  }
 0x147   :  { %2785 = vmatpush1.bf16.msra.mxu1 %v4077_v2  ;;  %v572_v2 = vcombine.high %v5296_v61, %v5296_v61  ;;  %v4175_v61 = vld [vmem:[%s5540_s1 + $0xc24] ss:$8 sps:$4 sm:$0xff]  }
 0x148   :  { %3031 = vmatpush1.bf16.msra.mxu0 %v4080_v3  ;;  %2786 = vmatprep.subr.bf16.mxu1 %v4085_v40  ;;  %v4167_v3 = vld [vmem:[%s5540_s1 + $0xc00] ss:$8 sps:$4 sm:$0xff]   ;;  %v4172_v40 = vld [vmem:[%s5540_s1 + $0xc14] ss:$8 sps:$4 sm:$0xff]  }
 0x149   :  { %3032 = vmatprep.subr.bf16.mxu0 %v4088_v43  ;;  %v4206_v43 = vmov 0  }
 0x14b   :  { %2787 = vmatpush1.bf16.msra.mxu1 %v4083_v4  ;;  %v4173_v4 = vld [vmem:[%s5540_s1 + $0xc20] ss:$8 sps:$4 sm:$0xff]  }
 0x14c   :  { %3033 = vmatpush1.bf16.msra.mxu0 %v4086_v5  ;;  %2788 = vmatprep.subr.bf16.mxu1 %v4091_v6  ;;  %v4178_v5 = vld [vmem:[%s5540_s1 + $0xc34] ss:$8 sps:$4 sm:$0xff]   ;;  %v4176_v6 = vld [vmem:[%s5540_s1 + $0xc30] ss:$8 sps:$4 sm:$0xff]  }
 0x14d   :  { %3034 = vmatprep.subr.bf16.mxu0 %v4094_v7  ;;  %v3142_v7 = vld.sshfl [vmem:[%s5539_s0 + $0x18] sm:$0x1 pattern:$0x75316420]  ;;  %s4207_s0 = smov [#allocation2]  }
 0x14e   :  { %s3134_s1 = sshll.u32 %s4207_s0, 4  ;;  %s3135_s1 = int_to_ptr.vmem [resolvable:$true] %s3134_s1 }
 0x14f   :  { %2789 = vmatpush1.bf16.msra.mxu1 %v4089_v8  ;;  %v588_v8 = vrot.slane %v3142_v7, %v4363_v49  ;;  %p4186_p1 = scmp.lt.s32.totalorder %s3135_s1, %s3135_s1 }
 0x150   :  { %3035 = vmatpush1.bf16.msra.mxu0 %v4092_v9  ;;  %2790 = vmatprep.subr.bf16.mxu1 %v4097_v10 }
 0x151   :  { %3036 = vmatprep.subr.bf16.mxu0 %v4100_v11 }
 0x153   :  { %2791 = vmatpush1.bf16.msra.mxu1 %v4095_v12 }
 0x154   :  { %3037 = vmatpush1.bf16.msra.mxu0 %v4098_v13  ;;  %2792 = vmatprep.subr.bf16.mxu1 %v4103_v14  ;;  %v416_v13 = vsub.s32 0, %v4345_v42  ;;  %v412_v14 = vld [vmem:[%s5541_s2] sm:$0x3]  ;;  %s4181_s2 = scalar_lea.vmem %s3135_s1, 64 }
 0x155   :  { %3038 = vmatprep.subr.bf16.mxu0 %v4106_v15  ;;  %v420_v15 = vsub.s32 1, %v4345_v42  ;;  %p4182_p0 = scmp.ne.s32.totalorder %s3135_s1, %s4181_s2  ;;  %p4187_p2 = scmp.lt.s32.totalorder %s4181_s2, %s4181_s2 }
 0x157   :  { %2793 = vmatpush1.bf16.msra.mxu1 %v4101_v16  ;;  %v417_v16 = vrot.slane %v412_v14, %v416_v13  ;;  %p4188_p3 = por %p4187_p2, %p4186_p1 }
 0x158   :  { %3039 = vmatpush1.bf16.msra.mxu0 %v4104_v19  ;;  %2794 = vmatprep.subr.bf16.mxu1 %v4109_v20  ;;  %v421_v19 = vrot.slane %v412_v14, %v420_v15 }
 0x159   :  { %3040 = vmatprep.subr.bf16.mxu0 %v4112_v21  ;;  %p4189_p4 = pnand %p4188_p3, %p4182_p0 }
 0x15b   :  { %2795 = vmatpush1.bf16.msra.mxu1 %v4107_v52 }
 0x15c   :  { %3041 = vmatpush1.bf16.msra.mxu0 %v4110_v23  ;;  %2796 = vmatprep.subr.bf16.mxu1 %v4115_v24 }
 0x15d   :  { %3042 = vmatprep.subr.bf16.mxu0 %v4118_v25 }
 0x15f   :  { %2797 = vmatpush1.bf16.msra.mxu1 %v4113_v26 }
 0x160   :  { %3043 = vmatpush1.bf16.msra.mxu0 %v4116_v27  ;;  %2798 = vmatprep.subr.bf16.mxu1 %v4121_v28 }
 0x161   :  { %3044 = vmatprep.subr.bf16.mxu0 %v4124_v29 }
 0x163   :  { %2799 = vmatpush1.bf16.msra.mxu1 %v4119_v30 }
 0x164   :  { %3045 = vmatpush1.bf16.msra.mxu0 %v4122_v31  ;;  %2800 = vmatprep.subr.bf16.mxu1 %v4127_v32 }
 0x165   :  { %3046 = vmatprep.subr.bf16.mxu0 %v4130_v17 }
 0x167   :  { %2801 = vmatpush1.bf16.msra.mxu1 %v4125_v34 }
 0x168   :  { %3047 = vmatpush1.bf16.msra.mxu0 %v4128_v36  ;;  %2802 = vmatprep.subr.bf16.mxu1 %v4133_v37 }
 0x169   :  { %3048 = vmatprep.subr.bf16.mxu0 %v4136_v38 }
 0x16b   :  { %2803 = vmatpush1.bf16.msra.mxu1 %v4131_v39 }
 0x16c   :  { %3049 = vmatpush1.bf16.msra.mxu0 %v4134_v44  ;;  %2804 = vmatprep.subr.bf16.mxu1 %v4139_v45 }
 0x16d   :  { %3050 = vmatprep.subr.bf16.mxu0 %v4142_v33 }
 0x16f   :  { %2805 = vmatpush1.bf16.msra.mxu1 %v4137_v46 }
 0x170   :  { %3051 = vmatpush1.bf16.msra.mxu0 %v4140_v47  ;;  %2806 = vmatprep.subr.bf16.mxu1 %v4145_v48 }
 0x171   :  { %3052 = vmatprep.subr.bf16.mxu0 %v4148_v18 }
 0x173   :  { %2807 = vmatpush1.bf16.msra.mxu1 %v4143_v41 }
 0x174   :  { %3053 = vmatpush1.bf16.msra.mxu0 %v4146_v50  ;;  %2808 = vmatprep.subr.bf16.mxu1 %v4151_v51 }
 0x175   :  { %3054 = vmatprep.subr.bf16.mxu0 %v4154_v53 }
 0x177   :  { %2809 = vmatpush1.bf16.msra.mxu1 %v4149_v54 }
 0x178   :  { %3055 = vmatpush1.bf16.msra.mxu0 %v4152_v55  ;;  %2810 = vmatprep.subr.bf16.mxu1 %v4157_v56 }
 0x179   :  { %3056 = vmatprep.subr.bf16.mxu0 %v4160_v57 }
 0x17b   :  { %2811 = vmatpush1.bf16.msra.mxu1 %v4155_v58 }
 0x17c   :  { %3057 = vmatpush1.bf16.msra.mxu0 %v4158_v59  ;;  %2812 = vmatprep.subr.bf16.mxu1 %v4163_v62 }
 0x17d   :  { %3058 = vmatprep.subr.bf16.mxu0 %v4166_v63 }
 0x17f   :  { %2813 = vmatpush1.bf16.msra.mxu1 %v4161_v22 }
 0x180   :  { %3059 = vmatpush1.bf16.msra.mxu0 %v4164_v35 }
 0x181   :  { %3069 = vmatprep.subr.bf16.mxu0 %v4169_v0 }
 0x182   :  { %2815 = vmatmul.mubr.bf16.vlgmr.msra.gmra.mrb[0].mxu1 %v522_v1 }
 0x183   :  { %3061 = vmatmul.mubr.bf16.vlgmr.msra.gmra.mrb[0].mxu0 %v572_v2 }
 0x184   :  { %3070 = vmatpush1.bf16.msra.mxu0 %v4167_v3  ;;  %3101 = vmatprep.mubr.bf16.mxu0 %v4206_v43 }
 0x185   :  { %3071 = vmatprep.subr.bf16.mxu0 %v4172_v40 }
 0x188   :  { %3072 = vmatpush1.bf16.msra.mxu0 %v4170_v60 }
 0x189   :  { %3073 = vmatprep.subr.bf16.mxu0 %v4175_v61 }
 0x18c   :  { %3074 = vmatpush1.bf16.msra.mxu0 %v4173_v4 }
 0x18d   :  { %3075 = vmatprep.subr.bf16.mxu0 %v4178_v5 }
 0x190   :  { %3076 = vmatpush1.bf16.msra.mxu0 %v4176_v6 }
 0x193   :  { %3535 = vmatmul.mubr.msk.bf16.vlgmr.msra.gmra.mrb[0].mxu0 %vm2573_vm0, %v588_v8 }
 0x255   :  { %v2816_v9 = vpop.f32.mrb[0].mxu1 }
 0x256   :  { %v2818_v10 = vpop.f32.mrb[1].mxu1  ;;  %v3537_v20 = vadd.f32 %v2816_v9, %v417_v16 }
 0x257   :  { %v2820_v11 = vpop.f32.mrb[2].mxu1  ;;  %v3539_v21 = vadd.f32 %v2818_v10, %v421_v19 }
 0x258   :  { %v2821_v12 = vpop.f32.mrb[3].mxu1 }
 0x266   :  { %v3103_v49 = vpop.f32.mrb[0].mxu0 }
 0x267   :  { %v3538_v52 = vadd.f32 %v3537_v20, %v3103_v49  ;;  %v3105_v23 = vpop.f32.mrb[1].mxu0 }
 0x268   :  { %v3540_v24 = vadd.f32 %v3539_v21, %v3105_v23  ;;  %v3107_v25 = vpop.f32.mrb[2].mxu0 }
 0x269   :  { %vm3110_vm1 = vcmp.ge.f32.partialorder %v3538_v52, 0.0  ;;  %v3112_v26 = vmul.f32 0.01, %v3538_v52  ;;  %v3108_v27 = vpop.f32.mrb[3].mxu0 }
 0x26a   :  { %vm3111_vm2 = vcmp.ge.f32.partialorder %v3540_v24, 0.0  ;;  %v3113_v28 = vmul.f32 0.01, %v3540_v24 }
 0x26b   :  { %v3114_v29 = vsel %vm3110_vm1, %v3538_v52, %v3112_v26 }
 0x26c   :  { %v3115_v30 = vsel %vm3111_vm2, %v3540_v24, %v3113_v28 }
 0x26d   :  { %v3118_v31 = vcombine.low %v3114_v29, %v3115_v30 }
 0x26f   :  { %3536 = vst.sshfl [vmem:[#allocation2] sm:$0x33 pattern:$0x76325410] %v3118_v31 }
 0x270   :  { %4192 = shalt.err (!%p4189_p4)
}
 0x271   :  { %s4193_s27 = scalar_lea.hbm %s5542_s3, 64 }
 0x272   :  { %p4194_p5 = scmp.ne.s32.totalorder %s5542_s3, %s4193_s27  ;;  %p4197_p6 = scmp.lt.u32.totalorder %s4193_s27, %s5542_s3 }
 0x274   :  { %p4199_p7 = pnand %p4197_p6, %p4194_p5 }
 0x276   :  { %4202 = shalt.err (!%p4199_p7)
}
 0x277   :  { %3137 = dma.vmem_to_hbm [thread:$0]  %s3135_s1, 64, %s5542_s3, [#allocation3]  }
 0x278   :  { %4203 = dma.done.wait [#allocation3], 64  }
 0x279   :  { %4204 = vsyncadd [#allocation3], 4294967232 }
 0x27a   :  { %3141 = vsyncpa [#allocation3], 1 }

</bundles_post_ra>
